<compile_context>
chip_gen: v5e
topology: v5e:2x2
jax: 0.10.0
libtpu: 0.0.40
codegen_flags: <defaults>
</compile_context>

<pallas_src>
import jax
import jax.numpy as jnp
from jax.experimental import pallas as pl
from jax.experimental.pallas import tpu as pltpu

CANAIS = 1
ALTURA = 32
LARGURA = 32
D_IN = CANAIS * LARGURA * ALTURA          # 1024
D_HID = LARGURA * ALTURA // 2             # 512
D_OUT = 1

TB = 8                                    # batch rows per grid step (sublane-aligned)


def _sigmoid(z):
    # 1/(1+exp(-z)): safe in f32 (exp overflow -> inf still yields the correct 0.0).
    return 1.0 / (1.0 + jnp.exp(-z))


def _discriminator_kernel(x_ref, w1_ref, b1_ref, w2_ref, b2_ref, w3_ref, b3_ref, o_ref):
    # x_ref: (TB, 1024) f32; w1/w2: bf16 (in, out), resident across the grid;
    # w3: (1, 512) f32 row; biases f32; all accumulation in f32.
    x = x_ref[...].astype(jnp.bfloat16)

    # linear1 + ReLU  (bf16 x bf16 -> f32 on the MXU)
    h1 = jnp.dot(x, w1_ref[...], preferred_element_type=jnp.float32) + b1_ref[...]
    h1 = jnp.maximum(h1, 0.0)

    # linear2 + ReLU
    h2 = jnp.dot(h1.astype(jnp.bfloat16), w2_ref[...],
                 preferred_element_type=jnp.float32) + b2_ref[...]
    h2 = jnp.maximum(h2, 0.0)

    # linear3 + sigmoid: (TB,512) * (1,512) broadcast + lane reduction (VPU/XLU).
    z = jnp.sum(h2 * w3_ref[...], axis=-1, keepdims=True) + b3_ref[...]
    o_ref[...] = _sigmoid(z)


def discriminator_linear(x, params):
    """x: NCHW (B, 1, 32, 32) float32.  Returns (B, 1); row b is exactly the
    PyTorch module's (1,)-shaped forward output for sample b."""
    w1, b1, w2, b2, w3, b3 = params
    B = x.shape[0]
    x_rows = x.reshape(B, D_IN).astype(jnp.float32)

    # Pad batch to a multiple of the sublane tile; padded rows are zeros and
    # their outputs are discarded below.
    b_pad = pl.cdiv(B, TB) * TB
    if b_pad != B:
        x_rows = jnp.pad(x_rows, ((0, b_pad - B), (0, 0)))

    const2 = lambda b: (0, 0)   # parameters: same block every grid step -> VMEM-resident

    out = pl.pallas_call(
        _discriminator_kernel,
        out_shape=jax.ShapeDtypeStruct((b_pad, D_OUT), jnp.float32),
        grid_spec=pltpu.PrefetchScalarGridSpec(
            num_scalar_prefetch=0,
            grid=(b_pad // TB,),
            in_specs=[
                pl.BlockSpec((TB, D_IN), lambda b: (b, 0)),     # x: new tile per step
                pl.BlockSpec((D_IN, D_IN), const2),             # w1 (bf16, resident)
                pl.BlockSpec((1, D_IN), const2),                # b1
                pl.BlockSpec((D_IN, D_HID), const2),            # w2 (bf16, resident)
                pl.BlockSpec((1, D_HID), const2),               # b2
                pl.BlockSpec((1, D_HID), const2),               # w3 row
                pl.BlockSpec((1, D_OUT), const2),               # b3
            ],
            out_specs=pl.BlockSpec((TB, D_OUT), lambda b: (b, 0)),
        ),
        compiler_params=pltpu.CompilerParams(
            # "parallel" lets v7x shard batch tiles across its 2 TensorCores
            # (each core keeps its own ~3 MiB weight copy resident in VMEM).
            dimension_semantics=("parallel",),
            # ~6.2 MiB actually used (weights double-buffered + tiles); 16 MiB is
            # comfortable headroom on every generation incl. v7x's smaller VMEM.
            vmem_limit_bytes=16 * 1024 * 1024,
        ),
    )(x_rows, w1, b1, w2, b2, w3, b3)

    return out[:B]


def init_params_f32(key):
    """nn.Linear-style init, stored in kernel layout: (in, out) weights, (1, out)
    biases, w3 stored as a (1, D_HID) row.  All float32."""
    k1, k2, k3, k4, k5, k6 = jax.random.split(key, 6)

    def _w(k, fan_in, fan_out):
        bound = 1.0 / jnp.sqrt(fan_in)
        return jax.random.uniform(k, (fan_in, fan_out), jnp.float32, -bound, bound)

    def _b(k, fan_in, fan_out):
        bound = 1.0 / jnp.sqrt(fan_in)
        return jax.random.uniform(k, (1, fan_out), jnp.float32, -bound, bound)

    w1 = _w(k1, D_IN, D_IN)
    b1 = _b(k2, D_IN, D_IN)
    w2 = _w(k3, D_IN, D_HID)
    b2 = _b(k4, D_IN, D_HID)
    w3 = _w(k5, D_HID, D_OUT).reshape(1, D_HID)   # row layout for the VPU reduction
    b3 = _b(k6, D_HID, D_OUT)
    return (w1, b1, w2, b2, w3, b3)


def prepare_params(params_f32):
    """Cast the two large weight matrices to bf16 for HBM storage / MXU feed;
    biases, w3 row and all accumulation stay f32.  (Note: bf16 weights deviate
    slightly from the PyTorch module's f32 math; validated loosely below.)"""
    w1, b1, w2, b2, w3, b3 = params_f32
    return (w1.astype(jnp.bfloat16), b1, w2.astype(jnp.bfloat16), b2, w3, b3)


def _reference_bf16(x, params_bf16):
    """Pure-JAX reference of exactly the math the kernel performs (bf16 weights,
    f32 accumulation), batched."""
    w1, b1, w2, b2, w3, b3 = params_bf16
    B = x.shape[0]
    v = x.reshape(B, D_IN).astype(jnp.bfloat16)
    h1 = jnp.maximum(jnp.dot(v, w1, preferred_element_type=jnp.float32) + b1, 0.0)
    h2 = jnp.maximum(jnp.dot(h1.astype(jnp.bfloat16), w2,
                             preferred_element_type=jnp.float32) + b2, 0.0)
    z = jnp.sum(h2 * w3, axis=-1, keepdims=True) + b3
    return _sigmoid(z)


def _reference_f32(x, params_f32):
    """Full-precision reference of the original module semantics, batched."""
    w1, b1, w2, b2, w3, b3 = params_f32
    B = x.shape[0]
    v = x.reshape(B, D_IN)
    h1 = jnp.maximum(v @ w1 + b1, 0.0)
    h2 = jnp.maximum(h1 @ w2 + b2, 0.0)
    z = jnp.sum(h2 * w3, axis=-1, keepdims=True) + b3
    return jax.nn.sigmoid(z)


if __name__ == "__main__":
    key = jax.random.PRNGKey(0)
    k_x, k_p = jax.random.split(key)

    # Batched NCHW input; each sample flattens to exactly 1*32*32 = 1024 features,
    # as the module's forward requires.
    BATCH = 2
    x = jax.random.normal(k_x, (BATCH, CANAIS, ALTURA, LARGURA), jnp.float32)
    params_f32 = init_params_f32(k_p)
    params = prepare_params(params_f32)

    y = discriminator_linear(x, params)
    y = jax.block_until_ready(y)
    assert y.shape == (BATCH, D_OUT), y.shape

    # Check against the bf16-weight reference (same math as the kernel).  Tolerance
    # is sized for sigmoid outputs in [0,1] and MXU accumulation-order drift.
    y_ref = _reference_bf16(x, params)
    assert jnp.allclose(y, y_ref, atol=2e-3, rtol=1e-3), (y, y_ref)

    # Loose check against the original f32 module semantics (bf16 weight
    # quantization only perturbs the sigmoid output slightly).
    y_full = _reference_f32(x, params_f32)
    assert jnp.allclose(y, y_full, atol=5e-2, rtol=5e-2), (y, y_full)

    print("KERNEL_OK")
</pallas_src>

<mosaic_0001>
module attributes {stable_mosaic.version = 11 : i64} {
  func.func @_discriminator_kernel(%arg0: i32, %arg1: memref<8x1024xf32, #tpu.memory_space<vmem>>, %arg2: memref<1024x1024xbf16, #tpu.memory_space<vmem>>, %arg3: memref<1x1024xf32, #tpu.memory_space<vmem>>, %arg4: memref<1024x512xbf16, #tpu.memory_space<vmem>>, %arg5: memref<1x512xf32, #tpu.memory_space<vmem>>, %arg6: memref<1x512xf32, #tpu.memory_space<vmem>>, %arg7: memref<1x1xf32, #tpu.memory_space<vmem>>, %arg8: memref<8x1xf32, #tpu.memory_space<vmem>>) attributes {dimension_semantics = [#tpu.dimension_semantics<parallel>], iteration_bounds = array<i64: 1>, scalar_prefetch = 0 : i64, scratch_operands = 0 : i64, tpu.core_type = #tpu.core_type<tc>, window_params = [{transform_indices = @transform_0, window_bounds = array<i64: 8, 1024>}, {pipeline_mode = #tpu.pipeline_mode<synchronous>, transform_indices = @transform_1, window_bounds = array<i64: 1024, 1024>}, {pipeline_mode = #tpu.pipeline_mode<synchronous>, transform_indices = @transform_2, window_bounds = array<i64: 1, 1024>}, {pipeline_mode = #tpu.pipeline_mode<synchronous>, transform_indices = @transform_3, window_bounds = array<i64: 1024, 512>}, {pipeline_mode = #tpu.pipeline_mode<synchronous>, transform_indices = @transform_4, window_bounds = array<i64: 1, 512>}, {pipeline_mode = #tpu.pipeline_mode<synchronous>, transform_indices = @transform_5, window_bounds = array<i64: 1, 512>}, {pipeline_mode = #tpu.pipeline_mode<synchronous>, transform_indices = @transform_6, window_bounds = array<i64: 1, 1>}, {transform_indices = @transform_7, window_bounds = array<i64: 8, 1>}]} {
    %c0 = arith.constant 0 : index
    %c0_0 = arith.constant 0 : index
    %0 = vector.load %arg1[%c0, %c0_0] : memref<8x1024xf32, #tpu.memory_space<vmem>>, vector<8x1024xf32>
    %1 = arith.truncf %0 : vector<8x1024xf32> to vector<8x1024xbf16>
    %c0_1 = arith.constant 0 : index
    %c0_2 = arith.constant 0 : index
    %2 = vector.load %arg2[%c0_1, %c0_2] : memref<1024x1024xbf16, #tpu.memory_space<vmem>>, vector<1024x1024xbf16>
    %cst = arith.constant dense<0.000000e+00> : vector<8x1024xf32>
    %3 = tpu.matmul %1, %2, %cst {dimension_numbers = #tpu.dot_dimension_numbers<[1], [0], [0], [1], [0, 0, 1, 1], [], []>} : vector<8x1024xbf16>, vector<1024x1024xbf16>, vector<8x1024xf32> -> vector<8x1024xf32>
    %c0_3 = arith.constant 0 : index
    %c0_4 = arith.constant 0 : index
    %4 = vector.load %arg3[%c0_3, %c0_4] : memref<1x1024xf32, #tpu.memory_space<vmem>>, vector<1x1024xf32>
    %5 = vector.broadcast %4 : vector<1x1024xf32> to vector<8x1024xf32>
    %6 = arith.addf %3, %5 : vector<8x1024xf32>
    %cst_5 = arith.constant 0.000000e+00 : f32
    %7 = vector.broadcast %cst_5 : f32 to vector<8x1024xf32>
    %8 = arith.maximumf %6, %7 : vector<8x1024xf32>
    %9 = arith.truncf %8 : vector<8x1024xf32> to vector<8x1024xbf16>
    %c0_6 = arith.constant 0 : index
    %c0_7 = arith.constant 0 : index
    %10 = vector.load %arg4[%c0_6, %c0_7] : memref<1024x512xbf16, #tpu.memory_space<vmem>>, vector<1024x512xbf16>
    %cst_8 = arith.constant dense<0.000000e+00> : vector<8x512xf32>
    %11 = tpu.matmul %9, %10, %cst_8 {dimension_numbers = #tpu.dot_dimension_numbers<[1], [0], [0], [1], [0, 0, 1, 1], [], []>} : vector<8x1024xbf16>, vector<1024x512xbf16>, vector<8x512xf32> -> vector<8x512xf32>
    %c0_9 = arith.constant 0 : index
    %c0_10 = arith.constant 0 : index
    %12 = vector.load %arg5[%c0_9, %c0_10] : memref<1x512xf32, #tpu.memory_space<vmem>>, vector<1x512xf32>
    %13 = vector.broadcast %12 : vector<1x512xf32> to vector<8x512xf32>
    %14 = arith.addf %11, %13 : vector<8x512xf32>
    %cst_11 = arith.constant 0.000000e+00 : f32
    %15 = vector.broadcast %cst_11 : f32 to vector<8x512xf32>
    %16 = arith.maximumf %14, %15 : vector<8x512xf32>
    %c0_12 = arith.constant 0 : index
    %c0_13 = arith.constant 0 : index
    %17 = vector.load %arg6[%c0_12, %c0_13] : memref<1x512xf32, #tpu.memory_space<vmem>>, vector<1x512xf32>
    %18 = vector.broadcast %17 : vector<1x512xf32> to vector<8x512xf32>
    %19 = arith.mulf %16, %18 : vector<8x512xf32>
    %cst_14 = arith.constant dense<0.000000e+00> : vector<8xf32>
    %20 = vector.multi_reduction <add>, %19, %cst_14 [1] : vector<8x512xf32> to vector<8xf32>
    %21 = vector.shape_cast %20 : vector<8xf32> to vector<8x1xf32>
    %c0_15 = arith.constant 0 : index
    %c0_16 = arith.constant 0 : index
    %22 = vector.load %arg7[%c0_15, %c0_16] : memref<1x1xf32, #tpu.memory_space<vmem>>, vector<1x1xf32>
    %23 = vector.broadcast %22 : vector<1x1xf32> to vector<8x1xf32>
    %24 = arith.addf %21, %23 : vector<8x1xf32>
    %cst_17 = arith.constant 0.000000e+00 : f32
    %25 = vector.broadcast %cst_17 : f32 to vector<8x1xf32>
    %26 = arith.subf %25, %24 : vector<8x1xf32>
    %27 = math.exp %26 : vector<8x1xf32>
    %cst_18 = arith.constant 1.000000e+00 : f32
    %28 = vector.broadcast %cst_18 : f32 to vector<8x1xf32>
    %29 = arith.addf %28, %27 : vector<8x1xf32>
    %cst_19 = arith.constant 1.000000e+00 : f32
    %30 = vector.broadcast %cst_19 : f32 to vector<8x1xf32>
    %31 = arith.divf %30, %29 : vector<8x1xf32>
    %c0_20 = arith.constant 0 : index
    %c0_21 = arith.constant 0 : index
    %32 = vector.load %arg8[%c0_20, %c0_21] : memref<8x1xf32, #tpu.memory_space<vmem>>, vector<8x1xf32>
    tpu.vector_store %arg8[%c0_20, %c0_21], %31 {strides = array<i32>} : memref<8x1xf32, #tpu.memory_space<vmem>>, vector<8x1xf32>,
    return
  }
  func.func @transform_0(%arg0: i32) -> (i32, i32) {
    %c0_i32 = arith.constant 0 : i32
    %c0_i32_0 = arith.constant 0 : i32
    return %arg0, %c0_i32 : i32, i32
  }
  func.func @transform_1(%arg0: i32) -> (i32, i32) {
    %c0_i32 = arith.constant 0 : i32
    %c0_i32_0 = arith.constant 0 : i32
    %c0_i32_1 = arith.constant 0 : i32
    return %c0_i32, %c0_i32_0 : i32, i32
  }
  func.func @transform_2(%arg0: i32) -> (i32, i32) {
    %c0_i32 = arith.constant 0 : i32
    %c0_i32_0 = arith.constant 0 : i32
    %c0_i32_1 = arith.constant 0 : i32
    return %c0_i32, %c0_i32_0 : i32, i32
  }
  func.func @transform_3(%arg0: i32) -> (i32, i32) {
    %c0_i32 = arith.constant 0 : i32
    %c0_i32_0 = arith.constant 0 : i32
    %c0_i32_1 = arith.constant 0 : i32
    return %c0_i32, %c0_i32_0 : i32, i32
  }
  func.func @transform_4(%arg0: i32) -> (i32, i32) {
    %c0_i32 = arith.constant 0 : i32
    %c0_i32_0 = arith.constant 0 : i32
    %c0_i32_1 = arith.constant 0 : i32
    return %c0_i32, %c0_i32_0 : i32, i32
  }
  func.func @transform_5(%arg0: i32) -> (i32, i32) {
    %c0_i32 = arith.constant 0 : i32
    %c0_i32_0 = arith.constant 0 : i32
    %c0_i32_1 = arith.constant 0 : i32
    return %c0_i32, %c0_i32_0 : i32, i32
  }
  func.func @transform_6(%arg0: i32) -> (i32, i32) {
    %c0_i32 = arith.constant 0 : i32
    %c0_i32_0 = arith.constant 0 : i32
    %c0_i32_1 = arith.constant 0 : i32
    return %c0_i32, %c0_i32_0 : i32, i32
  }
  func.func @transform_7(%arg0: i32) -> (i32, i32) {
    %c0_i32 = arith.constant 0 : i32
    %c0_i32_0 = arith.constant 0 : i32
    return %arg0, %c0_i32 : i32, i32
  }
}

</mosaic_0001>

<bundles_post_ra>
// kernel: tpu_custom_call.1
= control target key start
LH: loop header
LB: loop body
LE: loop exit
PB: predicated region body
PF: predicated region fallthrough
CT: control target
= control target key end

     0   :  { %s10420_s0 = inlined_call_operand.hbm [shape: f32[8,1024], index: 0, kind: input, shape index: {}]   ;;  %s10421_s1 = inlined_call_operand.hbm [shape: bf16[1024,1024], index: 1, kind: input, shape index: {}]   ;;  %s10422_s2 = inlined_call_operand.hbm [shape: f32[1,1024], index: 2, kind: input, shape index: {}]   ;;  %s10423_s3 = inlined_call_operand.hbm [shape: bf16[1024,512], index: 3, kind: input, shape index: {}]   ;;  %s10424_s4 = inlined_call_operand.hbm [shape: f32[1,512], index: 4, kind: input, shape index: {}]   ;;  %s10425_s5 = inlined_call_operand.hbm [shape: f32[1,512], index: 5, kind: input, shape index: {}]   ;;  %s10426_s6 = inlined_call_operand.<no memory space> [shape: f32[1,1], index: 6, kind: input, shape index: {}]   ;;  %s10427_s7 = inlined_call_operand.vmem [shape: f32[8,1], index: 7, kind: output, shape index: {}]  }
   0x1   :  { %v12_v0 = vstv %s10426_s6 }
   0x2   :  { %13 = vst [vmem:[#allocation2] sm:$0x1] %v12_v0 }
   0x3   :  { %14 = vsyncpa [#allocation4], 0 }
   0x4   :  { %15 = vsyncpa [#allocation6], 0 }
   0x5   :  { %16 = vsyncpa [#allocation9], 0  ;;  %s33_s28 = sshll.u32 %s10421_s1, 4  ;;  %s34_s28 = int_to_ptr.hbm [resolvable:$true] %s33_s28 }
   0x6   :  { %17 = vsyncpa [#allocation12], 0  ;;  %s10097_s29 = smov [#allocation5]   ;;  %s57_s10 = sshll.u32 %s10423_s3, 4  ;;  %s58_s10 = int_to_ptr.hbm [resolvable:$true] %s57_s10 }
   0x7   :  { %s35_s30 = sshll.u32 %s10097_s29, 4  ;;  %s10098_s11 = smov 512   ;;  %s36_s30 = int_to_ptr.vmem [resolvable:$true] %s35_s30 }
   0x8   :  { %s10099_s12 = smov 32   ;;  %s10100_s6 = smov [#allocation8]  }
   0x9   :  { %41 = dma.hbm_to_vmem [thread:$0]  %s34_s28, 65536, %s36_s30, [#allocation6], %s10098_s11, %s10098_s11, %s10099_s12  }
   0xa   :  { %s59_s13 = sshll.u32 %s10100_s6, 4  ;;  %s10101_s14 = smov 256   ;;  %s60_s13 = int_to_ptr.vmem [resolvable:$true] %s59_s13 }
   0xb   :  { %s10102_s15 = smov 16   ;;  %s23_s17 = sshll.u32 %s10420_s0, 4  ;;  %s24_s17 = int_to_ptr.hbm [resolvable:$true] %s23_s17 }
   0xc   :  { %65 = dma.hbm_to_vmem [thread:$0]  %s58_s10, 32768, %s60_s13, [#allocation9], %s10101_s14, %s10101_s14, %s10102_s15  }
   0xd   :  { %s10103_s18 = smov [#allocation3]   ;;  %s47_s21 = sshll.u32 %s10422_s2, 4  ;;  %s48_s21 = int_to_ptr.hbm [resolvable:$true] %s47_s21 }
   0xe   :  { %s25_s19 = sshll.u32 %s10103_s18, 4  ;;  %s10104_s22 = smov [#allocation7]   ;;  %s26_s19 = int_to_ptr.vmem [resolvable:$true] %s25_s19 }
   0xf   :  { %28 = dma.hbm_to_vmem [thread:$0]  %s24_s17, 1024, %s26_s19, [#allocation4]  }
  0x10   :  { %s49_s23 = sshll.u32 %s10104_s22, 4  ;;  %s71_s26 = sshll.u32 %s10424_s4, 4  ;;  %s50_s23 = int_to_ptr.vmem [resolvable:$true] %s49_s23  ;;  %s72_s26 = int_to_ptr.hbm [resolvable:$true] %s71_s26 }
  0x11   :  { %52 = dma.hbm_to_vmem [thread:$0]  %s48_s21, 128, %s50_s23, [#allocation6]  }
  0x12   :  { %s82_s28 = sshll.u32 %s10425_s5, 4  ;;  %s10105_s29 = smov [#allocation10]   ;;  %s83_s28 = int_to_ptr.hbm [resolvable:$true] %s82_s28 }
  0x13   :  { %s73_s30 = sshll.u32 %s10105_s29, 4  ;;  %s10106_s2 = smov [#allocation11]   ;;  %s74_s30 = int_to_ptr.vmem [resolvable:$true] %s73_s30 }
  0x14   :  { %76 = dma.hbm_to_vmem [thread:$0]  %s72_s26, 64, %s74_s30, [#allocation9]  }
  0x15   :  { %s84_s8 = sshll.u32 %s10106_s2, 4  ;;  %s85_s8 = int_to_ptr.vmem [resolvable:$true] %s84_s8 }
  0x16   :  { %87 = dma.hbm_to_vmem [thread:$0]  %s83_s28, 64, %s85_s8, [#allocation12]  }
  0x17   :  { %10089 = dma.done.wait [#allocation4], 1024  }
  0x18   :  { %10090 = vsyncadd [#allocation4], 4294966272 }
  0x19   :  { %10091 = dma.done.wait [#allocation6], 65664  }
  0x1a   :  { %10092 = vsyncadd [#allocation6], 4294901632 }
  0x1b   :  { %10093 = dma.done.wait [#allocation9], 32832  }
  0x1c   :  { %10094 = vsyncadd [#allocation9], 4294934464 }
  0x1d   :  { %10095 = dma.done.wait [#allocation12], 64  }
  0x1e   :  { %10096 = vsyncadd [#allocation12], 4294967232  ;;  %v6313_v1 = vld [vmem:[#allocation5 + $0x1c0] sm:$0xf]  ;;  %vm6077_vm3 = vcmask 7168  }
  0x1f   :  { %v9219_v2 = vld [vmem:[#allocation5 + $0x1dc] sm:$0xf0] }
  0x20   :  { %v6569_v3 = vld [vmem:[#allocation5 + $0x3c0] sm:$0xf]  ;;  %v6314_v4 = vor.u32 %v9219_v2, %v6313_v1 }
  0x21   :  { %v9283_v5 = vld [vmem:[#allocation5 + $0x3dc] sm:$0xf0] }
  0x22   :  { %v6825_v6 = vld [vmem:[#allocation5 + $0x5c0] sm:$0xf]  ;;  %v6570_v8 = vor.u32 %v9283_v5, %v6569_v3  ;;  %3220 = vmatpush.bf16.msra.mxu0 %v6314_v4 }
  0x23   :  { %v9347_v7 = vld [vmem:[#allocation5 + $0x5dc] sm:$0xf0] }
  0x24   :  { %v6826_v9 = vor.u32 %v9347_v7, %v6825_v6  ;;  %v7081_v10 = vld [vmem:[#allocation5 + $0x7c0] sm:$0xf]  ;;  %3233 = vmatpush.bf16.msra.mxu1 %v6570_v8 }
  0x25   :  { %v9411_v11 = vld [vmem:[#allocation5 + $0x7dc] sm:$0xf0] }
  0x26   :  { %v6281_v12 = vld [vmem:[#allocation5 + $0x180] sm:$0xf]  ;;  %v7082_v13 = vor.u32 %v9411_v11, %v7081_v10  ;;  %3246 = vmatpush.bf16.msra.mxu2 %v6826_v9 }
  0x27   :  { %v9211_v14 = vld [vmem:[#allocation5 + $0x19c] sm:$0xf0] }
  0x28   :  { %v6537_v15 = vld [vmem:[#allocation5 + $0x380] sm:$0xf]  ;;  %v6282_v17 = vor.u32 %v9211_v14, %v6281_v12  ;;  %3259 = vmatpush.bf16.msra.mxu3 %v7082_v13 }
  0x29   :  { %v9275_v16 = vld [vmem:[#allocation5 + $0x39c] sm:$0xf0] }
  0x2a   :  { %v6538_v18 = vor.u32 %v9275_v16, %v6537_v15  ;;  %v6793_v19 = vld [vmem:[#allocation5 + $0x580] sm:$0xf]  ;;  %3221 = vmatpush.bf16.msra.mxu0 %v6282_v17 }
  0x2b   :  { %v9339_v20 = vld [vmem:[#allocation5 + $0x59c] sm:$0xf0] }
  0x2c   :  { %v7049_v21 = vld [vmem:[#allocation5 + $0x780] sm:$0xf]  ;;  %v6794_v22 = vor.u32 %v9339_v20, %v6793_v19  ;;  %3234 = vmatpush.bf16.msra.mxu1 %v6538_v18 }
  0x2d   :  { %v9403_v23 = vld [vmem:[#allocation5 + $0x79c] sm:$0xf0] }
  0x2e   :  { %v6249_v24 = vld [vmem:[#allocation5 + $0x140] sm:$0xf]  ;;  %v7050_v26 = vor.u32 %v9403_v23, %v7049_v21  ;;  %3247 = vmatpush.bf16.msra.mxu2 %v6794_v22 }
  0x2f   :  { %v9203_v25 = vld [vmem:[#allocation5 + $0x15c] sm:$0xf0] }
  0x30   :  { %v6505_v27 = vld [vmem:[#allocation5 + $0x340] sm:$0xf]  ;;  %v6250_v30 = vor.u32 %v9203_v25, %v6249_v24  ;;  %3260 = vmatpush.bf16.msra.mxu3 %v7050_v26 }
  0x31   :  { %v9267_v28 = vld [vmem:[#allocation5 + $0x35c] sm:$0xf0] }
  0x32   :  { %v6761_v29 = vld [vmem:[#allocation5 + $0x540] sm:$0xf]  ;;  %v6506_v34 = vor.u32 %v9267_v28, %v6505_v27  ;;  %3222 = vmatpush.bf16.msra.mxu0 %v6250_v30 }
  0x33   :  { %v9331_v31 = vld [vmem:[#allocation5 + $0x55c] sm:$0xf0] }
  0x34   :  { %v7017_v32 = vld [vmem:[#allocation5 + $0x740] sm:$0xf]  ;;  %v6762_v35 = vor.u32 %v9331_v31, %v6761_v29  ;;  %3235 = vmatpush.bf16.msra.mxu1 %v6506_v34 }
  0x35   :  { %v9395_v33 = vld [vmem:[#allocation5 + $0x75c] sm:$0xf0] }
  0x36   :  { %v6217_v36 = vld [vmem:[#allocation5 + $0x100] sm:$0xf]  ;;  %v7018_v39 = vor.u32 %v9395_v33, %v7017_v32  ;;  %3248 = vmatpush.bf16.msra.mxu2 %v6762_v35 }
  0x37   :  { %v9195_v37 = vld [vmem:[#allocation5 + $0x11c] sm:$0xf0] }
  0x38   :  { %v6473_v38 = vld [vmem:[#allocation5 + $0x300] sm:$0xf]  ;;  %v6218_v45 = vor.u32 %v9195_v37, %v6217_v36  ;;  %3261 = vmatpush.bf16.msra.mxu3 %v7018_v39 }
  0x39   :  { %v9259_v40 = vld [vmem:[#allocation5 + $0x31c] sm:$0xf0] }
  0x3a   :  { %v6729_v41 = vld [vmem:[#allocation5 + $0x500] sm:$0xf]  ;;  %v6474_v46 = vor.u32 %v9259_v40, %v6473_v38  ;;  %3223 = vmatpush.bf16.msra.mxu0 %v6218_v45 }
  0x3b   :  { %v9323_v42 = vld [vmem:[#allocation5 + $0x51c] sm:$0xf0] }
  0x3c   :  { %v6985_v43 = vld [vmem:[#allocation5 + $0x700] sm:$0xf]  ;;  %v6730_v47 = vor.u32 %v9323_v42, %v6729_v41  ;;  %3236 = vmatpush.bf16.msra.mxu1 %v6474_v46 }
  0x3d   :  { %v9387_v44 = vld [vmem:[#allocation5 + $0x71c] sm:$0xf0] }
  0x3e   :  { %v6185_v48 = vld [vmem:[#allocation5 + $0xc0] sm:$0xf]  ;;  %v6986_v51 = vor.u32 %v9387_v44, %v6985_v43  ;;  %3249 = vmatpush.bf16.msra.mxu2 %v6730_v47 }
  0x3f   :  { %v9187_v49 = vld [vmem:[#allocation5 + $0xdc] sm:$0xf0] }
  0x40   :  { %v6441_v50 = vld [vmem:[#allocation5 + $0x2c0] sm:$0xf]  ;;  %v6186_v57 = vor.u32 %v9187_v49, %v6185_v48  ;;  %3262 = vmatpush.bf16.msra.mxu3 %v6986_v51 }
  0x41   :  { %v9251_v52 = vld [vmem:[#allocation5 + $0x2dc] sm:$0xf0] }
  0x42   :  { %v6697_v53 = vld [vmem:[#allocation5 + $0x4c0] sm:$0xf]  ;;  %v6442_v58 = vor.u32 %v9251_v52, %v6441_v50  ;;  %3224 = vmatpush.bf16.msra.mxu0 %v6186_v57 }
  0x43   :  { %v9315_v54 = vld [vmem:[#allocation5 + $0x4dc] sm:$0xf0] }
  0x44   :  { %v6953_v55 = vld [vmem:[#allocation5 + $0x6c0] sm:$0xf]  ;;  %v6698_v59 = vor.u32 %v9315_v54, %v6697_v53  ;;  %3237 = vmatpush.bf16.msra.mxu1 %v6442_v58 }
  0x45   :  { %v9379_v56 = vld [vmem:[#allocation5 + $0x6dc] sm:$0xf0] }
  0x46   :  { %v6153_v60 = vld [vmem:[#allocation5 + $0x80] sm:$0xf]  ;;  %v6954_v63 = vor.u32 %v9379_v56, %v6953_v55  ;;  %3250 = vmatpush.bf16.msra.mxu2 %v6698_v59 }
  0x47   :  { %v9179_v61 = vld [vmem:[#allocation5 + $0x9c] sm:$0xf0] }
  0x48   :  { %v6409_v62 = vld [vmem:[#allocation5 + $0x280] sm:$0xf]  ;;  %v6154_v5 = vor.u32 %v9179_v61, %v6153_v60  ;;  %3263 = vmatpush.bf16.msra.mxu3 %v6954_v63 }
  0x49   :  { %v9243_v0 = vld [vmem:[#allocation5 + $0x29c] sm:$0xf0] }
  0x4a   :  { %v6665_v1 = vld [vmem:[#allocation5 + $0x480] sm:$0xf]  ;;  %v6410_v6 = vor.u32 %v9243_v0, %v6409_v62  ;;  %3225 = vmatpush.bf16.msra.mxu0 %v6154_v5 }
  0x4b   :  { %v9307_v2 = vld [vmem:[#allocation5 + $0x49c] sm:$0xf0] }
  0x4c   :  { %v6921_v3 = vld [vmem:[#allocation5 + $0x680] sm:$0xf]  ;;  %v6666_v7 = vor.u32 %v9307_v2, %v6665_v1  ;;  %3238 = vmatpush.bf16.msra.mxu1 %v6410_v6 }
  0x4d   :  { %v9371_v4 = vld [vmem:[#allocation5 + $0x69c] sm:$0xf0] }
  0x4e   :  { %v6121_v8 = vld [vmem:[#allocation5 + $0x40] sm:$0xf]  ;;  %v6922_v11 = vor.u32 %v9371_v4, %v6921_v3  ;;  %3251 = vmatpush.bf16.msra.mxu2 %v6666_v7  ;;  %v116_v4 = vld [vmem:[#allocation3 + $0x10] sm:$0xff] }
  0x4f   :  { %v9171_v9 = vld [vmem:[#allocation5 + $0x5c] sm:$0xf0] }
  0x50   :  { %v6377_v10 = vld [vmem:[#allocation5 + $0x240] sm:$0xf]  ;;  %v6122_v17 = vor.u32 %v9171_v9, %v6121_v8  ;;  %3264 = vmatpush.bf16.msra.mxu3 %v6922_v11  ;;  %v10168_v9 = vpack.c.bf16 %v116_v4, %v116_v4  ;;  %v117_v11 = vld [vmem:[#allocation3 + $0x18] sm:$0xff] }
  0x51   :  { %v9235_v12 = vld [vmem:[#allocation5 + $0x25c] sm:$0xf0] }
  0x52   :  { %v6633_v13 = vld [vmem:[#allocation5 + $0x440] sm:$0xf]  ;;  %v6378_v20 = vor.u32 %v9235_v12, %v6377_v10  ;;  %3226 = vmatpush.bf16.msra.mxu0 %v6122_v17 }
  0x53   :  { %v9299_v14 = vld [vmem:[#allocation5 + $0x45c] sm:$0xf0] }
  0x54   :  { %v6889_v15 = vld [vmem:[#allocation5 + $0x640] sm:$0xf]  ;;  %v6634_v21 = vor.u32 %v9299_v14, %v6633_v13  ;;  %3239 = vmatpush.bf16.msra.mxu1 %v6378_v20  ;;  %v115_v20 = vld [vmem:[#allocation3 + $0x8] sm:$0xff] }
  0x55   :  { %v9363_v16 = vld [vmem:[#allocation5 + $0x65c] sm:$0xf0] }
  0x56   :  { %v6089_v18 = vld [vmem:[#allocation5] sm:$0xf]  ;;  %v6890_v25 = vor.u32 %v9363_v16, %v6889_v15  ;;  %3252 = vmatpush.bf16.msra.mxu2 %v6634_v21  ;;  %v10172_v16 = vpack.c.bf16 %v117_v11, %v117_v11  ;;  %v6571_v11 = vld [vmem:[#allocation5 + $0x3e0] sm:$0xf0] }
  0x57   :  { %v9163_v19 = vld [vmem:[#allocation5 + $0x1c] sm:$0xf0] }
  0x58   :  { %v6345_v22 = vld [vmem:[#allocation5 + $0x200] sm:$0xf]  ;;  %v6090_v32 = vor.u32 %v9163_v19, %v6089_v18  ;;  %3265 = vmatpush.bf16.msra.mxu3 %v6890_v25 }
  0x59   :  { %v9227_v23 = vld [vmem:[#allocation5 + $0x21c] sm:$0xf0] }
  0x5a   :  { %v6601_v24 = vld [vmem:[#allocation5 + $0x400] sm:$0xf]  ;;  %v6346_v36 = vor.u32 %v9227_v23, %v6345_v22  ;;  %3227 = vmatpush.bf16.msra.mxu0 %v6090_v32 }
  0x5b   :  { %v9291_v26 = vld [vmem:[#allocation5 + $0x41c] sm:$0xf0] }
  0x5c   :  { %v6857_v27 = vld [vmem:[#allocation5 + $0x600] sm:$0xf]  ;;  %v6602_v37 = vor.u32 %v9291_v26, %v6601_v24  ;;  %3240 = vmatpush.bf16.msra.mxu1 %v6346_v36  ;;  %v10177_v26 = vpack.c.bf16 %v115_v20, %v115_v20 }
  0x5d   :  { %v9355_v28 = vld [vmem:[#allocation5 + $0x61c] sm:$0xf0] }
  0x5e   :  { %v7337_v29 = vld [vmem:[#allocation5 + $0x9c0] sm:$0xf]  ;;  %v6858_v40 = vor.u32 %v9355_v28, %v6857_v27  ;;  %3253 = vmatpush.bf16.msra.mxu2 %v6602_v37 }
  0x5f   :  { %v9475_v30 = vld [vmem:[#allocation5 + $0x9dc] sm:$0xf0]  ;;  %3241 = vmatmul.bf16.vlgmr.msra.gmra.mxu1 %v10177_v26 }
  0x60   :  { %v7593_v31 = vld [vmem:[#allocation5 + $0xbc0] sm:$0xf]  ;;  %v7338_v41 = vor.u32 %v9475_v30, %v7337_v29  ;;  %3266 = vmatpush.bf16.msra.mxu3 %v6858_v40 }
  0x61   :  { %v9539_v33 = vld [vmem:[#allocation5 + $0xbdc] sm:$0xf0]  ;;  %3254 = vmatmul.bf16.vlgmr.msra.gmra.mxu2 %v10168_v9 }
  0x62   :  { %v7849_v34 = vld [vmem:[#allocation5 + $0xdc0] sm:$0xf]  ;;  %v7594_v42 = vor.u32 %v9539_v33, %v7593_v31  ;;  %3272 = vmatpush.bf16.msrb.mxu0 %v7338_v41 }
  0x63   :  { %v9603_v35 = vld [vmem:[#allocation5 + $0xddc] sm:$0xf0]  ;;  %3267 = vmatmul.bf16.vlgmr.msra.gmra.mxu3 %v10172_v16 }
  0x64   :  { %v8105_v38 = vld [vmem:[#allocation5 + $0xfc0] sm:$0xf]  ;;  %v7850_v43 = vor.u32 %v9603_v35, %v7849_v34  ;;  %3285 = vmatpush.bf16.msrb.mxu1 %v7594_v42 }
  0x65   :  { %v9667_v39 = vld [vmem:[#allocation5 + $0xfdc] sm:$0xf0] }
  0x66   :  { %v7305_v44 = vld [vmem:[#allocation5 + $0x980] sm:$0xf]  ;;  %v8106_v47 = vor.u32 %v9667_v39, %v8105_v38  ;;  %3298 = vmatpush.bf16.msrb.mxu2 %v7850_v43 }
  0x67   :  { %v9467_v45 = vld [vmem:[#allocation5 + $0x99c] sm:$0xf0] }
  0x68   :  { %v7561_v46 = vld [vmem:[#allocation5 + $0xb80] sm:$0xf]  ;;  %v7306_v53 = vor.u32 %v9467_v45, %v7305_v44  ;;  %3311 = vmatpush.bf16.msrb.mxu3 %v8106_v47 }
  0x69   :  { %v9531_v48 = vld [vmem:[#allocation5 + $0xb9c] sm:$0xf0] }
  0x6a   :  { %v7817_v49 = vld [vmem:[#allocation5 + $0xd80] sm:$0xf]  ;;  %v7562_v55 = vor.u32 %v9531_v48, %v7561_v46  ;;  %3273 = vmatpush.bf16.msrb.mxu0 %v7306_v53 }
  0x6b   :  { %v9595_v50 = vld [vmem:[#allocation5 + $0xd9c] sm:$0xf0] }
  0x6c   :  { %v8073_v51 = vld [vmem:[#allocation5 + $0xf80] sm:$0xf]  ;;  %v7818_v56 = vor.u32 %v9595_v50, %v7817_v49  ;;  %3286 = vmatpush.bf16.msrb.mxu1 %v7562_v55 }
  0x6d   :  { %v9659_v52 = vld [vmem:[#allocation5 + $0xf9c] sm:$0xf0] }
  0x6e   :  { %v7273_v54 = vld [vmem:[#allocation5 + $0x940] sm:$0xf]  ;;  %v8074_v60 = vor.u32 %v9659_v52, %v8073_v51  ;;  %3299 = vmatpush.bf16.msrb.mxu2 %v7818_v56 }
  0x6f   :  { %v9459_v57 = vld [vmem:[#allocation5 + $0x95c] sm:$0xf0] }
  0x70   :  { %v7529_v58 = vld [vmem:[#allocation5 + $0xb40] sm:$0xf]  ;;  %v7274_v1 = vor.u32 %v9459_v57, %v7273_v54  ;;  %3312 = vmatpush.bf16.msrb.mxu3 %v8074_v60 }
  0x71   :  { %v9523_v59 = vld [vmem:[#allocation5 + $0xb5c] sm:$0xf0] }
  0x72   :  { %v7785_v61 = vld [vmem:[#allocation5 + $0xd40] sm:$0xf]  ;;  %v7530_v2 = vor.u32 %v9523_v59, %v7529_v58  ;;  %3274 = vmatpush.bf16.msrb.mxu0 %v7274_v1 }
  0x73   :  { %v9587_v62 = vld [vmem:[#allocation5 + $0xd5c] sm:$0xf0] }
  0x74   :  { %v8041_v63 = vld [vmem:[#allocation5 + $0xf40] sm:$0xf]  ;;  %v7786_v6 = vor.u32 %v9587_v62, %v7785_v61  ;;  %3287 = vmatpush.bf16.msrb.mxu1 %v7530_v2 }
  0x75   :  { %v9651_v0 = vld [vmem:[#allocation5 + $0xf5c] sm:$0xf0] }
  0x76   :  { %v7241_v3 = vld [vmem:[#allocation5 + $0x900] sm:$0xf]  ;;  %v8042_v12 = vor.u32 %v9651_v0, %v8041_v63  ;;  %3300 = vmatpush.bf16.msrb.mxu2 %v7786_v6  ;;  %v6315_v6 = vld [vmem:[#allocation5 + $0x1e0] sm:$0xf0] }
  0x77   :  { %v114_v5 = vld [vmem:[#allocation3] sm:$0xff] }
  0x78   :  { %v9451_v7 = vld [vmem:[#allocation5 + $0x91c] sm:$0xf0]  ;;  %v10170_v10 = vpack.c.bf16 %v114_v5, %v114_v5  ;;  %3313 = vmatpush.bf16.msrb.mxu3 %v8042_v12  ;;  %v9215_v5 = vld [vmem:[#allocation5 + $0x1c4] sm:$0xf] }
  0x79   :  { %v7497_v8 = vld [vmem:[#allocation5 + $0xb00] sm:$0xf]  ;;  %v7242_v19 = vor.u32 %v9451_v7, %v7241_v3  ;;  %v9279_v7 = vld [vmem:[#allocation5 + $0x3c4] sm:$0xf] }
  0x7a   :  { %v9515_v13 = vld [vmem:[#allocation5 + $0xb1c] sm:$0xf0]  ;;  %3228 = vmatmul.bf16.vlgmr.msra.gmra.mxu0 %v10170_v10  ;;  %v9343_v12 = vld [vmem:[#allocation5 + $0x5c4] sm:$0xf] }
  0x7b   :  { %v7753_v14 = vld [vmem:[#allocation5 + $0xd00] sm:$0xf]  ;;  %v7498_v21 = vor.u32 %v9515_v13, %v7497_v8  ;;  %3275 = vmatpush.bf16.msrb.mxu0 %v7242_v19  ;;  %v6827_v13 = vld [vmem:[#allocation5 + $0x5e0] sm:$0xf0]  ;;  %v120_v19 = vld [vmem:[#allocation3 + $0x30] sm:$0xff] }
  0x7c   :  { %v9579_v15 = vld [vmem:[#allocation5 + $0xd1c] sm:$0xf0] }
  0x7d   :  { %v8009_v17 = vld [vmem:[#allocation5 + $0xf00] sm:$0xf]  ;;  %v7754_v22 = vor.u32 %v9579_v15, %v7753_v14  ;;  %3288 = vmatpush.bf16.msrb.mxu1 %v7498_v21  ;;  %v6318_v21 = vor.u32 %v9215_v5, %v6315_v6  ;;  %v6187_v5 = vld [vmem:[#allocation5 + $0xe0] sm:$0xf0] }
  0x7e   :  { %v9643_v18 = vld [vmem:[#allocation5 + $0xf1c] sm:$0xf0]  ;;  %v9247_v6 = vld [vmem:[#allocation5 + $0x2c4] sm:$0xf] }
  0x7f   :  { %v7209_v23 = vld [vmem:[#allocation5 + $0x8c0] sm:$0xf]  ;;  %v8010_v27 = vor.u32 %v9643_v18, %v8009_v17  ;;  %3301 = vmatpush.bf16.msrb.mxu2 %v7754_v22  ;;  %v9407_v17 = vld [vmem:[#allocation5 + $0x7c4] sm:$0xf] }
  0x80   :  { %v9443_v24 = vld [vmem:[#allocation5 + $0x8dc] sm:$0xf0]  ;;  %v7083_v18 = vld [vmem:[#allocation5 + $0x7e0] sm:$0xf0] }
  0x81   :  { %v7465_v25 = vld [vmem:[#allocation5 + $0xac0] sm:$0xf]  ;;  %v7210_v33 = vor.u32 %v9443_v24, %v7209_v23  ;;  %3314 = vmatpush.bf16.msrb.mxu3 %v8010_v27  ;;  %v9207_v22 = vld [vmem:[#allocation5 + $0x184] sm:$0xf]  ;;  %v121_v24 = vld [vmem:[#allocation3 + $0x38] sm:$0xff]  ;;  %v6830_v27 = vor.u32 %v9343_v12, %v6827_v13 }
  0x82   :  { %v9507_v28 = vld [vmem:[#allocation5 + $0xadc] sm:$0xf0]  ;;  %v6699_v12 = vld [vmem:[#allocation5 + $0x4e0] sm:$0xf0] }
  0x83   :  { %v7721_v29 = vld [vmem:[#allocation5 + $0xcc0] sm:$0xf]  ;;  %v7466_v34 = vor.u32 %v9507_v28, %v7465_v25  ;;  %3276 = vmatpush.bf16.msrb.mxu0 %v7210_v33  ;;  %v6574_v25 = vor.u32 %v9279_v7, %v6571_v11  ;;  %v6283_v28 = vld [vmem:[#allocation5 + $0x1a0] sm:$0xf0] }
  0x84   :  { %v9571_v30 = vld [vmem:[#allocation5 + $0xcdc] sm:$0xf0]  ;;  %v9335_v33 = vld [vmem:[#allocation5 + $0x584] sm:$0xf] }
  0x85   :  { %v7977_v31 = vld [vmem:[#allocation5 + $0xec0] sm:$0xf]  ;;  %v7722_v35 = vor.u32 %v9571_v30, %v7721_v29  ;;  %3289 = vmatpush.bf16.msrb.mxu1 %v7466_v34  ;;  %v9271_v29 = vld [vmem:[#allocation5 + $0x384] sm:$0xf]  ;;  %v119_v30 = vld [vmem:[#allocation3 + $0x28] sm:$0xff] }
  0x86   :  { %v9635_v32 = vld [vmem:[#allocation5 + $0xedc] sm:$0xf0]  ;;  %v6795_v34 = vld [vmem:[#allocation5 + $0x5a0] sm:$0xf0] }
  0x87   :  { %v7177_v36 = vld [vmem:[#allocation5 + $0x880] sm:$0xf]  ;;  %v7978_v39 = vor.u32 %v9635_v32, %v7977_v31  ;;  %3302 = vmatpush.bf16.msrb.mxu2 %v7722_v35  ;;  %v7086_v31 = vor.u32 %v9407_v17, %v7083_v18  ;;  %v6539_v32 = vld [vmem:[#allocation5 + $0x3a0] sm:$0xf0]  ;;  %v10180_v35 = vpack.c.bf16 %v120_v19, %v120_v19 }
  0x88   :  { %v9435_v37 = vld [vmem:[#allocation5 + $0x89c] sm:$0xf0]  ;;  %v9311_v11 = vld [vmem:[#allocation5 + $0x4c4] sm:$0xf] }
  0x89   :  { %v7433_v38 = vld [vmem:[#allocation5 + $0xa80] sm:$0xf]  ;;  %v7178_v45 = vor.u32 %v9435_v37, %v7177_v36  ;;  %3315 = vmatpush.bf16.msrb.mxu3 %v7978_v39  ;;  %v9399_v36 = vld [vmem:[#allocation5 + $0x784] sm:$0xf]  ;;  %v10184_v39 = vpack.c.bf16 %v121_v24, %v121_v24  ;;  %v6702_v18 = vor.u32 %v9311_v11, %v6699_v12 }
  0x8a   :  { %v9499_v40 = vld [vmem:[#allocation5 + $0xa9c] sm:$0xf0]  ;;  %v7051_v37 = vld [vmem:[#allocation5 + $0x7a0] sm:$0xf0] }
  0x8b   :  { %v7689_v41 = vld [vmem:[#allocation5 + $0xc80] sm:$0xf]  ;;  %v7434_v46 = vor.u32 %v9499_v40, %v7433_v38  ;;  %3277 = vmatpush.bf16.msrb.mxu0 %v7178_v45  ;;  %v6286_v40 = vor.u32 %v9207_v22, %v6283_v28  ;;  %v6251_v45 = vld [vmem:[#allocation5 + $0x160] sm:$0xf0] }
  0x8c   :  { %v9563_v42 = vld [vmem:[#allocation5 + $0xc9c] sm:$0xf0]  ;;  %v9375_v13 = vld [vmem:[#allocation5 + $0x6c4] sm:$0xf] }
  0x8d   :  { %v7945_v43 = vld [vmem:[#allocation5 + $0xe80] sm:$0xf]  ;;  %v7690_v47 = vor.u32 %v9563_v42, %v7689_v41  ;;  %3290 = vmatpush.bf16.msrb.mxu1 %v7434_v46  ;;  %v10186_v41 = vpack.c.bf16 %v119_v30, %v119_v30  ;;  %v6542_v42 = vor.u32 %v9271_v29, %v6539_v32  ;;  %v9263_v46 = vld [vmem:[#allocation5 + $0x344] sm:$0xf] }
  0x8e   :  { %v9627_v44 = vld [vmem:[#allocation5 + $0xe9c] sm:$0xf0]  ;;  %v9175_v19 = vld [vmem:[#allocation5 + $0x84] sm:$0xf] }
  0x8f   :  { %v7145_v48 = vld [vmem:[#allocation5 + $0x840] sm:$0xf]  ;;  %v7946_v51 = vor.u32 %v9627_v44, %v7945_v43  ;;  %3303 = vmatpush.bf16.msrb.mxu2 %v7690_v47  ;;  %v6798_v43 = vor.u32 %v9335_v33, %v6795_v34  ;;  %v9199_v44 = vld [vmem:[#allocation5 + $0x144] sm:$0xf]  ;;  %v7054_v47 = vor.u32 %v9399_v36, %v7051_v37 }
  0x90   :  { %v9427_v49 = vld [vmem:[#allocation5 + $0x85c] sm:$0xf0]  ;;  %v9303_v24 = vld [vmem:[#allocation5 + $0x484] sm:$0xf] }
  0x91   :  { %v7401_v50 = vld [vmem:[#allocation5 + $0xa40] sm:$0xf]  ;;  %v7146_v57 = vor.u32 %v9427_v49, %v7145_v48  ;;  %3316 = vmatpush.bf16.msrb.mxu3 %v7946_v51  ;;  %v6507_v48 = vld [vmem:[#allocation5 + $0x360] sm:$0xf0] }
  0x92   :  { %v9491_v52 = vld [vmem:[#allocation5 + $0xa5c] sm:$0xf0]  ;;  %v9327_v49 = vld [vmem:[#allocation5 + $0x544] sm:$0xf] }
  0x93   :  { %v7657_v53 = vld [vmem:[#allocation5 + $0xc40] sm:$0xf]  ;;  %v7402_v60 = vor.u32 %v9491_v52, %v7401_v50  ;;  %3278 = vmatpush.bf16.msrb.mxu0 %v7146_v57  ;;  %v6763_v50 = vld [vmem:[#allocation5 + $0x560] sm:$0xf0] }
  0x94   :  { %v9555_v54 = vld [vmem:[#allocation5 + $0xc5c] sm:$0xf0]  ;;  %v9391_v51 = vld [vmem:[#allocation5 + $0x744] sm:$0xf] }
  0x95   :  { %v7913_v55 = vld [vmem:[#allocation5 + $0xe40] sm:$0xf]  ;;  %v7658_v61 = vor.u32 %v9555_v54, %v7657_v53  ;;  %3291 = vmatpush.bf16.msrb.mxu1 %v7402_v60  ;;  %v7019_v52 = vld [vmem:[#allocation5 + $0x760] sm:$0xf0]  ;;  %v6254_v53 = vor.u32 %v9199_v44, %v6251_v45  ;;  %v6510_v54 = vor.u32 %v9263_v46, %v6507_v48 }
  0x96   :  { %v9619_v56 = vld [vmem:[#allocation5 + $0xe5c] sm:$0xf0]  ;;  %v6219_v57 = vld [vmem:[#allocation5 + $0x120] sm:$0xf0] }
  0x97   :  { %v7113_v58 = vld [vmem:[#allocation5 + $0x800] sm:$0xf]  ;;  %v7914_v1 = vor.u32 %v9619_v56, %v7913_v55  ;;  %3304 = vmatpush.bf16.msrb.mxu2 %v7658_v61  ;;  %v6766_v55 = vor.u32 %v9327_v49, %v6763_v50  ;;  %v9191_v56 = vld [vmem:[#allocation5 + $0x104] sm:$0xf] }
  0x98   :  { %v9419_v59 = vld [vmem:[#allocation5 + $0x81c] sm:$0xf0]  ;;  %v6475_v60 = vld [vmem:[#allocation5 + $0x320] sm:$0xf0] }
  0x99   :  { %v7369_v62 = vld [vmem:[#allocation5 + $0xa00] sm:$0xf]  ;;  %v7114_v8 = vor.u32 %v9419_v59, %v7113_v58  ;;  %3317 = vmatpush.bf16.msrb.mxu3 %v7914_v1  ;;  %v9255_v58 = vld [vmem:[#allocation5 + $0x304] sm:$0xf]  ;;  %v7022_v59 = vor.u32 %v9391_v51, %v7019_v52  ;;  %v6222_v1 = vor.u32 %v9191_v56, %v6219_v57 }
  0x9a   :  { %v9483_v63 = vld [vmem:[#allocation5 + $0xa1c] sm:$0xf0]  ;;  %v9319_v61 = vld [vmem:[#allocation5 + $0x504] sm:$0xf] }
  0x9b   :  { %v7625_v0 = vld [vmem:[#allocation5 + $0xc00] sm:$0xf]  ;;  %v7370_v14 = vor.u32 %v9483_v63, %v7369_v62  ;;  %3279 = vmatpush.bf16.msrb.mxu0 %v7114_v8  ;;  %v6731_v62 = vld [vmem:[#allocation5 + $0x520] sm:$0xf0] }
  0x9c   :  { %v9547_v2 = vld [vmem:[#allocation5 + $0xc1c] sm:$0xf0]  ;;  %v9383_v63 = vld [vmem:[#allocation5 + $0x704] sm:$0xf] }
  0x9d   :  { %v7881_v3 = vld [vmem:[#allocation5 + $0xe00] sm:$0xf]  ;;  %v7626_v15 = vor.u32 %v9547_v2, %v7625_v0  ;;  %3292 = vmatpush.bf16.msrb.mxu1 %v7370_v14  ;;  %v6987_v0 = vld [vmem:[#allocation5 + $0x720] sm:$0xf0]  ;;  %v6478_v2 = vor.u32 %v9255_v58, %v6475_v60 }
  0x9e   :  { %v9611_v4 = vld [vmem:[#allocation5 + $0xe1c] sm:$0xf0]  ;;  %v6990_v7 = vor.u32 %v9383_v63, %v6987_v0  ;;  %v6443_v8 = vld [vmem:[#allocation5 + $0x2e0] sm:$0xf0] }
  0x9f   :  { %v7882_v20 = vor.u32 %v9611_v4, %v7881_v3  ;;  %v118_v23 = vld [vmem:[#allocation3 + $0x20] sm:$0xff]  ;;  %3305 = vmatpush.bf16.msrb.mxu2 %v7626_v15  ;;  %3324 = vmatpush.bf16.msra.mxu0 %v6318_v21  ;;  %v6734_v3 = vor.u32 %v9319_v61, %v6731_v62  ;;  %v6446_v17 = vor.u32 %v9247_v6, %v6443_v8 }
  0xa0   :  { %v10182_v38 = vpack.c.bf16 %v118_v23, %v118_v23  ;;  %3293 = vmatmul.bf16.vlgmr.msrb.gmra.mxu1 %v10186_v41  ;;  %v9183_v4 = vld [vmem:[#allocation5 + $0xc4] sm:$0xf] }
  0xa1   :  { %3318 = vmatpush.bf16.msrb.mxu3 %v7882_v20  ;;  %3337 = vmatpush.bf16.msra.mxu1 %v6574_v25  ;;  %v6955_v14 = vld [vmem:[#allocation5 + $0x6e0] sm:$0xf0]  ;;  %v6190_v15 = vor.u32 %v9183_v4, %v6187_v5 }
  0xa2   :  { %3306 = vmatmul.bf16.vlgmr.msrb.gmra.mxu2 %v10180_v35  ;;  %3280 = vmatmul.bf16.vlgmr.msrb.gmra.mxu0 %v10182_v38  ;;  %v6155_v20 = vld [vmem:[#allocation5 + $0xa0] sm:$0xf0]  ;;  %v6958_v22 = vor.u32 %v9375_v13, %v6955_v14 }
  0xa3   :  { %3350 = vmatpush.bf16.msra.mxu2 %v6830_v27  ;;  %3325 = vmatpush.bf16.msra.mxu0 %v6286_v40  ;;  %v9239_v21 = vld [vmem:[#allocation5 + $0x284] sm:$0xf]  ;;  %v6158_v29 = vor.u32 %v9175_v19, %v6155_v20 }
  0xa4   :  { %3319 = vmatmul.bf16.vlgmr.msrb.gmra.mxu3 %v10184_v39  ;;  %v6411_v23 = vld [vmem:[#allocation5 + $0x2a0] sm:$0xf0] }
  0xa5   :  { %3363 = vmatpush.bf16.msra.mxu3 %v7086_v31  ;;  %3338 = vmatpush.bf16.msra.mxu1 %v6542_v42  ;;  %v6667_v25 = vld [vmem:[#allocation5 + $0x4a0] sm:$0xf0]  ;;  %v6414_v30 = vor.u32 %v9239_v21, %v6411_v23 }
  0xa6   :  { %v9367_v27 = vld [vmem:[#allocation5 + $0x684] sm:$0xf]  ;;  %v6670_v31 = vor.u32 %v9303_v24, %v6667_v25 }
  0xa7   :  { %3351 = vmatpush.bf16.msra.mxu2 %v6798_v43  ;;  %3326 = vmatpush.bf16.msra.mxu0 %v6254_v53  ;;  %v6923_v28 = vld [vmem:[#allocation5 + $0x6a0] sm:$0xf0] }
  0xa8   :  { %v9167_v32 = vld [vmem:[#allocation5 + $0x44] sm:$0xf]  ;;  %v6926_v36 = vor.u32 %v9367_v27, %v6923_v28 }
  0xa9   :  { %3364 = vmatpush.bf16.msra.mxu3 %v7054_v47  ;;  %3339 = vmatpush.bf16.msra.mxu1 %v6510_v54  ;;  %v6123_v33 = vld [vmem:[#allocation5 + $0x60] sm:$0xf0] }
  0xaa   :  { %v9231_v34 = vld [vmem:[#allocation5 + $0x244] sm:$0xf]  ;;  %v6126_v45 = vor.u32 %v9167_v32, %v6123_v33 }
  0xab   :  { %3352 = vmatpush.bf16.msra.mxu2 %v6766_v55  ;;  %3327 = vmatpush.bf16.msra.mxu0 %v6222_v1  ;;  %v6379_v37 = vld [vmem:[#allocation5 + $0x260] sm:$0xf0] }
  0xac   :  { %v9295_v40 = vld [vmem:[#allocation5 + $0x444] sm:$0xf]  ;;  %v6382_v48 = vor.u32 %v9231_v34, %v6379_v37 }
  0xad   :  { %3365 = vmatpush.bf16.msra.mxu3 %v7022_v59  ;;  %3340 = vmatpush.bf16.msra.mxu1 %v6478_v2  ;;  %v6635_v42 = vld [vmem:[#allocation5 + $0x460] sm:$0xf0] }
  0xae   :  { %v9359_v43 = vld [vmem:[#allocation5 + $0x644] sm:$0xf]  ;;  %v6638_v49 = vor.u32 %v9295_v40, %v6635_v42 }
  0xaf   :  { %3353 = vmatpush.bf16.msra.mxu2 %v6734_v3  ;;  %3328 = vmatpush.bf16.msra.mxu0 %v6190_v15  ;;  %v6891_v44 = vld [vmem:[#allocation5 + $0x660] sm:$0xf0] }
  0xb0   :  { %v9159_v46 = vld [vmem:[#allocation5 + $0x4] sm:$0xf]  ;;  %v6894_v53 = vor.u32 %v9359_v43, %v6891_v44 }
  0xb1   :  { %3366 = vmatpush.bf16.msra.mxu3 %v6990_v7  ;;  %3341 = vmatpush.bf16.msra.mxu1 %v6446_v17  ;;  %v6091_v47 = vld [vmem:[#allocation5 + $0x20] sm:$0xf0] }
  0xb2   :  { %v9223_v50 = vld [vmem:[#allocation5 + $0x204] sm:$0xf]  ;;  %v6094_v60 = vor.u32 %v9159_v46, %v6091_v47 }
  0xb3   :  { %3354 = vmatpush.bf16.msra.mxu2 %v6702_v18  ;;  %3329 = vmatpush.bf16.msra.mxu0 %v6158_v29  ;;  %v6347_v51 = vld [vmem:[#allocation5 + $0x220] sm:$0xf0] }
  0xb4   :  { %v9287_v52 = vld [vmem:[#allocation5 + $0x404] sm:$0xf]  ;;  %v6350_v0 = vor.u32 %v9223_v50, %v6347_v51 }
  0xb5   :  { %3367 = vmatpush.bf16.msra.mxu3 %v6958_v22  ;;  %3342 = vmatpush.bf16.msra.mxu1 %v6414_v30  ;;  %v6603_v54 = vld [vmem:[#allocation5 + $0x420] sm:$0xf0] }
  0xb6   :  { %v9351_v55 = vld [vmem:[#allocation5 + $0x604] sm:$0xf]  ;;  %v6606_v1 = vor.u32 %v9287_v52, %v6603_v54 }
  0xb7   :  { %3355 = vmatpush.bf16.msra.mxu2 %v6670_v31  ;;  %v6859_v56 = vld [vmem:[#allocation5 + $0x620] sm:$0xf0]  ;;  %3330 = vmatpush.bf16.msra.mxu0 %v6126_v45 }
  0xb8   :  { %v9471_v57 = vld [vmem:[#allocation5 + $0x9c4] sm:$0xf]  ;;  %v6862_v4 = vor.u32 %v9351_v55, %v6859_v56 }
  0xb9   :  { %3368 = vmatpush.bf16.msra.mxu3 %v6926_v36  ;;  %v7339_v58 = vld [vmem:[#allocation5 + $0x9e0] sm:$0xf0]  ;;  %3343 = vmatpush.bf16.msra.mxu1 %v6382_v48 }
  0xba   :  { %v9535_v59 = vld [vmem:[#allocation5 + $0xbc4] sm:$0xf]  ;;  %v7342_v5 = vor.u32 %v9471_v57, %v7339_v58 }
  0xbb   :  { %v7595_v61 = vld [vmem:[#allocation5 + $0xbe0] sm:$0xf0]  ;;  %3356 = vmatpush.bf16.msra.mxu2 %v6638_v49  ;;  %3331 = vmatpush.bf16.msra.mxu0 %v6094_v60 }
  0xbc   :  { %v9599_v62 = vld [vmem:[#allocation5 + $0xdc4] sm:$0xf]  ;;  %v7598_v6 = vor.u32 %v9535_v59, %v7595_v61 }
  0xbd   :  { %v7851_v63 = vld [vmem:[#allocation5 + $0xde0] sm:$0xf0]  ;;  %3369 = vmatpush.bf16.msra.mxu3 %v6894_v53  ;;  %3344 = vmatpush.bf16.msra.mxu1 %v6350_v0 }
  0xbe   :  { %v9663_v2 = vld [vmem:[#allocation5 + $0xfc4] sm:$0xf]  ;;  %v7854_v7 = vor.u32 %v9599_v62, %v7851_v63  ;;  %3332 = vmatmul.bf16.vlgmr.msra.gmra.mxu0 %v10170_v10 }
  0xbf   :  { %v8107_v3 = vld [vmem:[#allocation5 + $0xfe0] sm:$0xf0]  ;;  %3357 = vmatpush.bf16.msra.mxu2 %v6606_v1  ;;  %3376 = vmatpush.bf16.msrb.mxu0 %v7342_v5 }
  0xc0   :  { %v9463_v8 = vld [vmem:[#allocation5 + $0x984] sm:$0xf]  ;;  %v8110_v13 = vor.u32 %v9663_v2, %v8107_v3  ;;  %3345 = vmatmul.bf16.vlgmr.msra.gmra.mxu1 %v10177_v26 }
  0xc1   :  { %v7307_v11 = vld [vmem:[#allocation5 + $0x9a0] sm:$0xf0]  ;;  %3370 = vmatpush.bf16.msra.mxu3 %v6862_v4  ;;  %3389 = vmatpush.bf16.msrb.mxu1 %v7598_v6 }
  0xc2   :  { %v9527_v12 = vld [vmem:[#allocation5 + $0xb84] sm:$0xf]  ;;  %v7310_v20 = vor.u32 %v9463_v8, %v7307_v11  ;;  %3358 = vmatmul.bf16.vlgmr.msra.gmra.mxu2 %v10168_v9 }
  0xc3   :  { %v7563_v14 = vld [vmem:[#allocation5 + $0xba0] sm:$0xf0]  ;;  %3402 = vmatpush.bf16.msrb.mxu2 %v7854_v7 }
  0xc4   :  { %v9591_v15 = vld [vmem:[#allocation5 + $0xd84] sm:$0xf]  ;;  %v7566_v21 = vor.u32 %v9527_v12, %v7563_v14  ;;  %3371 = vmatmul.bf16.vlgmr.msra.gmra.mxu3 %v10172_v16  ;;  %3377 = vmatpush.bf16.msrb.mxu0 %v7310_v20 }
  0xc5   :  { %v7819_v17 = vld [vmem:[#allocation5 + $0xda0] sm:$0xf0]  ;;  %3415 = vmatpush.bf16.msrb.mxu3 %v8110_v13 }
  0xc6   :  { %v9655_v18 = vld [vmem:[#allocation5 + $0xf84] sm:$0xf]  ;;  %v7822_v22 = vor.u32 %v9591_v15, %v7819_v17  ;;  %3390 = vmatpush.bf16.msrb.mxu1 %v7566_v21 }
  0xc7   :  { %v8075_v19 = vld [vmem:[#allocation5 + $0xfa0] sm:$0xf0] }
  0xc8   :  { %v9455_v23 = vld [vmem:[#allocation5 + $0x944] sm:$0xf]  ;;  %v8078_v27 = vor.u32 %v9655_v18, %v8075_v19  ;;  %3403 = vmatpush.bf16.msrb.mxu2 %v7822_v22 }
  0xc9   :  { %v7275_v24 = vld [vmem:[#allocation5 + $0x960] sm:$0xf0] }
  0xca   :  { %v9519_v25 = vld [vmem:[#allocation5 + $0xb44] sm:$0xf]  ;;  %v7278_v33 = vor.u32 %v9455_v23, %v7275_v24  ;;  %3416 = vmatpush.bf16.msrb.mxu3 %v8078_v27 }
  0xcb   :  { %v7531_v28 = vld [vmem:[#allocation5 + $0xb60] sm:$0xf0] }
  0xcc   :  { %v9583_v29 = vld [vmem:[#allocation5 + $0xd44] sm:$0xf]  ;;  %v7534_v34 = vor.u32 %v9519_v25, %v7531_v28  ;;  %3378 = vmatpush.bf16.msrb.mxu0 %v7278_v33 }
  0xcd   :  { %v7787_v30 = vld [vmem:[#allocation5 + $0xd60] sm:$0xf0] }
  0xce   :  { %v9647_v31 = vld [vmem:[#allocation5 + $0xf44] sm:$0xf]  ;;  %v7790_v36 = vor.u32 %v9583_v29, %v7787_v30  ;;  %3391 = vmatpush.bf16.msrb.mxu1 %v7534_v34 }
  0xcf   :  { %v8043_v32 = vld [vmem:[#allocation5 + $0xf60] sm:$0xf0] }
  0xd0   :  { %v9447_v37 = vld [vmem:[#allocation5 + $0x904] sm:$0xf]  ;;  %v8046_v43 = vor.u32 %v9647_v31, %v8043_v32  ;;  %3404 = vmatpush.bf16.msrb.mxu2 %v7790_v36 }
  0xd1   :  { %v7243_v40 = vld [vmem:[#allocation5 + $0x920] sm:$0xf0] }
  0xd2   :  { %v9511_v42 = vld [vmem:[#allocation5 + $0xb04] sm:$0xf]  ;;  %v7246_v49 = vor.u32 %v9447_v37, %v7243_v40  ;;  %3417 = vmatpush.bf16.msrb.mxu3 %v8046_v43  ;;  %v6321_v40 = vld [vmem:[#allocation5 + $0x1c8] sm:$0xf] }
  0xd3   :  { %v7499_v44 = vld [vmem:[#allocation5 + $0xb20] sm:$0xf0]  ;;  %v6577_v43 = vld [vmem:[#allocation5 + $0x3c8] sm:$0xf] }
  0xd4   :  { %v9575_v45 = vld [vmem:[#allocation5 + $0xd04] sm:$0xf]  ;;  %v7502_v50 = vor.u32 %v9511_v42, %v7499_v44  ;;  %3379 = vmatpush.bf16.msrb.mxu0 %v7246_v49  ;;  %v9220_v42 = vld [vmem:[#allocation5 + $0x1e4] sm:$0xf0] }
  0xd5   :  { %v7755_v46 = vld [vmem:[#allocation5 + $0xd20] sm:$0xf0] }
  0xd6   :  { %v9639_v47 = vld [vmem:[#allocation5 + $0xf04] sm:$0xf]  ;;  %v7758_v51 = vor.u32 %v9575_v45, %v7755_v46  ;;  %3392 = vmatpush.bf16.msrb.mxu1 %v7502_v50  ;;  %v9284_v45 = vld [vmem:[#allocation5 + $0x3e4] sm:$0xf0] }
  0xd7   :  { %v8011_v48 = vld [vmem:[#allocation5 + $0xf20] sm:$0xf0]  ;;  %v6833_v46 = vld [vmem:[#allocation5 + $0x5c8] sm:$0xf] }
  0xd8   :  { %v9439_v52 = vld [vmem:[#allocation5 + $0x8c4] sm:$0xf]  ;;  %v8014_v55 = vor.u32 %v9639_v47, %v8011_v48  ;;  %3405 = vmatpush.bf16.msrb.mxu2 %v7758_v51  ;;  %v9348_v47 = vld [vmem:[#allocation5 + $0x5e4] sm:$0xf0] }
  0xd9   :  { %v7211_v53 = vld [vmem:[#allocation5 + $0x8e0] sm:$0xf0]  ;;  %v7089_v50 = vld [vmem:[#allocation5 + $0x7c8] sm:$0xf] }
  0xda   :  { %v9503_v54 = vld [vmem:[#allocation5 + $0xac4] sm:$0xf]  ;;  %v7214_v61 = vor.u32 %v9439_v52, %v7211_v53  ;;  %3418 = vmatpush.bf16.msrb.mxu3 %v8014_v55  ;;  %v9412_v51 = vld [vmem:[#allocation5 + $0x7e4] sm:$0xf0]  ;;  %v6322_v53 = vor.u32 %v9220_v42, %v6321_v40  ;;  %v6834_v55 = vor.u32 %v9348_v47, %v6833_v46 }
  0xdb   :  { %v7467_v56 = vld [vmem:[#allocation5 + $0xae0] sm:$0xf0]  ;;  %v6705_v40 = vld [vmem:[#allocation5 + $0x4c8] sm:$0xf] }
  0xdc   :  { %v9567_v57 = vld [vmem:[#allocation5 + $0xcc4] sm:$0xf]  ;;  %v7470_v62 = vor.u32 %v9503_v54, %v7467_v56  ;;  %3380 = vmatpush.bf16.msrb.mxu0 %v7214_v61  ;;  %v6578_v54 = vor.u32 %v9284_v45, %v6577_v43  ;;  %v6289_v56 = vld [vmem:[#allocation5 + $0x188] sm:$0xf] }
  0xdd   :  { %v7723_v58 = vld [vmem:[#allocation5 + $0xce0] sm:$0xf0]  ;;  %v6801_v61 = vld [vmem:[#allocation5 + $0x588] sm:$0xf] }
  0xde   :  { %v9631_v59 = vld [vmem:[#allocation5 + $0xec4] sm:$0xf]  ;;  %v7726_v63 = vor.u32 %v9567_v57, %v7723_v58  ;;  %3393 = vmatpush.bf16.msrb.mxu1 %v7470_v62  ;;  %v9212_v57 = vld [vmem:[#allocation5 + $0x1a4] sm:$0xf0] }
  0xdf   :  { %v7979_v60 = vld [vmem:[#allocation5 + $0xee0] sm:$0xf0]  ;;  %v6545_v58 = vld [vmem:[#allocation5 + $0x388] sm:$0xf] }
  0xe0   :  { %v9431_v0 = vld [vmem:[#allocation5 + $0x884] sm:$0xf]  ;;  %v7982_v3 = vor.u32 %v9631_v59, %v7979_v60  ;;  %3406 = vmatpush.bf16.msrb.mxu2 %v7726_v63  ;;  %v7090_v59 = vor.u32 %v9412_v51, %v7089_v50  ;;  %v9276_v60 = vld [vmem:[#allocation5 + $0x3a4] sm:$0xf0] }
  0xe1   :  { %v7179_v1 = vld [vmem:[#allocation5 + $0x8a0] sm:$0xf0]  ;;  %v9340_v62 = vld [vmem:[#allocation5 + $0x5a4] sm:$0xf0] }
  0xe2   :  { %v9495_v2 = vld [vmem:[#allocation5 + $0xa84] sm:$0xf]  ;;  %v7182_v11 = vor.u32 %v9431_v0, %v7179_v1  ;;  %3419 = vmatpush.bf16.msrb.mxu3 %v7982_v3  ;;  %v7057_v63 = vld [vmem:[#allocation5 + $0x788] sm:$0xf]  ;;  %v6290_v1 = vor.u32 %v9212_v57, %v6289_v56  ;;  %v6802_v3 = vor.u32 %v9340_v62, %v6801_v61 }
  0xe3   :  { %v7435_v4 = vld [vmem:[#allocation5 + $0xaa0] sm:$0xf0]  ;;  %v9404_v0 = vld [vmem:[#allocation5 + $0x7a4] sm:$0xf0] }
  0xe4   :  { %v9559_v5 = vld [vmem:[#allocation5 + $0xc84] sm:$0xf]  ;;  %v7438_v12 = vor.u32 %v9495_v2, %v7435_v4  ;;  %3381 = vmatpush.bf16.msrb.mxu0 %v7182_v11  ;;  %v6546_v2 = vor.u32 %v9276_v60, %v6545_v58  ;;  %v6257_v4 = vld [vmem:[#allocation5 + $0x148] sm:$0xf] }
  0xe5   :  { %v7691_v6 = vld [vmem:[#allocation5 + $0xca0] sm:$0xf0]  ;;  %v6769_v11 = vld [vmem:[#allocation5 + $0x548] sm:$0xf] }
  0xe6   :  { %v9623_v7 = vld [vmem:[#allocation5 + $0xe84] sm:$0xf]  ;;  %v7694_v13 = vor.u32 %v9559_v5, %v7691_v6  ;;  %3394 = vmatpush.bf16.msrb.mxu1 %v7438_v12  ;;  %v9204_v5 = vld [vmem:[#allocation5 + $0x164] sm:$0xf0] }
  0xe7   :  { %v7947_v8 = vld [vmem:[#allocation5 + $0xea0] sm:$0xf0]  ;;  %v6513_v6 = vld [vmem:[#allocation5 + $0x348] sm:$0xf] }
  0xe8   :  { %v9423_v14 = vld [vmem:[#allocation5 + $0x844] sm:$0xf]  ;;  %v7950_v18 = vor.u32 %v9623_v7, %v7947_v8  ;;  %3407 = vmatpush.bf16.msrb.mxu2 %v7694_v13  ;;  %v7058_v7 = vor.u32 %v9404_v0, %v7057_v63  ;;  %v9268_v8 = vld [vmem:[#allocation5 + $0x364] sm:$0xf0] }
  0xe9   :  { %v7147_v15 = vld [vmem:[#allocation5 + $0x860] sm:$0xf0]  ;;  %v9332_v12 = vld [vmem:[#allocation5 + $0x564] sm:$0xf0] }
  0xea   :  { %v9487_v17 = vld [vmem:[#allocation5 + $0xa44] sm:$0xf]  ;;  %v7150_v24 = vor.u32 %v9423_v14, %v7147_v15  ;;  %3420 = vmatpush.bf16.msrb.mxu3 %v7950_v18  ;;  %v7025_v13 = vld [vmem:[#allocation5 + $0x748] sm:$0xf]  ;;  %v6258_v15 = vor.u32 %v9204_v5, %v6257_v4  ;;  %v6770_v18 = vor.u32 %v9332_v12, %v6769_v11 }
  0xeb   :  { %v7403_v19 = vld [vmem:[#allocation5 + $0xa60] sm:$0xf0]  ;;  %v9396_v14 = vld [vmem:[#allocation5 + $0x764] sm:$0xf0] }
  0xec   :  { %v9551_v20 = vld [vmem:[#allocation5 + $0xc44] sm:$0xf]  ;;  %v7406_v28 = vor.u32 %v9487_v17, %v7403_v19  ;;  %3382 = vmatpush.bf16.msrb.mxu0 %v7150_v24  ;;  %v6514_v17 = vor.u32 %v9268_v8, %v6513_v6  ;;  %v6225_v19 = vld [vmem:[#allocation5 + $0x108] sm:$0xf] }
  0xed   :  { %v7659_v21 = vld [vmem:[#allocation5 + $0xc60] sm:$0xf0]  ;;  %v6737_v24 = vld [vmem:[#allocation5 + $0x508] sm:$0xf] }
  0xee   :  { %v9615_v22 = vld [vmem:[#allocation5 + $0xe44] sm:$0xf]  ;;  %v7662_v29 = vor.u32 %v9551_v20, %v7659_v21  ;;  %3395 = vmatpush.bf16.msrb.mxu1 %v7406_v28  ;;  %v9196_v20 = vld [vmem:[#allocation5 + $0x124] sm:$0xf0] }
  0xef   :  { %v7915_v23 = vld [vmem:[#allocation5 + $0xe60] sm:$0xf0]  ;;  %v6481_v21 = vld [vmem:[#allocation5 + $0x308] sm:$0xf] }
  0xf0   :  { %v9415_v25 = vld [vmem:[#allocation5 + $0x804] sm:$0xf]  ;;  %v7918_v33 = vor.u32 %v9615_v22, %v7915_v23  ;;  %3408 = vmatpush.bf16.msrb.mxu2 %v7662_v29  ;;  %v7026_v22 = vor.u32 %v9396_v14, %v7025_v13  ;;  %v9260_v23 = vld [vmem:[#allocation5 + $0x324] sm:$0xf0]  ;;  %v6226_v29 = vor.u32 %v9196_v20, %v6225_v19 }
  0xf1   :  { %v7115_v27 = vld [vmem:[#allocation5 + $0x820] sm:$0xf0]  ;;  %v9388_v28 = vld [vmem:[#allocation5 + $0x724] sm:$0xf0] }
  0xf2   :  { %v9479_v30 = vld [vmem:[#allocation5 + $0xa04] sm:$0xf]  ;;  %v7118_v44 = vor.u32 %v9415_v25, %v7115_v27  ;;  %3421 = vmatpush.bf16.msrb.mxu3 %v7918_v33  ;;  %v9324_v25 = vld [vmem:[#allocation5 + $0x524] sm:$0xf0] }
  0xf3   :  { %v7371_v31 = vld [vmem:[#allocation5 + $0xa20] sm:$0xf0]  ;;  %v6993_v27 = vld [vmem:[#allocation5 + $0x708] sm:$0xf] }
  0xf4   :  { %v9543_v32 = vld [vmem:[#allocation5 + $0xc04] sm:$0xf]  ;;  %v7374_v48 = vor.u32 %v9479_v30, %v7371_v31  ;;  %3383 = vmatpush.bf16.msrb.mxu0 %v7118_v44  ;;  %v6482_v30 = vor.u32 %v9260_v23, %v6481_v21  ;;  %v6738_v31 = vor.u32 %v9324_v25, %v6737_v24  ;;  %v9188_v33 = vld [vmem:[#allocation5 + $0xe4] sm:$0xf0] }
  0xf5   :  { %v7627_v34 = vld [vmem:[#allocation5 + $0xc20] sm:$0xf0]  ;;  %v9316_v42 = vld [vmem:[#allocation5 + $0x4e4] sm:$0xf0] }
  0xf6   :  { %v9607_v36 = vld [vmem:[#allocation5 + $0xe04] sm:$0xf]  ;;  %v7630_v49 = vor.u32 %v9543_v32, %v7627_v34  ;;  %3396 = vmatpush.bf16.msrb.mxu1 %v7374_v48  ;;  %v6193_v32 = vld [vmem:[#allocation5 + $0xc8] sm:$0xf]  ;;  %v6706_v47 = vor.u32 %v9316_v42, %v6705_v40 }
  0xf7   :  { %v7883_v37 = vld [vmem:[#allocation5 + $0xe20] sm:$0xf0]  ;;  %3384 = vmatmul.bf16.vlgmr.msrb.gmra.mxu0 %v10182_v38  ;;  %v6449_v34 = vld [vmem:[#allocation5 + $0x2c8] sm:$0xf]  ;;  %v6194_v45 = vor.u32 %v9188_v33, %v6193_v32 }
  0xf8   :  { %v7886_v52 = vor.u32 %v9607_v36, %v7883_v37  ;;  %3409 = vmatpush.bf16.msrb.mxu2 %v7630_v49  ;;  %3428 = vmatpush.bf16.msra.mxu0 %v6322_v53  ;;  %v6994_v36 = vor.u32 %v9388_v28, %v6993_v27  ;;  %v9252_v37 = vld [vmem:[#allocation5 + $0x2e4] sm:$0xf0] }
  0xf9   :  { %3397 = vmatmul.bf16.vlgmr.msrb.gmra.mxu1 %v10186_v41  ;;  %v6961_v43 = vld [vmem:[#allocation5 + $0x6c8] sm:$0xf]  ;;  %v6450_v46 = vor.u32 %v9252_v37, %v6449_v34 }
  0xfa   :  { %3422 = vmatpush.bf16.msrb.mxu3 %v7886_v52  ;;  %3441 = vmatpush.bf16.msra.mxu1 %v6578_v54  ;;  %v9380_v44 = vld [vmem:[#allocation5 + $0x6e4] sm:$0xf0] }
  0xfb   :  { %3410 = vmatmul.bf16.vlgmr.msrb.gmra.mxu2 %v10180_v35  ;;  %v6161_v48 = vld [vmem:[#allocation5 + $0x88] sm:$0xf]  ;;  %v6962_v51 = vor.u32 %v9380_v44, %v6961_v43 }
  0xfc   :  { %3454 = vmatpush.bf16.msra.mxu2 %v6834_v55  ;;  %3429 = vmatpush.bf16.msra.mxu0 %v6290_v1  ;;  %v9180_v49 = vld [vmem:[#allocation5 + $0xa4] sm:$0xf0] }
  0xfd   :  { %3423 = vmatmul.bf16.vlgmr.msrb.gmra.mxu3 %v10184_v39  ;;  %v6417_v50 = vld [vmem:[#allocation5 + $0x288] sm:$0xf]  ;;  %v6162_v57 = vor.u32 %v9180_v49, %v6161_v48 }
  0xfe   :  { %3467 = vmatpush.bf16.msra.mxu3 %v7090_v59  ;;  %3442 = vmatpush.bf16.msra.mxu1 %v6546_v2  ;;  %v9244_v52 = vld [vmem:[#allocation5 + $0x2a4] sm:$0xf0] }
  0xff   :  { %v6673_v53 = vld [vmem:[#allocation5 + $0x488] sm:$0xf]  ;;  %v6418_v58 = vor.u32 %v9244_v52, %v6417_v50 }
 0x100   :  { %3455 = vmatpush.bf16.msra.mxu2 %v6802_v3  ;;  %3430 = vmatpush.bf16.msra.mxu0 %v6258_v15  ;;  %v9308_v54 = vld [vmem:[#allocation5 + $0x4a4] sm:$0xf0] }
 0x101   :  { %v6929_v55 = vld [vmem:[#allocation5 + $0x688] sm:$0xf]  ;;  %v6674_v59 = vor.u32 %v9308_v54, %v6673_v53 }
 0x102   :  { %3468 = vmatpush.bf16.msra.mxu3 %v7058_v7  ;;  %3443 = vmatpush.bf16.msra.mxu1 %v6514_v17  ;;  %v9372_v56 = vld [vmem:[#allocation5 + $0x6a4] sm:$0xf0] }
 0x103   :  { %v6129_v60 = vld [vmem:[#allocation5 + $0x48] sm:$0xf]  ;;  %v6930_v63 = vor.u32 %v9372_v56, %v6929_v55 }
 0x104   :  { %3456 = vmatpush.bf16.msra.mxu2 %v6770_v18  ;;  %3431 = vmatpush.bf16.msra.mxu0 %v6226_v29  ;;  %v9172_v61 = vld [vmem:[#allocation5 + $0x64] sm:$0xf0] }
 0x105   :  { %v6385_v62 = vld [vmem:[#allocation5 + $0x248] sm:$0xf]  ;;  %v6130_v5 = vor.u32 %v9172_v61, %v6129_v60 }
 0x106   :  { %3469 = vmatpush.bf16.msra.mxu3 %v7026_v22  ;;  %3444 = vmatpush.bf16.msra.mxu1 %v6482_v30  ;;  %v9236_v0 = vld [vmem:[#allocation5 + $0x264] sm:$0xf0] }
 0x107   :  { %v6641_v1 = vld [vmem:[#allocation5 + $0x448] sm:$0xf]  ;;  %v6386_v8 = vor.u32 %v9236_v0, %v6385_v62 }
 0x108   :  { %3457 = vmatpush.bf16.msra.mxu2 %v6738_v31  ;;  %3432 = vmatpush.bf16.msra.mxu0 %v6194_v45  ;;  %v9300_v2 = vld [vmem:[#allocation5 + $0x464] sm:$0xf0] }
 0x109   :  { %v6897_v3 = vld [vmem:[#allocation5 + $0x648] sm:$0xf]  ;;  %v6642_v11 = vor.u32 %v9300_v2, %v6641_v1 }
 0x10a   :  { %3470 = vmatpush.bf16.msra.mxu3 %v6994_v36  ;;  %3445 = vmatpush.bf16.msra.mxu1 %v6450_v46  ;;  %v9364_v4 = vld [vmem:[#allocation5 + $0x664] sm:$0xf0] }
 0x10b   :  { %v6097_v6 = vld [vmem:[#allocation5 + $0x8] sm:$0xf]  ;;  %v6898_v15 = vor.u32 %v9364_v4, %v6897_v3 }
 0x10c   :  { %3458 = vmatpush.bf16.msra.mxu2 %v6706_v47  ;;  %3433 = vmatpush.bf16.msra.mxu0 %v6162_v57  ;;  %v9164_v7 = vld [vmem:[#allocation5 + $0x24] sm:$0xf0] }
 0x10d   :  { %v6353_v12 = vld [vmem:[#allocation5 + $0x208] sm:$0xf]  ;;  %v6098_v23 = vor.u32 %v9164_v7, %v6097_v6  ;;  %v10204_v7 = vld [vmem:[#allocation7] sm:$0xff] }
 0x10e   :  { %3471 = vmatpush.bf16.msra.mxu3 %v6962_v51  ;;  %3446 = vmatpush.bf16.msra.mxu1 %v6418_v58  ;;  %v9228_v13 = vld [vmem:[#allocation5 + $0x224] sm:$0xf0] }
 0x10f   :  { %v6609_v14 = vld [vmem:[#allocation5 + $0x408] sm:$0xf]  ;;  %v6354_v28 = vor.u32 %v9228_v13, %v6353_v12 }
 0x110   :  { %3459 = vmatpush.bf16.msra.mxu2 %v6674_v59  ;;  %v9292_v17 = vld [vmem:[#allocation5 + $0x424] sm:$0xf0]  ;;  %3434 = vmatpush.bf16.msra.mxu0 %v6130_v5 }
 0x111   :  { %v6865_v18 = vld [vmem:[#allocation5 + $0x608] sm:$0xf]  ;;  %v6610_v29 = vor.u32 %v9292_v17, %v6609_v14 }
 0x112   :  { %3472 = vmatpush.bf16.msra.mxu3 %v6930_v63  ;;  %v9356_v19 = vld [vmem:[#allocation5 + $0x624] sm:$0xf0]  ;;  %3447 = vmatpush.bf16.msra.mxu1 %v6386_v8 }
 0x113   :  { %v7345_v20 = vld [vmem:[#allocation5 + $0x9c8] sm:$0xf]  ;;  %v6866_v32 = vor.u32 %v9356_v19, %v6865_v18  ;;  %v644_v19 = vperm.slane %v10204_v7, 0 }
 0x114   :  { %v9476_v21 = vld [vmem:[#allocation5 + $0x9e4] sm:$0xf0]  ;;  %3460 = vmatpush.bf16.msra.mxu2 %v6642_v11  ;;  %3435 = vmatpush.bf16.msra.mxu0 %v6098_v23 }
 0x115   :  { %v7601_v22 = vld [vmem:[#allocation5 + $0xbc8] sm:$0xf]  ;;  %v7346_v33 = vor.u32 %v9476_v21, %v7345_v20 }
 0x116   :  { %v9540_v24 = vld [vmem:[#allocation5 + $0xbe4] sm:$0xf0]  ;;  %3473 = vmatpush.bf16.msra.mxu3 %v6898_v15  ;;  %3448 = vmatpush.bf16.msra.mxu1 %v6354_v28  ;;  %v3229_v28 = vpop.f32.mrf.mxu0 }
 0x117   :  { %v7857_v25 = vld [vmem:[#allocation5 + $0xdc8] sm:$0xf]  ;;  %v7602_v34 = vor.u32 %v9540_v24, %v7601_v22  ;;  %3436 = vmatmul.bf16.vlgmr.msra.gmra.mxu0 %v10170_v10 }
 0x118   :  { %v9604_v27 = vld [vmem:[#allocation5 + $0xde4] sm:$0xf0]  ;;  %3461 = vmatpush.bf16.msra.mxu2 %v6610_v29  ;;  %3480 = vmatpush.bf16.msrb.mxu0 %v7346_v33 }
 0x119   :  { %v8113_v30 = vld [vmem:[#allocation5 + $0xfc8] sm:$0xf]  ;;  %v7858_v36 = vor.u32 %v9604_v27, %v7857_v25  ;;  %3449 = vmatmul.bf16.vlgmr.msra.gmra.mxu1 %v10177_v26 }
 0x11a   :  { %v9668_v31 = vld [vmem:[#allocation5 + $0xfe4] sm:$0xf0]  ;;  %3474 = vmatpush.bf16.msra.mxu3 %v6866_v32  ;;  %3493 = vmatpush.bf16.msrb.mxu1 %v7602_v34  ;;  %v3230_v34 = vadd.f32 %v3229_v28, %v644_v19  ;;  %v7091_v28 = vld [vmem:[#allocation5 + $0x7e8] sm:$0xf0] }
 0x11b   :  { %v7313_v37 = vld [vmem:[#allocation5 + $0x988] sm:$0xf]  ;;  %v8114_v43 = vor.u32 %v9668_v31, %v8113_v30  ;;  %3462 = vmatmul.bf16.vlgmr.msra.gmra.mxu2 %v10168_v9 }
 0x11c   :  { %v9468_v40 = vld [vmem:[#allocation5 + $0x9a4] sm:$0xf0]  ;;  %3506 = vmatpush.bf16.msrb.mxu2 %v7858_v36 }
 0x11d   :  { %v7569_v42 = vld [vmem:[#allocation5 + $0xb88] sm:$0xf]  ;;  %v7314_v49 = vor.u32 %v9468_v40, %v7313_v37  ;;  %3475 = vmatmul.bf16.vlgmr.msra.gmra.mxu3 %v10172_v16 }
 0x11e   :  { %v9532_v44 = vld [vmem:[#allocation5 + $0xba4] sm:$0xf0]  ;;  %3519 = vmatpush.bf16.msrb.mxu3 %v8114_v43 }
 0x11f   :  { %v7825_v45 = vld [vmem:[#allocation5 + $0xd88] sm:$0xf]  ;;  %v7570_v50 = vor.u32 %v9532_v44, %v7569_v42  ;;  %3481 = vmatpush.bf16.msrb.mxu0 %v7314_v49 }
 0x120   :  { %v9596_v46 = vld [vmem:[#allocation5 + $0xda4] sm:$0xf0] }
 0x121   :  { %v8081_v47 = vld [vmem:[#allocation5 + $0xf88] sm:$0xf]  ;;  %v7826_v51 = vor.u32 %v9596_v46, %v7825_v45  ;;  %3494 = vmatpush.bf16.msrb.mxu1 %v7570_v50  ;;  %v3242_v46 = vpop.f32.mrf.mxu1 }
 0x122   :  { %v9660_v48 = vld [vmem:[#allocation5 + $0xfa4] sm:$0xf0] }
 0x123   :  { %v7281_v52 = vld [vmem:[#allocation5 + $0x948] sm:$0xf]  ;;  %v8082_v55 = vor.u32 %v9660_v48, %v8081_v47  ;;  %3507 = vmatpush.bf16.msrb.mxu2 %v7826_v51 }
 0x124   :  { %v9460_v53 = vld [vmem:[#allocation5 + $0x964] sm:$0xf0] }
 0x125   :  { %v7537_v54 = vld [vmem:[#allocation5 + $0xb48] sm:$0xf]  ;;  %v7282_v61 = vor.u32 %v9460_v53, %v7281_v52  ;;  %3520 = vmatpush.bf16.msrb.mxu3 %v8082_v55  ;;  %v3243_v52 = vadd.f32 %v3242_v46, %v3230_v34  ;;  %v9208_v34 = vld [vmem:[#allocation5 + $0x18c] sm:$0xf] }
 0x126   :  { %v9524_v56 = vld [vmem:[#allocation5 + $0xb64] sm:$0xf0]  ;;  %v9400_v46 = vld [vmem:[#allocation5 + $0x78c] sm:$0xf] }
 0x127   :  { %v7793_v57 = vld [vmem:[#allocation5 + $0xd48] sm:$0xf]  ;;  %v7538_v63 = vor.u32 %v9524_v56, %v7537_v54  ;;  %3482 = vmatpush.bf16.msrb.mxu0 %v7282_v61  ;;  %v3268_v61 = vpop.f32.mrf.mxu3 }
 0x128   :  { %v9588_v58 = vld [vmem:[#allocation5 + $0xd64] sm:$0xf0] }
 0x129   :  { %v8049_v59 = vld [vmem:[#allocation5 + $0xf48] sm:$0xf]  ;;  %v7794_v0 = vor.u32 %v9588_v58, %v7793_v57  ;;  %3495 = vmatpush.bf16.msrb.mxu1 %v7538_v63  ;;  %v3255_v57 = vpop.f32.mrf.mxu2 }
 0x12a   :  { %v9652_v60 = vld [vmem:[#allocation5 + $0xf64] sm:$0xf0] }
 0x12b   :  { %v7249_v62 = vld [vmem:[#allocation5 + $0x908] sm:$0xf]  ;;  %v8050_v4 = vor.u32 %v9652_v60, %v8049_v59  ;;  %3508 = vmatpush.bf16.msrb.mxu2 %v7794_v0  ;;  %v3256_v60 = vadd.f32 %v3255_v57, %v3243_v52  ;;  %v6259_v52 = vld [vmem:[#allocation5 + $0x168] sm:$0xf0] }
 0x12c   :  { %v9452_v1 = vld [vmem:[#allocation5 + $0x924] sm:$0xf0]  ;;  %v6771_v57 = vld [vmem:[#allocation5 + $0x568] sm:$0xf0] }
 0x12d   :  { %v7505_v2 = vld [vmem:[#allocation5 + $0xb08] sm:$0xf]  ;;  %v7250_v12 = vor.u32 %v9452_v1, %v7249_v62  ;;  %3521 = vmatpush.bf16.msrb.mxu3 %v8050_v4  ;;  %v3231_v1 = vpop.f32.mrf.mxu0 }
 0x12e   :  { %v9516_v3 = vld [vmem:[#allocation5 + $0xb24] sm:$0xf0]  ;;  %v9256_v1 = vld [vmem:[#allocation5 + $0x30c] sm:$0xf] }
 0x12f   :  { %v7761_v5 = vld [vmem:[#allocation5 + $0xd08] sm:$0xf]  ;;  %v7506_v14 = vor.u32 %v9516_v3, %v7505_v2  ;;  %3483 = vmatpush.bf16.msrb.mxu0 %v7250_v12 }
 0x130   :  { %v9580_v6 = vld [vmem:[#allocation5 + $0xd24] sm:$0xf0] }
 0x131   :  { %v8017_v8 = vld [vmem:[#allocation5 + $0xf08] sm:$0xf]  ;;  %v7762_v15 = vor.u32 %v9580_v6, %v7761_v5  ;;  %3496 = vmatpush.bf16.msrb.mxu1 %v7506_v14 }
 0x132   :  { %v9644_v11 = vld [vmem:[#allocation5 + $0xf24] sm:$0xf0] }
 0x133   :  { %v7217_v13 = vld [vmem:[#allocation5 + $0x8c8] sm:$0xf]  ;;  %v8018_v20 = vor.u32 %v9644_v11, %v8017_v8  ;;  %3509 = vmatpush.bf16.msrb.mxu2 %v7762_v15  ;;  %v10207_v8 = vadd.f32 %v3268_v61, %v3256_v60  ;;  %v9216_v15 = vld [vmem:[#allocation5 + $0x1cc] sm:$0xf] }
 0x134   :  { %v9444_v17 = vld [vmem:[#allocation5 + $0x8e4] sm:$0xf0] }
 0x135   :  { %v7473_v18 = vld [vmem:[#allocation5 + $0xac8] sm:$0xf]  ;;  %v7218_v27 = vor.u32 %v9444_v17, %v7217_v13  ;;  %3522 = vmatpush.bf16.msrb.mxu3 %v8018_v20  ;;  %v6323_v17 = vld [vmem:[#allocation5 + $0x1e8] sm:$0xf0] }
 0x136   :  { %v9508_v21 = vld [vmem:[#allocation5 + $0xae4] sm:$0xf0]  ;;  %v6579_v20 = vld [vmem:[#allocation5 + $0x3e8] sm:$0xf0] }
 0x137   :  { %v7729_v22 = vld [vmem:[#allocation5 + $0xcc8] sm:$0xf]  ;;  %v7474_v29 = vor.u32 %v9508_v21, %v7473_v18  ;;  %3484 = vmatpush.bf16.msrb.mxu0 %v7218_v27  ;;  %v9280_v18 = vld [vmem:[#allocation5 + $0x3cc] sm:$0xf] }
 0x138   :  { %v9572_v23 = vld [vmem:[#allocation5 + $0xce4] sm:$0xf0]  ;;  %v9344_v21 = vld [vmem:[#allocation5 + $0x5cc] sm:$0xf] }
 0x139   :  { %v7985_v24 = vld [vmem:[#allocation5 + $0xec8] sm:$0xf]  ;;  %v7730_v30 = vor.u32 %v9572_v23, %v7729_v22  ;;  %3497 = vmatpush.bf16.msrb.mxu1 %v7474_v29  ;;  %v6835_v22 = vld [vmem:[#allocation5 + $0x5e8] sm:$0xf0]  ;;  %v3244_v23 = vpop.f32.mrf.mxu1 }
 0x13a   :  { %v9636_v25 = vld [vmem:[#allocation5 + $0xee4] sm:$0xf0]  ;;  %v9408_v27 = vld [vmem:[#allocation5 + $0x7cc] sm:$0xf] }
 0x13b   :  { %v7185_v31 = vld [vmem:[#allocation5 + $0x888] sm:$0xf]  ;;  %v7986_v36 = vor.u32 %v9636_v25, %v7985_v24  ;;  %3510 = vmatpush.bf16.msrb.mxu2 %v7730_v30  ;;  %v6326_v30 = vor.u32 %v9216_v15, %v6323_v17  ;;  %v9184_v17 = vld [vmem:[#allocation5 + $0xcc] sm:$0xf] }
 0x13c   :  { %v9436_v32 = vld [vmem:[#allocation5 + $0x8a4] sm:$0xf0]  ;;  %v6451_v23 = vld [vmem:[#allocation5 + $0x2e8] sm:$0xf0] }
 0x13d   :  { %v7441_v33 = vld [vmem:[#allocation5 + $0xa88] sm:$0xf]  ;;  %v7186_v45 = vor.u32 %v9436_v32, %v7185_v31  ;;  %3523 = vmatpush.bf16.msrb.mxu3 %v7986_v36  ;;  %v3257_v31 = vpop.f32.mrf.mxu2  ;;  %v6582_v32 = vor.u32 %v9280_v18, %v6579_v20  ;;  %v6291_v36 = vld [vmem:[#allocation5 + $0x1a8] sm:$0xf0] }
 0x13e   :  { %v9500_v37 = vld [vmem:[#allocation5 + $0xaa4] sm:$0xf0]  ;;  %v6195_v18 = vld [vmem:[#allocation5 + $0xe8] sm:$0xf0] }
 0x13f   :  { %v7697_v40 = vld [vmem:[#allocation5 + $0xc88] sm:$0xf]  ;;  %v7442_v47 = vor.u32 %v9500_v37, %v7441_v33  ;;  %3485 = vmatpush.bf16.msrb.mxu0 %v7186_v45  ;;  %v6838_v33 = vor.u32 %v9344_v21, %v6835_v22  ;;  %v9272_v37 = vld [vmem:[#allocation5 + $0x38c] sm:$0xf] }
 0x140   :  { %v9564_v42 = vld [vmem:[#allocation5 + $0xca4] sm:$0xf0]  ;;  %v6803_v45 = vld [vmem:[#allocation5 + $0x5a8] sm:$0xf0] }
 0x141   :  { %v7953_v43 = vld [vmem:[#allocation5 + $0xe88] sm:$0xf]  ;;  %v7698_v48 = vor.u32 %v9564_v42, %v7697_v40  ;;  %3498 = vmatpush.bf16.msrb.mxu1 %v7442_v47  ;;  %v3270_v40 = vpop.f32.mrf.mxu3  ;;  %v7094_v42 = vor.u32 %v9408_v27, %v7091_v28  ;;  %v7059_v47 = vld [vmem:[#allocation5 + $0x7a8] sm:$0xf0]  ;;  %v3294_v21 = vpop.f32.mrf.mxu1 }
 0x142   :  { %v9628_v44 = vld [vmem:[#allocation5 + $0xea4] sm:$0xf0]  ;;  %v9376_v27 = vld [vmem:[#allocation5 + $0x6cc] sm:$0xf] }
 0x143   :  { %v7153_v49 = vld [vmem:[#allocation5 + $0x848] sm:$0xf]  ;;  %v7954_v53 = vor.u32 %v9628_v44, %v7953_v43  ;;  %3511 = vmatpush.bf16.msrb.mxu2 %v7698_v48  ;;  %v6547_v43 = vld [vmem:[#allocation5 + $0x3a8] sm:$0xf0]  ;;  %v6294_v48 = vor.u32 %v9208_v34, %v6291_v36 }
 0x144   :  { %v9428_v50 = vld [vmem:[#allocation5 + $0x864] sm:$0xf0]  ;;  %v9336_v44 = vld [vmem:[#allocation5 + $0x58c] sm:$0xf] }
 0x145   :  { %v7409_v51 = vld [vmem:[#allocation5 + $0xa48] sm:$0xf]  ;;  %v7154_v62 = vor.u32 %v9428_v50, %v7153_v49  ;;  %3524 = vmatpush.bf16.msrb.mxu3 %v7954_v53  ;;  %v6550_v49 = vor.u32 %v9272_v37, %v6547_v43  ;;  %v6806_v50 = vor.u32 %v9336_v44, %v6803_v45  ;;  %v9264_v53 = vld [vmem:[#allocation5 + $0x34c] sm:$0xf]  ;;  %v3307_v37 = vpop.f32.mrf.mxu2 }
 0x146   :  { %v9492_v54 = vld [vmem:[#allocation5 + $0xa64] sm:$0xf0]  ;;  %v6963_v28 = vld [vmem:[#allocation5 + $0x6e8] sm:$0xf0] }
 0x147   :  { %v7665_v55 = vld [vmem:[#allocation5 + $0xc48] sm:$0xf]  ;;  %v7410_v2 = vor.u32 %v9492_v54, %v7409_v51  ;;  %3486 = vmatpush.bf16.msrb.mxu0 %v7154_v62  ;;  %v9200_v51 = vld [vmem:[#allocation5 + $0x14c] sm:$0xf]  ;;  %v7062_v54 = vor.u32 %v9400_v46, %v7059_v47 }
 0x148   :  { %v9556_v56 = vld [vmem:[#allocation5 + $0xc64] sm:$0xf0]  ;;  %v6262_v60 = vor.u32 %v9200_v51, %v6259_v52  ;;  %v6163_v34 = vld [vmem:[#allocation5 + $0xa8] sm:$0xf0] }
 0x149   :  { %v7921_v58 = vld [vmem:[#allocation5 + $0xe48] sm:$0xf]  ;;  %v7666_v3 = vor.u32 %v9556_v56, %v7665_v55  ;;  %3499 = vmatpush.bf16.msrb.mxu1 %v7410_v2  ;;  %v6515_v55 = vld [vmem:[#allocation5 + $0x368] sm:$0xf0]  ;;  %v3320_v45 = vpop.f32.mrf.mxu3 }
 0x14a   :  { %v9620_v59 = vld [vmem:[#allocation5 + $0xe64] sm:$0xf0]  ;;  %v9328_v56 = vld [vmem:[#allocation5 + $0x54c] sm:$0xf]  ;;  %v6518_v61 = vor.u32 %v9264_v53, %v6515_v55 }
 0x14b   :  { %v7121_v63 = vld [vmem:[#allocation5 + $0x808] sm:$0xf]  ;;  %v7922_v11 = vor.u32 %v9620_v59, %v7921_v58  ;;  %3512 = vmatpush.bf16.msrb.mxu2 %v7666_v3  ;;  %v9392_v58 = vld [vmem:[#allocation5 + $0x74c] sm:$0xf]  ;;  %v6774_v62 = vor.u32 %v9328_v56, %v6771_v57  ;;  %v3296_v56 = vpop.f32.mrf.mxu1 }
 0x14c   :  { %v9420_v0 = vld [vmem:[#allocation5 + $0x824] sm:$0xf0]  ;;  %v7027_v59 = vld [vmem:[#allocation5 + $0x768] sm:$0xf0] }
 0x14d   :  { %v7377_v4 = vld [vmem:[#allocation5 + $0xa08] sm:$0xf]  ;;  %v7122_v19 = vor.u32 %v9420_v0, %v7121_v63  ;;  %3525 = vmatpush.bf16.msrb.mxu3 %v7922_v11  ;;  %v9192_v63 = vld [vmem:[#allocation5 + $0x10c] sm:$0xf]  ;;  %v7030_v2 = vor.u32 %v9392_v58, %v7027_v59 }
 0x14e   :  { %v9484_v5 = vld [vmem:[#allocation5 + $0xa24] sm:$0xf0]  ;;  %v6227_v0 = vld [vmem:[#allocation5 + $0x128] sm:$0xf0] }
 0x14f   :  { %v7633_v6 = vld [vmem:[#allocation5 + $0xc08] sm:$0xf]  ;;  %v7378_v24 = vor.u32 %v9484_v5, %v7377_v4  ;;  %3487 = vmatpush.bf16.msrb.mxu0 %v7122_v19  ;;  %v6483_v3 = vld [vmem:[#allocation5 + $0x328] sm:$0xf0] }
 0x150   :  { %v9548_v12 = vld [vmem:[#allocation5 + $0xc24] sm:$0xf0]  ;;  %v9320_v4 = vld [vmem:[#allocation5 + $0x50c] sm:$0xf] }
 0x151   :  { %v7889_v13 = vld [vmem:[#allocation5 + $0xe08] sm:$0xf]  ;;  %v7634_v25 = vor.u32 %v9548_v12, %v7633_v6  ;;  %3500 = vmatpush.bf16.msrb.mxu1 %v7378_v24  ;;  %v6739_v5 = vld [vmem:[#allocation5 + $0x528] sm:$0xf0]  ;;  %v6230_v12 = vor.u32 %v9192_v63, %v6227_v0 }
 0x152   :  { %v9612_v14 = vld [vmem:[#allocation5 + $0xe24] sm:$0xf0]  ;;  %3488 = vmatmul.bf16.vlgmr.msrb.gmra.mxu0 %v10182_v38  ;;  %v9384_v6 = vld [vmem:[#allocation5 + $0x70c] sm:$0xf]  ;;  %v6742_v15 = vor.u32 %v9320_v4, %v6739_v5 }
 0x153   :  { %v7890_v29 = vor.u32 %v9612_v14, %v7889_v13  ;;  %3513 = vmatpush.bf16.msrb.mxu2 %v7634_v25  ;;  %3532 = vmatpush.bf16.msra.mxu0 %v6326_v30  ;;  %v6995_v11 = vld [vmem:[#allocation5 + $0x728] sm:$0xf0]  ;;  %v3281_v13 = vpop.f32.mrf.mxu0  ;;  %v6486_v14 = vor.u32 %v9256_v1, %v6483_v3  ;;  %v6198_v30 = vor.u32 %v9184_v17, %v6195_v18  ;;  %v3322_v17 = vpop.f32.mrf.mxu3 }
 0x154   :  { %3501 = vmatmul.bf16.vlgmr.msrb.gmra.mxu1 %v10186_v41  ;;  %v9248_v19 = vld [vmem:[#allocation5 + $0x2cc] sm:$0xf]  ;;  %v3282_v20 = vadd.f32 %v3281_v13, %v10207_v8  ;;  %v6998_v22 = vor.u32 %v9384_v6, %v6995_v11  ;;  %v6966_v8 = vor.u32 %v9376_v27, %v6963_v28  ;;  %v3309_v11 = vpop.f32.mrf.mxu2 }
 0x155   :  { %3526 = vmatpush.bf16.msrb.mxu3 %v7890_v29  ;;  %3545 = vmatpush.bf16.msra.mxu1 %v6582_v32  ;;  %v9312_v24 = vld [vmem:[#allocation5 + $0x4cc] sm:$0xf]  ;;  %v6454_v31 = vor.u32 %v9248_v19, %v6451_v23 }
 0x156   :  { %3514 = vmatmul.bf16.vlgmr.msrb.gmra.mxu2 %v10180_v35  ;;  %v6707_v25 = vld [vmem:[#allocation5 + $0x4e8] sm:$0xf0]  ;;  %v3295_v29 = vadd.f32 %v3294_v21, %v3282_v20 }
 0x157   :  { %3558 = vmatpush.bf16.msra.mxu2 %v6838_v33  ;;  %3533 = vmatpush.bf16.msra.mxu0 %v6294_v48  ;;  %v6710_v32 = vor.u32 %v9312_v24, %v6707_v25  ;;  %v9176_v33 = vld [vmem:[#allocation5 + $0x8c] sm:$0xf] }
 0x158   :  { %3527 = vmatmul.bf16.vlgmr.msrb.gmra.mxu3 %v10184_v39  ;;  %v9240_v36 = vld [vmem:[#allocation5 + $0x28c] sm:$0xf]  ;;  %v3308_v44 = vadd.f32 %v3307_v37, %v3295_v29  ;;  %v6166_v48 = vor.u32 %v9176_v33, %v6163_v34 }
 0x159   :  { %3571 = vmatpush.bf16.msra.mxu3 %v7094_v42  ;;  %3546 = vmatpush.bf16.msra.mxu1 %v6550_v49  ;;  %v6419_v40 = vld [vmem:[#allocation5 + $0x2a8] sm:$0xf0] }
 0x15a   :  { %v9304_v42 = vld [vmem:[#allocation5 + $0x48c] sm:$0xf]  ;;  %v10214_v49 = vadd.f32 %v3320_v45, %v3308_v44  ;;  %v6422_v51 = vor.u32 %v9240_v36, %v6419_v40 }
 0x15b   :  { %3559 = vmatpush.bf16.msra.mxu2 %v6806_v50  ;;  %3534 = vmatpush.bf16.msra.mxu0 %v6262_v60  ;;  %v6675_v43 = vld [vmem:[#allocation5 + $0x4a8] sm:$0xf0]  ;;  %v3283_v50 = vpop.f32.mrf.mxu0 }
 0x15c   :  { %v9368_v46 = vld [vmem:[#allocation5 + $0x68c] sm:$0xf]  ;;  %v6678_v52 = vor.u32 %v9304_v42, %v6675_v43 }
 0x15d   :  { %3572 = vmatpush.bf16.msra.mxu3 %v7062_v54  ;;  %3547 = vmatpush.bf16.msra.mxu1 %v6518_v61  ;;  %v6931_v47 = vld [vmem:[#allocation5 + $0x6a8] sm:$0xf0] }
 0x15e   :  { %v9168_v53 = vld [vmem:[#allocation5 + $0x4c] sm:$0xf]  ;;  %v6934_v57 = vor.u32 %v9368_v46, %v6931_v47 }
 0x15f   :  { %3560 = vmatpush.bf16.msra.mxu2 %v6774_v62  ;;  %3535 = vmatpush.bf16.msra.mxu0 %v6230_v12  ;;  %v6131_v54 = vld [vmem:[#allocation5 + $0x68] sm:$0xf0] }
 0x160   :  { %v9232_v55 = vld [vmem:[#allocation5 + $0x24c] sm:$0xf]  ;;  %v6134_v63 = vor.u32 %v9168_v53, %v6131_v54 }
 0x161   :  { %3573 = vmatpush.bf16.msra.mxu3 %v7030_v2  ;;  %3548 = vmatpush.bf16.msra.mxu1 %v6486_v14  ;;  %v6387_v58 = vld [vmem:[#allocation5 + $0x268] sm:$0xf0] }
 0x162   :  { %v9296_v59 = vld [vmem:[#allocation5 + $0x44c] sm:$0xf]  ;;  %v6390_v2 = vor.u32 %v9232_v55, %v6387_v58 }
 0x163   :  { %3561 = vmatpush.bf16.msra.mxu2 %v6742_v15  ;;  %3536 = vmatpush.bf16.msra.mxu0 %v6198_v30  ;;  %v6643_v60 = vld [vmem:[#allocation5 + $0x468] sm:$0xf0] }
 0x164   :  { %v9360_v61 = vld [vmem:[#allocation5 + $0x64c] sm:$0xf]  ;;  %v6646_v3 = vor.u32 %v9296_v59, %v6643_v60 }
 0x165   :  { %3574 = vmatpush.bf16.msra.mxu3 %v6998_v22  ;;  %3549 = vmatpush.bf16.msra.mxu1 %v6454_v31  ;;  %v6899_v62 = vld [vmem:[#allocation5 + $0x668] sm:$0xf0] }
 0x166   :  { %v9160_v0 = vld [vmem:[#allocation5 + $0xc] sm:$0xf]  ;;  %v6902_v12 = vor.u32 %v9360_v61, %v6899_v62 }
 0x167   :  { %3562 = vmatpush.bf16.msra.mxu2 %v6710_v32  ;;  %3537 = vmatpush.bf16.msra.mxu0 %v6166_v48  ;;  %v6099_v1 = vld [vmem:[#allocation5 + $0x28] sm:$0xf0] }
 0x168   :  { %v9224_v4 = vld [vmem:[#allocation5 + $0x20c] sm:$0xf]  ;;  %v6102_v21 = vor.u32 %v9160_v0, %v6099_v1  ;;  %v645_v1 = vperm.slane %v10204_v7, 1 }
 0x169   :  { %3575 = vmatpush.bf16.msra.mxu3 %v6966_v8  ;;  %3550 = vmatpush.bf16.msra.mxu1 %v6422_v51  ;;  %v6355_v5 = vld [vmem:[#allocation5 + $0x228] sm:$0xf0] }
 0x16a   :  { %v9288_v6 = vld [vmem:[#allocation5 + $0x40c] sm:$0xf]  ;;  %v6358_v25 = vor.u32 %v9224_v4, %v6355_v5 }
 0x16b   :  { %3563 = vmatpush.bf16.msra.mxu2 %v6678_v52  ;;  %v6611_v13 = vld [vmem:[#allocation5 + $0x428] sm:$0xf0]  ;;  %3538 = vmatpush.bf16.msra.mxu0 %v6134_v63 }
 0x16c   :  { %v9352_v14 = vld [vmem:[#allocation5 + $0x60c] sm:$0xf]  ;;  %v6614_v27 = vor.u32 %v9288_v6, %v6611_v13  ;;  %v3333_v13 = vpop.f32.mrf.mxu0 }
 0x16d   :  { %3576 = vmatpush.bf16.msra.mxu3 %v6934_v57  ;;  %v6867_v15 = vld [vmem:[#allocation5 + $0x628] sm:$0xf0]  ;;  %3551 = vmatpush.bf16.msra.mxu1 %v6390_v2 }
 0x16e   :  { %v9472_v18 = vld [vmem:[#allocation5 + $0x9cc] sm:$0xf]  ;;  %v6870_v30 = vor.u32 %v9352_v14, %v6867_v15 }
 0x16f   :  { %v7347_v19 = vld [vmem:[#allocation5 + $0x9e8] sm:$0xf0]  ;;  %3564 = vmatpush.bf16.msra.mxu2 %v6646_v3  ;;  %3539 = vmatpush.bf16.msra.mxu0 %v6102_v21  ;;  %v3346_v21 = vpop.f32.mrf.mxu1 }
 0x170   :  { %v9536_v20 = vld [vmem:[#allocation5 + $0xbcc] sm:$0xf]  ;;  %v7350_v31 = vor.u32 %v9472_v18, %v7347_v19 }
 0x171   :  { %v7603_v22 = vld [vmem:[#allocation5 + $0xbe8] sm:$0xf0]  ;;  %3577 = vmatpush.bf16.msra.mxu3 %v6902_v12  ;;  %3552 = vmatpush.bf16.msra.mxu1 %v6358_v25 }
 0x172   :  { %v9600_v23 = vld [vmem:[#allocation5 + $0xdcc] sm:$0xf]  ;;  %v7606_v32 = vor.u32 %v9536_v20, %v7603_v22  ;;  %3540 = vmatmul.bf16.vlgmr.msra.gmra.mxu0 %v10170_v10  ;;  %v3334_v20 = vadd.f32 %v3333_v13, %v645_v1 }
 0x173   :  { %v7859_v24 = vld [vmem:[#allocation5 + $0xde8] sm:$0xf0]  ;;  %3565 = vmatpush.bf16.msra.mxu2 %v6614_v27  ;;  %3584 = vmatpush.bf16.msrb.mxu0 %v7350_v31 }
 0x174   :  { %v9664_v28 = vld [vmem:[#allocation5 + $0xfcc] sm:$0xf]  ;;  %v7862_v33 = vor.u32 %v9600_v23, %v7859_v24  ;;  %3553 = vmatmul.bf16.vlgmr.msra.gmra.mxu1 %v10177_v26 }
 0x175   :  { %v8115_v29 = vld [vmem:[#allocation5 + $0xfe8] sm:$0xf0]  ;;  %3578 = vmatpush.bf16.msra.mxu3 %v6870_v30  ;;  %3597 = vmatpush.bf16.msrb.mxu1 %v7606_v32 }
 0x176   :  { %v9464_v34 = vld [vmem:[#allocation5 + $0x98c] sm:$0xf]  ;;  %v8118_v8 = vor.u32 %v9664_v28, %v8115_v29  ;;  %3566 = vmatmul.bf16.vlgmr.msra.gmra.mxu2 %v10168_v9  ;;  %v3347_v28 = vadd.f32 %v3346_v21, %v3334_v20  ;;  %v6585_v20 = vld [vmem:[#allocation5 + $0x3d0] sm:$0xf] }
 0x177   :  { %v7315_v36 = vld [vmem:[#allocation5 + $0x9a8] sm:$0xf0]  ;;  %3610 = vmatpush.bf16.msrb.mxu2 %v7862_v33 }
 0x178   :  { %v9528_v37 = vld [vmem:[#allocation5 + $0xb8c] sm:$0xf]  ;;  %v7318_v46 = vor.u32 %v9464_v34, %v7315_v36  ;;  %3579 = vmatmul.bf16.vlgmr.msra.gmra.mxu3 %v10172_v16  ;;  %v3359_v36 = vpop.f32.mrf.mxu2 }
 0x179   :  { %v7571_v40 = vld [vmem:[#allocation5 + $0xba8] sm:$0xf0]  ;;  %3623 = vmatpush.bf16.msrb.mxu3 %v8118_v8 }
 0x17a   :  { %v9592_v42 = vld [vmem:[#allocation5 + $0xd8c] sm:$0xf]  ;;  %v7574_v47 = vor.u32 %v9528_v37, %v7571_v40  ;;  %3585 = vmatpush.bf16.msrb.mxu0 %v7318_v46 }
 0x17b   :  { %v7827_v43 = vld [vmem:[#allocation5 + $0xda8] sm:$0xf0] }
 0x17c   :  { %v9656_v44 = vld [vmem:[#allocation5 + $0xf8c] sm:$0xf]  ;;  %v7830_v48 = vor.u32 %v9592_v42, %v7827_v43  ;;  %3598 = vmatpush.bf16.msrb.mxu1 %v7574_v47  ;;  %v3360_v43 = vadd.f32 %v3359_v36, %v3347_v28  ;;  %v9413_v28 = vld [vmem:[#allocation5 + $0x7ec] sm:$0xf0] }
 0x17d   :  { %v8083_v45 = vld [vmem:[#allocation5 + $0xfa8] sm:$0xf0]  ;;  %v6553_v36 = vld [vmem:[#allocation5 + $0x390] sm:$0xf] }
 0x17e   :  { %v9456_v50 = vld [vmem:[#allocation5 + $0x94c] sm:$0xf]  ;;  %v8086_v53 = vor.u32 %v9656_v44, %v8083_v45  ;;  %3611 = vmatpush.bf16.msrb.mxu2 %v7830_v48  ;;  %v3372_v44 = vpop.f32.mrf.mxu3 }
 0x17f   :  { %v7283_v51 = vld [vmem:[#allocation5 + $0x968] sm:$0xf0]  ;;  %v10221_v48 = vadd.f32 %v3372_v44, %v3360_v43  ;;  %v7065_v43 = vld [vmem:[#allocation5 + $0x790] sm:$0xf] }
 0x180   :  { %v9520_v52 = vld [vmem:[#allocation5 + $0xb4c] sm:$0xf]  ;;  %v7286_v59 = vor.u32 %v9456_v50, %v7283_v51  ;;  %3624 = vmatpush.bf16.msrb.mxu3 %v8086_v53  ;;  %v3335_v50 = vpop.f32.mrf.mxu0  ;;  %v9405_v44 = vld [vmem:[#allocation5 + $0x7ac] sm:$0xf0] }
 0x181   :  { %v7539_v54 = vld [vmem:[#allocation5 + $0xb68] sm:$0xf0]  ;;  %v6265_v50 = vld [vmem:[#allocation5 + $0x150] sm:$0xf] }
 0x182   :  { %v9584_v55 = vld [vmem:[#allocation5 + $0xd4c] sm:$0xf]  ;;  %v7542_v61 = vor.u32 %v9520_v52, %v7539_v54  ;;  %3586 = vmatpush.bf16.msrb.mxu0 %v7286_v59 }
 0x183   :  { %v7795_v56 = vld [vmem:[#allocation5 + $0xd68] sm:$0xf0] }
 0x184   :  { %v9648_v57 = vld [vmem:[#allocation5 + $0xf4c] sm:$0xf]  ;;  %v7798_v62 = vor.u32 %v9584_v55, %v7795_v56  ;;  %3599 = vmatpush.bf16.msrb.mxu1 %v7542_v61  ;;  %v3348_v56 = vpop.f32.mrf.mxu1 }
 0x185   :  { %v8051_v58 = vld [vmem:[#allocation5 + $0xf68] sm:$0xf0]  ;;  %v9333_v56 = vld [vmem:[#allocation5 + $0x56c] sm:$0xf0] }
 0x186   :  { %v9448_v60 = vld [vmem:[#allocation5 + $0x90c] sm:$0xf]  ;;  %v8054_v2 = vor.u32 %v9648_v57, %v8051_v58  ;;  %3612 = vmatpush.bf16.msrb.mxu2 %v7798_v62 }
 0x187   :  { %v7251_v63 = vld [vmem:[#allocation5 + $0x928] sm:$0xf0] }
 0x188   :  { %v9512_v0 = vld [vmem:[#allocation5 + $0xb0c] sm:$0xf]  ;;  %v7254_v12 = vor.u32 %v9448_v60, %v7251_v63  ;;  %3625 = vmatpush.bf16.msrb.mxu3 %v8054_v2 }
 0x189   :  { %v7507_v3 = vld [vmem:[#allocation5 + $0xb28] sm:$0xf0] }
 0x18a   :  { %v9576_v4 = vld [vmem:[#allocation5 + $0xd0c] sm:$0xf]  ;;  %v7510_v14 = vor.u32 %v9512_v0, %v7507_v3  ;;  %3587 = vmatpush.bf16.msrb.mxu0 %v7254_v12 }
 0x18b   :  { %v7763_v5 = vld [vmem:[#allocation5 + $0xd28] sm:$0xf0] }
 0x18c   :  { %v9640_v6 = vld [vmem:[#allocation5 + $0xf0c] sm:$0xf]  ;;  %v7766_v15 = vor.u32 %v9576_v4, %v7763_v5  ;;  %3600 = vmatpush.bf16.msrb.mxu1 %v7510_v14 }
 0x18d   :  { %v8019_v11 = vld [vmem:[#allocation5 + $0xf28] sm:$0xf0] }
 0x18e   :  { %v9440_v17 = vld [vmem:[#allocation5 + $0x8cc] sm:$0xf]  ;;  %v8022_v7 = vor.u32 %v9640_v6, %v8019_v11  ;;  %3613 = vmatpush.bf16.msrb.mxu2 %v7766_v15  ;;  %v3361_v11 = vpop.f32.mrf.mxu2 }
 0x18f   :  { %v7219_v18 = vld [vmem:[#allocation5 + $0x8e8] sm:$0xf0] }
 0x190   :  { %v9504_v19 = vld [vmem:[#allocation5 + $0xacc] sm:$0xf]  ;;  %v7222_v29 = vor.u32 %v9440_v17, %v7219_v18  ;;  %3626 = vmatpush.bf16.msrb.mxu3 %v8022_v7  ;;  %v3374_v17 = vpop.f32.mrf.mxu3  ;;  %v6329_v18 = vld [vmem:[#allocation5 + $0x1d0] sm:$0xf] }
 0x191   :  { %v7475_v22 = vld [vmem:[#allocation5 + $0xae8] sm:$0xf0]  ;;  %v9285_v7 = vld [vmem:[#allocation5 + $0x3ec] sm:$0xf0] }
 0x192   :  { %v9568_v23 = vld [vmem:[#allocation5 + $0xccc] sm:$0xf]  ;;  %v7478_v30 = vor.u32 %v9504_v19, %v7475_v22  ;;  %3588 = vmatpush.bf16.msrb.mxu0 %v7222_v29  ;;  %v9221_v19 = vld [vmem:[#allocation5 + $0x1ec] sm:$0xf0] }
 0x193   :  { %v7731_v24 = vld [vmem:[#allocation5 + $0xce8] sm:$0xf0]  ;;  %v6841_v22 = vld [vmem:[#allocation5 + $0x5d0] sm:$0xf] }
 0x194   :  { %v9632_v25 = vld [vmem:[#allocation5 + $0xecc] sm:$0xf]  ;;  %v7734_v31 = vor.u32 %v9568_v23, %v7731_v24  ;;  %3601 = vmatpush.bf16.msrb.mxu1 %v7478_v30  ;;  %v9349_v23 = vld [vmem:[#allocation5 + $0x5ec] sm:$0xf0]  ;;  %v6330_v30 = vor.u32 %v9221_v19, %v6329_v18 }
 0x195   :  { %v7987_v27 = vld [vmem:[#allocation5 + $0xee8] sm:$0xf0]  ;;  %v9189_v17 = vld [vmem:[#allocation5 + $0xec] sm:$0xf0] }
 0x196   :  { %v9432_v32 = vld [vmem:[#allocation5 + $0x88c] sm:$0xf]  ;;  %v7990_v37 = vor.u32 %v9632_v25, %v7987_v27  ;;  %3614 = vmatpush.bf16.msrb.mxu2 %v7734_v31  ;;  %v7097_v27 = vld [vmem:[#allocation5 + $0x7d0] sm:$0xf]  ;;  %v6586_v31 = vor.u32 %v9285_v7, %v6585_v20  ;;  %v3398_v20 = vpop.f32.mrf.mxu1 }
 0x197   :  { %v7187_v33 = vld [vmem:[#allocation5 + $0x8a8] sm:$0xf0]  ;;  %v6457_v18 = vld [vmem:[#allocation5 + $0x2d0] sm:$0xf] }
 0x198   :  { %v9496_v34 = vld [vmem:[#allocation5 + $0xa8c] sm:$0xf]  ;;  %v7190_v47 = vor.u32 %v9432_v32, %v7187_v33  ;;  %3627 = vmatpush.bf16.msrb.mxu3 %v7990_v37  ;;  %v6842_v32 = vor.u32 %v9349_v23, %v6841_v22  ;;  %v6297_v33 = vld [vmem:[#allocation5 + $0x190] sm:$0xf]  ;;  %v7098_v37 = vor.u32 %v9413_v28, %v7097_v27 }
 0x199   :  { %v7443_v8 = vld [vmem:[#allocation5 + $0xaa8] sm:$0xf0]  ;;  %v9253_v7 = vld [vmem:[#allocation5 + $0x2ec] sm:$0xf0] }
 0x19a   :  { %v9560_v40 = vld [vmem:[#allocation5 + $0xc8c] sm:$0xf]  ;;  %v7446_v51 = vor.u32 %v9496_v34, %v7443_v8  ;;  %3589 = vmatpush.bf16.msrb.mxu0 %v7190_v47  ;;  %v9213_v34 = vld [vmem:[#allocation5 + $0x1ac] sm:$0xf0] }
 0x19b   :  { %v7699_v42 = vld [vmem:[#allocation5 + $0xca8] sm:$0xf0]  ;;  %v9277_v8 = vld [vmem:[#allocation5 + $0x3ac] sm:$0xf0] }
 0x19c   :  { %v9624_v45 = vld [vmem:[#allocation5 + $0xe8c] sm:$0xf]  ;;  %v7702_v52 = vor.u32 %v9560_v40, %v7699_v42  ;;  %3602 = vmatpush.bf16.msrb.mxu1 %v7446_v51  ;;  %v6809_v40 = vld [vmem:[#allocation5 + $0x590] sm:$0xf] }
 0x19d   :  { %v7955_v46 = vld [vmem:[#allocation5 + $0xea8] sm:$0xf0]  ;;  %v9341_v42 = vld [vmem:[#allocation5 + $0x5ac] sm:$0xf0] }
 0x19e   :  { %v9424_v53 = vld [vmem:[#allocation5 + $0x84c] sm:$0xf]  ;;  %v7958_v57 = vor.u32 %v9624_v45, %v7955_v46  ;;  %3615 = vmatpush.bf16.msrb.mxu2 %v7702_v52  ;;  %v6298_v45 = vor.u32 %v9213_v34, %v6297_v33  ;;  %v6554_v46 = vor.u32 %v9277_v8, %v6553_v36  ;;  %v6810_v47 = vor.u32 %v9341_v42, %v6809_v40  ;;  %v9205_v51 = vld [vmem:[#allocation5 + $0x16c] sm:$0xf0]  ;;  %v3411_v34 = vpop.f32.mrf.mxu2  ;;  %v3424_v42 = vpop.f32.mrf.mxu3 }
 0x19f   :  { %v7155_v54 = vld [vmem:[#allocation5 + $0x868] sm:$0xf0]  ;;  %v6521_v52 = vld [vmem:[#allocation5 + $0x350] sm:$0xf] }
 0x1a0   :  { %v9488_v55 = vld [vmem:[#allocation5 + $0xa4c] sm:$0xf]  ;;  %v7158_v63 = vor.u32 %v9424_v53, %v7155_v54  ;;  %3628 = vmatpush.bf16.msrb.mxu3 %v7958_v57  ;;  %v7066_v53 = vor.u32 %v9405_v44, %v7065_v43  ;;  %v9269_v54 = vld [vmem:[#allocation5 + $0x36c] sm:$0xf0] }
 0x1a1   :  { %v7411_v58 = vld [vmem:[#allocation5 + $0xa68] sm:$0xf0]  ;;  %v7033_v57 = vld [vmem:[#allocation5 + $0x750] sm:$0xf] }
 0x1a2   :  { %v9552_v59 = vld [vmem:[#allocation5 + $0xc4c] sm:$0xf]  ;;  %v7414_v2 = vor.u32 %v9488_v55, %v7411_v58  ;;  %3590 = vmatpush.bf16.msrb.mxu0 %v7158_v63  ;;  %v6777_v55 = vld [vmem:[#allocation5 + $0x550] sm:$0xf] }
 0x1a3   :  { %v7667_v60 = vld [vmem:[#allocation5 + $0xc68] sm:$0xf0]  ;;  %v9397_v58 = vld [vmem:[#allocation5 + $0x76c] sm:$0xf0] }
 0x1a4   :  { %v9616_v61 = vld [vmem:[#allocation5 + $0xe4c] sm:$0xf]  ;;  %v7670_v3 = vor.u32 %v9552_v59, %v7667_v60  ;;  %3603 = vmatpush.bf16.msrb.mxu1 %v7414_v2  ;;  %v6266_v59 = vor.u32 %v9205_v51, %v6265_v50  ;;  %v6522_v60 = vor.u32 %v9269_v54, %v6521_v52  ;;  %v9197_v63 = vld [vmem:[#allocation5 + $0x12c] sm:$0xf0] }
 0x1a5   :  { %v7923_v62 = vld [vmem:[#allocation5 + $0xe68] sm:$0xf0]  ;;  %v9261_v2 = vld [vmem:[#allocation5 + $0x32c] sm:$0xf0] }
 0x1a6   :  { %v9416_v0 = vld [vmem:[#allocation5 + $0x80c] sm:$0xf]  ;;  %v7926_v12 = vor.u32 %v9616_v61, %v7923_v62  ;;  %3616 = vmatpush.bf16.msrb.mxu2 %v7670_v3  ;;  %v6778_v61 = vor.u32 %v9333_v56, %v6777_v55  ;;  %v6233_v62 = vld [vmem:[#allocation5 + $0x110] sm:$0xf]  ;;  %v3400_v55 = vpop.f32.mrf.mxu1 }
 0x1a7   :  { %v7123_v1 = vld [vmem:[#allocation5 + $0x828] sm:$0xf0]  ;;  %v6745_v3 = vld [vmem:[#allocation5 + $0x510] sm:$0xf]  ;;  %v6234_v11 = vor.u32 %v9197_v63, %v6233_v62 }
 0x1a8   :  { %v9480_v4 = vld [vmem:[#allocation5 + $0xa0c] sm:$0xf]  ;;  %v7126_v21 = vor.u32 %v9416_v0, %v7123_v1  ;;  %3629 = vmatpush.bf16.msrb.mxu3 %v7926_v12  ;;  %v6489_v0 = vld [vmem:[#allocation5 + $0x310] sm:$0xf]  ;;  %v7034_v1 = vor.u32 %v9397_v58, %v7033_v57  ;;  %v3385_v12 = vpop.f32.mrf.mxu0 }
 0x1a9   :  { %v7379_v5 = vld [vmem:[#allocation5 + $0xa28] sm:$0xf0]  ;;  %v3386_v19 = vadd.f32 %v3385_v12, %v10221_v48  ;;  %v6713_v22 = vld [vmem:[#allocation5 + $0x4d0] sm:$0xf] }
 0x1aa   :  { %v9544_v6 = vld [vmem:[#allocation5 + $0xc0c] sm:$0xf]  ;;  %v7382_v24 = vor.u32 %v9480_v4, %v7379_v5  ;;  %3591 = vmatpush.bf16.msrb.mxu0 %v7126_v21  ;;  %v9325_v4 = vld [vmem:[#allocation5 + $0x52c] sm:$0xf0] }
 0x1ab   :  { %v7635_v13 = vld [vmem:[#allocation5 + $0xc28] sm:$0xf0]  ;;  %v7001_v5 = vld [vmem:[#allocation5 + $0x710] sm:$0xf]  ;;  %v3399_v27 = vadd.f32 %v3398_v20, %v3386_v19 }
 0x1ac   :  { %v9608_v14 = vld [vmem:[#allocation5 + $0xe0c] sm:$0xf]  ;;  %v7638_v25 = vor.u32 %v9544_v6, %v7635_v13  ;;  %3604 = vmatpush.bf16.msrb.mxu1 %v7382_v24  ;;  %v9389_v6 = vld [vmem:[#allocation5 + $0x72c] sm:$0xf0]  ;;  %v6490_v13 = vor.u32 %v9261_v2, %v6489_v0 }
 0x1ad   :  { %v7891_v15 = vld [vmem:[#allocation5 + $0xe28] sm:$0xf0]  ;;  %3592 = vmatmul.bf16.vlgmr.msrb.gmra.mxu0 %v10182_v38  ;;  %v7002_v21 = vor.u32 %v9389_v6, %v7001_v5  ;;  %v9317_v23 = vld [vmem:[#allocation5 + $0x4ec] sm:$0xf0]  ;;  %v3412_v40 = vadd.f32 %v3411_v34, %v3399_v27  ;;  %v3413_v6 = vpop.f32.mrf.mxu2 }
 0x1ae   :  { %v7894_v29 = vor.u32 %v9608_v14, %v7891_v15  ;;  %3617 = vmatpush.bf16.msrb.mxu2 %v7638_v25  ;;  %3636 = vmatpush.bf16.msra.mxu0 %v6330_v30  ;;  %v6746_v14 = vor.u32 %v9325_v4, %v6745_v3  ;;  %v6201_v15 = vld [vmem:[#allocation5 + $0xd0] sm:$0xf]  ;;  %v6714_v30 = vor.u32 %v9317_v23, %v6713_v22 }
 0x1af   :  { %3605 = vmatmul.bf16.vlgmr.msrb.gmra.mxu1 %v10186_v41  ;;  %v6969_v24 = vld [vmem:[#allocation5 + $0x6d0] sm:$0xf]  ;;  %v6202_v28 = vor.u32 %v9189_v17, %v6201_v15  ;;  %v3426_v15 = vpop.f32.mrf.mxu3 }
 0x1b0   :  { %3630 = vmatpush.bf16.msrb.mxu3 %v7894_v29  ;;  %3649 = vmatpush.bf16.msra.mxu1 %v6586_v31  ;;  %v9381_v25 = vld [vmem:[#allocation5 + $0x6ec] sm:$0xf0]  ;;  %v6458_v29 = vor.u32 %v9253_v7, %v6457_v18 }
 0x1b1   :  { %3618 = vmatmul.bf16.vlgmr.msrb.gmra.mxu2 %v10180_v35  ;;  %v6169_v31 = vld [vmem:[#allocation5 + $0x90] sm:$0xf]  ;;  %v6970_v48 = vor.u32 %v9381_v25, %v6969_v24 }
 0x1b2   :  { %3662 = vmatpush.bf16.msra.mxu2 %v6842_v32  ;;  %3637 = vmatpush.bf16.msra.mxu0 %v6298_v45  ;;  %v9181_v32 = vld [vmem:[#allocation5 + $0xac] sm:$0xf0] }
 0x1b3   :  { %3631 = vmatmul.bf16.vlgmr.msrb.gmra.mxu3 %v10184_v39  ;;  %v6425_v33 = vld [vmem:[#allocation5 + $0x290] sm:$0xf]  ;;  %v6170_v45 = vor.u32 %v9181_v32, %v6169_v31 }
 0x1b4   :  { %3675 = vmatpush.bf16.msra.mxu3 %v7098_v37  ;;  %3650 = vmatpush.bf16.msra.mxu1 %v6554_v46  ;;  %v9245_v36 = vld [vmem:[#allocation5 + $0x2ac] sm:$0xf0]  ;;  %v10228_v46 = vadd.f32 %v3424_v42, %v3412_v40 }
 0x1b5   :  { %v6681_v37 = vld [vmem:[#allocation5 + $0x490] sm:$0xf]  ;;  %v6426_v50 = vor.u32 %v9245_v36, %v6425_v33 }
 0x1b6   :  { %3663 = vmatpush.bf16.msra.mxu2 %v6810_v47  ;;  %3638 = vmatpush.bf16.msra.mxu0 %v6266_v59  ;;  %v9309_v8 = vld [vmem:[#allocation5 + $0x4ac] sm:$0xf0]  ;;  %v3387_v47 = vpop.f32.mrf.mxu0 }
 0x1b7   :  { %v6937_v43 = vld [vmem:[#allocation5 + $0x690] sm:$0xf]  ;;  %v6682_v51 = vor.u32 %v9309_v8, %v6681_v37 }
 0x1b8   :  { %3676 = vmatpush.bf16.msra.mxu3 %v7066_v53  ;;  %3651 = vmatpush.bf16.msra.mxu1 %v6522_v60  ;;  %v9373_v44 = vld [vmem:[#allocation5 + $0x6ac] sm:$0xf0] }
 0x1b9   :  { %v6137_v52 = vld [vmem:[#allocation5 + $0x50] sm:$0xf]  ;;  %v6938_v56 = vor.u32 %v9373_v44, %v6937_v43 }
 0x1ba   :  { %3664 = vmatpush.bf16.msra.mxu2 %v6778_v61  ;;  %3639 = vmatpush.bf16.msra.mxu0 %v6234_v11  ;;  %v9173_v53 = vld [vmem:[#allocation5 + $0x6c] sm:$0xf0] }
 0x1bb   :  { %v6393_v54 = vld [vmem:[#allocation5 + $0x250] sm:$0xf]  ;;  %v6138_v62 = vor.u32 %v9173_v53, %v6137_v52 }
 0x1bc   :  { %3677 = vmatpush.bf16.msra.mxu3 %v7034_v1  ;;  %3652 = vmatpush.bf16.msra.mxu1 %v6490_v13  ;;  %v9237_v57 = vld [vmem:[#allocation5 + $0x26c] sm:$0xf0] }
 0x1bd   :  { %v6649_v58 = vld [vmem:[#allocation5 + $0x450] sm:$0xf]  ;;  %v6394_v1 = vor.u32 %v9237_v57, %v6393_v54 }
 0x1be   :  { %3665 = vmatpush.bf16.msra.mxu2 %v6746_v14  ;;  %3640 = vmatpush.bf16.msra.mxu0 %v6202_v28  ;;  %v9301_v59 = vld [vmem:[#allocation5 + $0x46c] sm:$0xf0] }
 0x1bf   :  { %v6905_v60 = vld [vmem:[#allocation5 + $0x650] sm:$0xf]  ;;  %v6650_v2 = vor.u32 %v9301_v59, %v6649_v58 }
 0x1c0   :  { %3678 = vmatpush.bf16.msra.mxu3 %v7002_v21  ;;  %3653 = vmatpush.bf16.msra.mxu1 %v6458_v29  ;;  %v9365_v61 = vld [vmem:[#allocation5 + $0x66c] sm:$0xf0] }
 0x1c1   :  { %v6105_v63 = vld [vmem:[#allocation5 + $0x10] sm:$0xf]  ;;  %v6906_v11 = vor.u32 %v9365_v61, %v6905_v60 }
 0x1c2   :  { %3666 = vmatpush.bf16.msra.mxu2 %v6714_v30  ;;  %3641 = vmatpush.bf16.msra.mxu0 %v6170_v45  ;;  %v9165_v0 = vld [vmem:[#allocation5 + $0x2c] sm:$0xf0] }
 0x1c3   :  { %v6361_v3 = vld [vmem:[#allocation5 + $0x210] sm:$0xf]  ;;  %v6106_v20 = vor.u32 %v9165_v0, %v6105_v63  ;;  %v10234_v0 = vld [vmem:[#allocation7] sm:$0xff] }
 0x1c4   :  { %3679 = vmatpush.bf16.msra.mxu3 %v6970_v48  ;;  %3654 = vmatpush.bf16.msra.mxu1 %v6426_v50  ;;  %v9229_v4 = vld [vmem:[#allocation5 + $0x22c] sm:$0xf0] }
 0x1c5   :  { %v6617_v5 = vld [vmem:[#allocation5 + $0x410] sm:$0xf]  ;;  %v6362_v23 = vor.u32 %v9229_v4, %v6361_v3 }
 0x1c6   :  { %3667 = vmatpush.bf16.msra.mxu2 %v6682_v51  ;;  %v9293_v12 = vld [vmem:[#allocation5 + $0x42c] sm:$0xf0]  ;;  %3642 = vmatpush.bf16.msra.mxu0 %v6138_v62 }
 0x1c7   :  { %v6873_v13 = vld [vmem:[#allocation5 + $0x610] sm:$0xf]  ;;  %v6618_v24 = vor.u32 %v9293_v12, %v6617_v5 }
 0x1c8   :  { %3680 = vmatpush.bf16.msra.mxu3 %v6938_v56  ;;  %v9357_v14 = vld [vmem:[#allocation5 + $0x62c] sm:$0xf0]  ;;  %3655 = vmatpush.bf16.msra.mxu1 %v6394_v1  ;;  %v646_v1 = vperm.slane %v10234_v0, 2 }
 0x1c9   :  { %v7353_v17 = vld [vmem:[#allocation5 + $0x9d0] sm:$0xf]  ;;  %v6874_v28 = vor.u32 %v9357_v14, %v6873_v13  ;;  %v3437_v13 = vpop.f32.mrf.mxu0 }
 0x1ca   :  { %v9477_v18 = vld [vmem:[#allocation5 + $0x9ec] sm:$0xf0]  ;;  %3668 = vmatpush.bf16.msra.mxu2 %v6650_v2  ;;  %3643 = vmatpush.bf16.msra.mxu0 %v6106_v20  ;;  %v3438_v20 = vadd.f32 %v3437_v13, %v646_v1 }
 0x1cb   :  { %v7609_v19 = vld [vmem:[#allocation5 + $0xbd0] sm:$0xf]  ;;  %v7354_v29 = vor.u32 %v9477_v18, %v7353_v17 }
 0x1cc   :  { %v9541_v21 = vld [vmem:[#allocation5 + $0xbec] sm:$0xf0]  ;;  %3681 = vmatpush.bf16.msra.mxu3 %v6906_v11  ;;  %3656 = vmatpush.bf16.msra.mxu1 %v6362_v23 }
 0x1cd   :  { %v7865_v7 = vld [vmem:[#allocation5 + $0xdd0] sm:$0xf]  ;;  %v7610_v30 = vor.u32 %v9541_v21, %v7609_v19  ;;  %3644 = vmatmul.bf16.vlgmr.msra.gmra.mxu0 %v10170_v10  ;;  %v3450_v21 = vpop.f32.mrf.mxu1 }
 0x1ce   :  { %v9605_v22 = vld [vmem:[#allocation5 + $0xdec] sm:$0xf0]  ;;  %3669 = vmatpush.bf16.msra.mxu2 %v6618_v24  ;;  %3688 = vmatpush.bf16.msrb.mxu0 %v7354_v29 }
 0x1cf   :  { %v8121_v25 = vld [vmem:[#allocation5 + $0xfd0] sm:$0xf]  ;;  %v7866_v31 = vor.u32 %v9605_v22, %v7865_v7  ;;  %3657 = vmatmul.bf16.vlgmr.msra.gmra.mxu1 %v10177_v26 }
 0x1d0   :  { %v9669_v27 = vld [vmem:[#allocation5 + $0xfec] sm:$0xf0]  ;;  %3682 = vmatpush.bf16.msra.mxu3 %v6874_v28  ;;  %3701 = vmatpush.bf16.msrb.mxu1 %v7610_v30  ;;  %v3451_v28 = vadd.f32 %v3450_v21, %v3438_v20  ;;  %v9217_v20 = vld [vmem:[#allocation5 + $0x1d4] sm:$0xf] }
 0x1d1   :  { %v7321_v32 = vld [vmem:[#allocation5 + $0x990] sm:$0xf]  ;;  %v8122_v48 = vor.u32 %v9669_v27, %v8121_v25  ;;  %3670 = vmatmul.bf16.vlgmr.msra.gmra.mxu2 %v10168_v9  ;;  %v6331_v21 = vld [vmem:[#allocation5 + $0x1f0] sm:$0xf0] }
 0x1d2   :  { %v9469_v33 = vld [vmem:[#allocation5 + $0x9ac] sm:$0xf0]  ;;  %3714 = vmatpush.bf16.msrb.mxu2 %v7866_v31 }
 0x1d3   :  { %v7577_v34 = vld [vmem:[#allocation5 + $0xb90] sm:$0xf]  ;;  %v7322_v43 = vor.u32 %v9469_v33, %v7321_v32  ;;  %3683 = vmatmul.bf16.vlgmr.msra.gmra.mxu3 %v10172_v16 }
 0x1d4   :  { %v9533_v36 = vld [vmem:[#allocation5 + $0xbac] sm:$0xf0]  ;;  %3727 = vmatpush.bf16.msrb.mxu3 %v8122_v48  ;;  %v3463_v48 = vpop.f32.mrf.mxu2 }
 0x1d5   :  { %v7833_v37 = vld [vmem:[#allocation5 + $0xd90] sm:$0xf]  ;;  %v7578_v44 = vor.u32 %v9533_v36, %v7577_v34  ;;  %3689 = vmatpush.bf16.msrb.mxu0 %v7322_v43  ;;  %v3476_v43 = vpop.f32.mrf.mxu3 }
 0x1d6   :  { %v9597_v8 = vld [vmem:[#allocation5 + $0xdac] sm:$0xf0] }
 0x1d7   :  { %v8089_v40 = vld [vmem:[#allocation5 + $0xf90] sm:$0xf]  ;;  %v7834_v45 = vor.u32 %v9597_v8, %v7833_v37  ;;  %3702 = vmatpush.bf16.msrb.mxu1 %v7578_v44 }
 0x1d8   :  { %v9661_v42 = vld [vmem:[#allocation5 + $0xfac] sm:$0xf0] }
 0x1d9   :  { %v7289_v47 = vld [vmem:[#allocation5 + $0x950] sm:$0xf]  ;;  %v8090_v52 = vor.u32 %v9661_v42, %v8089_v40  ;;  %3715 = vmatpush.bf16.msrb.mxu2 %v7834_v45  ;;  %v3464_v42 = vadd.f32 %v3463_v48, %v3451_v28  ;;  %v9209_v48 = vld [vmem:[#allocation5 + $0x194] sm:$0xf] }
 0x1da   :  { %v9461_v50 = vld [vmem:[#allocation5 + $0x96c] sm:$0xf0] }
 0x1db   :  { %v7545_v51 = vld [vmem:[#allocation5 + $0xb50] sm:$0xf]  ;;  %v7290_v58 = vor.u32 %v9461_v50, %v7289_v47  ;;  %3728 = vmatpush.bf16.msrb.mxu3 %v8090_v52  ;;  %v10237_v50 = vadd.f32 %v3476_v43, %v3464_v42  ;;  %v9337_v42 = vld [vmem:[#allocation5 + $0x594] sm:$0xf] }
 0x1dc   :  { %v9525_v53 = vld [vmem:[#allocation5 + $0xb6c] sm:$0xf0]  ;;  %v3465_v13 = vpop.f32.mrf.mxu2  ;;  %v6811_v43 = vld [vmem:[#allocation5 + $0x5b0] sm:$0xf0] }
 0x1dd   :  { %v7801_v54 = vld [vmem:[#allocation5 + $0xd50] sm:$0xf]  ;;  %v7546_v60 = vor.u32 %v9525_v53, %v7545_v51  ;;  %3690 = vmatpush.bf16.msrb.mxu0 %v7290_v58  ;;  %v3439_v51 = vpop.f32.mrf.mxu0  ;;  %v9385_v13 = vld [vmem:[#allocation5 + $0x714] sm:$0xf] }
 0x1de   :  { %v9589_v55 = vld [vmem:[#allocation5 + $0xd6c] sm:$0xf0] }
 0x1df   :  { %v8057_v56 = vld [vmem:[#allocation5 + $0xf50] sm:$0xf]  ;;  %v7802_v61 = vor.u32 %v9589_v55, %v7801_v54  ;;  %3703 = vmatpush.bf16.msrb.mxu1 %v7546_v60 }
 0x1e0   :  { %v9653_v57 = vld [vmem:[#allocation5 + $0xf6c] sm:$0xf0] }
 0x1e1   :  { %v7257_v59 = vld [vmem:[#allocation5 + $0x910] sm:$0xf]  ;;  %v8058_v2 = vor.u32 %v9653_v57, %v8057_v56  ;;  %3716 = vmatpush.bf16.msrb.mxu2 %v7802_v61  ;;  %v3452_v57 = vpop.f32.mrf.mxu1 }
 0x1e2   :  { %v9453_v62 = vld [vmem:[#allocation5 + $0x92c] sm:$0xf0]  ;;  %v6523_v57 = vld [vmem:[#allocation5 + $0x370] sm:$0xf0] }
 0x1e3   :  { %v7513_v63 = vld [vmem:[#allocation5 + $0xb10] sm:$0xf]  ;;  %v7258_v12 = vor.u32 %v9453_v62, %v7257_v59  ;;  %3729 = vmatpush.bf16.msrb.mxu3 %v8058_v2 }
 0x1e4   :  { %v9517_v3 = vld [vmem:[#allocation5 + $0xb2c] sm:$0xf0] }
 0x1e5   :  { %v7769_v4 = vld [vmem:[#allocation5 + $0xd10] sm:$0xf]  ;;  %v7514_v14 = vor.u32 %v9517_v3, %v7513_v63  ;;  %3691 = vmatpush.bf16.msrb.mxu0 %v7258_v12 }
 0x1e6   :  { %v9581_v5 = vld [vmem:[#allocation5 + $0xd2c] sm:$0xf0] }
 0x1e7   :  { %v8025_v6 = vld [vmem:[#allocation5 + $0xf10] sm:$0xf]  ;;  %v7770_v15 = vor.u32 %v9581_v5, %v7769_v4  ;;  %3704 = vmatpush.bf16.msrb.mxu1 %v7514_v14 }
 0x1e8   :  { %v9645_v11 = vld [vmem:[#allocation5 + $0xf2c] sm:$0xf0] }
 0x1e9   :  { %v7225_v17 = vld [vmem:[#allocation5 + $0x8d0] sm:$0xf]  ;;  %v8026_v7 = vor.u32 %v9645_v11, %v8025_v6  ;;  %3717 = vmatpush.bf16.msrb.mxu2 %v7770_v15 }
 0x1ea   :  { %v9445_v18 = vld [vmem:[#allocation5 + $0x8ec] sm:$0xf0] }
 0x1eb   :  { %v7481_v19 = vld [vmem:[#allocation5 + $0xad0] sm:$0xf]  ;;  %v7226_v29 = vor.u32 %v9445_v18, %v7225_v17  ;;  %3730 = vmatpush.bf16.msrb.mxu3 %v8026_v7  ;;  %v9281_v7 = vld [vmem:[#allocation5 + $0x3d4] sm:$0xf] }
 0x1ec   :  { %v9509_v22 = vld [vmem:[#allocation5 + $0xaec] sm:$0xf0] }
 0x1ed   :  { %v7737_v23 = vld [vmem:[#allocation5 + $0xcd0] sm:$0xf]  ;;  %v7482_v30 = vor.u32 %v9509_v22, %v7481_v19  ;;  %3692 = vmatpush.bf16.msrb.mxu0 %v7226_v29  ;;  %v3478_v19 = vpop.f32.mrf.mxu3  ;;  %v9409_v29 = vld [vmem:[#allocation5 + $0x7d4] sm:$0xf] }
 0x1ee   :  { %v9573_v24 = vld [vmem:[#allocation5 + $0xcec] sm:$0xf0] }
 0x1ef   :  { %v7993_v25 = vld [vmem:[#allocation5 + $0xed0] sm:$0xf]  ;;  %v7738_v31 = vor.u32 %v9573_v24, %v7737_v23  ;;  %3705 = vmatpush.bf16.msrb.mxu1 %v7482_v30  ;;  %v6587_v23 = vld [vmem:[#allocation5 + $0x3f0] sm:$0xf0] }
 0x1f0   :  { %v9637_v27 = vld [vmem:[#allocation5 + $0xeec] sm:$0xf0]  ;;  %v9345_v24 = vld [vmem:[#allocation5 + $0x5d4] sm:$0xf] }
 0x1f1   :  { %v7193_v32 = vld [vmem:[#allocation5 + $0x890] sm:$0xf]  ;;  %v7994_v36 = vor.u32 %v9637_v27, %v7993_v25  ;;  %3718 = vmatpush.bf16.msrb.mxu2 %v7738_v31  ;;  %v6843_v25 = vld [vmem:[#allocation5 + $0x5f0] sm:$0xf0] }
 0x1f2   :  { %v9437_v33 = vld [vmem:[#allocation5 + $0x8ac] sm:$0xf0]  ;;  %v7099_v30 = vld [vmem:[#allocation5 + $0x7f0] sm:$0xf0] }
 0x1f3   :  { %v7449_v34 = vld [vmem:[#allocation5 + $0xa90] sm:$0xf]  ;;  %v7194_v47 = vor.u32 %v9437_v33, %v7193_v32  ;;  %3731 = vmatpush.bf16.msrb.mxu3 %v7994_v36  ;;  %v6334_v32 = vor.u32 %v9217_v20, %v6331_v21  ;;  %v6590_v33 = vor.u32 %v9281_v7, %v6587_v23  ;;  %v6299_v36 = vld [vmem:[#allocation5 + $0x1b0] sm:$0xf0]  ;;  %v3502_v23 = vpop.f32.mrf.mxu1 }
 0x1f4   :  { %v9501_v37 = vld [vmem:[#allocation5 + $0xaac] sm:$0xf0]  ;;  %v9185_v20 = vld [vmem:[#allocation5 + $0xd4] sm:$0xf] }
 0x1f5   :  { %v7705_v8 = vld [vmem:[#allocation5 + $0xc90] sm:$0xf]  ;;  %v7450_v52 = vor.u32 %v9501_v37, %v7449_v34  ;;  %3693 = vmatpush.bf16.msrb.mxu0 %v7194_v47  ;;  %v6846_v34 = vor.u32 %v9345_v24, %v6843_v25  ;;  %v9273_v37 = vld [vmem:[#allocation5 + $0x394] sm:$0xf]  ;;  %v6302_v47 = vor.u32 %v9209_v48, %v6299_v36 }
 0x1f6   :  { %v9565_v40 = vld [vmem:[#allocation5 + $0xcac] sm:$0xf0]  ;;  %v6203_v21 = vld [vmem:[#allocation5 + $0xf0] sm:$0xf0] }
 0x1f7   :  { %v7961_v44 = vld [vmem:[#allocation5 + $0xe90] sm:$0xf]  ;;  %v7706_v53 = vor.u32 %v9565_v40, %v7705_v8  ;;  %3706 = vmatpush.bf16.msrb.mxu1 %v7450_v52  ;;  %v7102_v8 = vor.u32 %v9409_v29, %v7099_v30  ;;  %v6555_v40 = vld [vmem:[#allocation5 + $0x3b0] sm:$0xf0]  ;;  %v6814_v52 = vor.u32 %v9337_v42, %v6811_v43 }
 0x1f8   :  { %v9629_v45 = vld [vmem:[#allocation5 + $0xeac] sm:$0xf0]  ;;  %v6558_v51 = vor.u32 %v9273_v37, %v6555_v40  ;;  %v9249_v7 = vld [vmem:[#allocation5 + $0x2d4] sm:$0xf] }
 0x1f9   :  { %v7161_v54 = vld [vmem:[#allocation5 + $0x850] sm:$0xf]  ;;  %v7962_v58 = vor.u32 %v9629_v45, %v7961_v44  ;;  %3719 = vmatpush.bf16.msrb.mxu2 %v7706_v53  ;;  %v9401_v44 = vld [vmem:[#allocation5 + $0x794] sm:$0xf] }
 0x1fa   :  { %v9429_v55 = vld [vmem:[#allocation5 + $0x86c] sm:$0xf0]  ;;  %v7067_v45 = vld [vmem:[#allocation5 + $0x7b0] sm:$0xf0] }
 0x1fb   :  { %v7417_v56 = vld [vmem:[#allocation5 + $0xa50] sm:$0xf]  ;;  %v7162_v1 = vor.u32 %v9429_v55, %v7161_v54  ;;  %3732 = vmatpush.bf16.msrb.mxu3 %v7962_v58  ;;  %v9201_v53 = vld [vmem:[#allocation5 + $0x154] sm:$0xf] }
 0x1fc   :  { %v9493_v59 = vld [vmem:[#allocation5 + $0xa6c] sm:$0xf0]  ;;  %v6267_v54 = vld [vmem:[#allocation5 + $0x170] sm:$0xf0] }
 0x1fd   :  { %v7673_v60 = vld [vmem:[#allocation5 + $0xc50] sm:$0xf]  ;;  %v7418_v4 = vor.u32 %v9493_v59, %v7417_v56  ;;  %3694 = vmatpush.bf16.msrb.mxu0 %v7162_v1  ;;  %v9265_v55 = vld [vmem:[#allocation5 + $0x354] sm:$0xf]  ;;  %v7070_v56 = vor.u32 %v9401_v44, %v7067_v45  ;;  %v3528_v45 = vpop.f32.mrf.mxu3 }
 0x1fe   :  { %v9557_v61 = vld [vmem:[#allocation5 + $0xc6c] sm:$0xf0]  ;;  %v9329_v58 = vld [vmem:[#allocation5 + $0x554] sm:$0xf] }
 0x1ff   :  { %v7929_v62 = vld [vmem:[#allocation5 + $0xe50] sm:$0xf]  ;;  %v7674_v5 = vor.u32 %v9557_v61, %v7673_v60  ;;  %3707 = vmatpush.bf16.msrb.mxu1 %v7418_v4  ;;  %v6779_v59 = vld [vmem:[#allocation5 + $0x570] sm:$0xf0] }
 0x200   :  { %v9621_v63 = vld [vmem:[#allocation5 + $0xe6c] sm:$0xf0]  ;;  %v9393_v60 = vld [vmem:[#allocation5 + $0x754] sm:$0xf]  ;;  %v6782_v1 = vor.u32 %v9329_v58, %v6779_v59 }
 0x201   :  { %v7129_v2 = vld [vmem:[#allocation5 + $0x810] sm:$0xf]  ;;  %v7930_v14 = vor.u32 %v9621_v63, %v7929_v62  ;;  %3720 = vmatpush.bf16.msrb.mxu2 %v7674_v5  ;;  %v7035_v61 = vld [vmem:[#allocation5 + $0x770] sm:$0xf0]  ;;  %v6270_v62 = vor.u32 %v9201_v53, %v6267_v54  ;;  %v6526_v63 = vor.u32 %v9265_v55, %v6523_v57 }
 0x202   :  { %v9421_v3 = vld [vmem:[#allocation5 + $0x82c] sm:$0xf0]  ;;  %v9257_v4 = vld [vmem:[#allocation5 + $0x314] sm:$0xf]  ;;  %v7038_v5 = vor.u32 %v9393_v60, %v7035_v61  ;;  %v3504_v60 = vpop.f32.mrf.mxu1 }
 0x203   :  { %v7385_v6 = vld [vmem:[#allocation5 + $0xa10] sm:$0xf]  ;;  %v7130_v22 = vor.u32 %v9421_v3, %v7129_v2  ;;  %3733 = vmatpush.bf16.msrb.mxu3 %v7930_v14  ;;  %v9193_v2 = vld [vmem:[#allocation5 + $0x114] sm:$0xf] }
 0x204   :  { %v9485_v11 = vld [vmem:[#allocation5 + $0xa2c] sm:$0xf0]  ;;  %v6235_v3 = vld [vmem:[#allocation5 + $0x130] sm:$0xf0] }
 0x205   :  { %v7641_v12 = vld [vmem:[#allocation5 + $0xc10] sm:$0xf]  ;;  %v7386_v27 = vor.u32 %v9485_v11, %v7385_v6  ;;  %3695 = vmatpush.bf16.msrb.mxu0 %v7130_v22  ;;  %v6491_v6 = vld [vmem:[#allocation5 + $0x330] sm:$0xf0] }
 0x206   :  { %v9549_v15 = vld [vmem:[#allocation5 + $0xc2c] sm:$0xf0]  ;;  %v9321_v11 = vld [vmem:[#allocation5 + $0x514] sm:$0xf] }
 0x207   :  { %v7897_v17 = vld [vmem:[#allocation5 + $0xe10] sm:$0xf]  ;;  %v7642_v28 = vor.u32 %v9549_v15, %v7641_v12  ;;  %3708 = vmatpush.bf16.msrb.mxu1 %v7386_v27  ;;  %v6747_v12 = vld [vmem:[#allocation5 + $0x530] sm:$0xf0]  ;;  %v6238_v15 = vor.u32 %v9193_v2, %v6235_v3 }
 0x208   :  { %v9613_v18 = vld [vmem:[#allocation5 + $0xe2c] sm:$0xf0]  ;;  %3696 = vmatmul.bf16.vlgmr.msrb.gmra.mxu0 %v10182_v38  ;;  %v7003_v14 = vld [vmem:[#allocation5 + $0x730] sm:$0xf0]  ;;  %v6750_v19 = vor.u32 %v9321_v11, %v6747_v12 }
 0x209   :  { %v7898_v31 = vor.u32 %v9613_v18, %v7897_v17  ;;  %3721 = vmatpush.bf16.msrb.mxu2 %v7642_v28  ;;  %3740 = vmatpush.bf16.msra.mxu0 %v6334_v32  ;;  %v3489_v17 = vpop.f32.mrf.mxu0  ;;  %v6494_v18 = vor.u32 %v9257_v4, %v6491_v6  ;;  %v7006_v24 = vor.u32 %v9385_v13, %v7003_v14  ;;  %v6459_v25 = vld [vmem:[#allocation5 + $0x2f0] sm:$0xf0] }
 0x20a   :  { %3709 = vmatmul.bf16.vlgmr.msrb.gmra.mxu1 %v10186_v41  ;;  %v3490_v22 = vadd.f32 %v3489_v17, %v10237_v50  ;;  %v9313_v27 = vld [vmem:[#allocation5 + $0x4d4] sm:$0xf]  ;;  %v6206_v32 = vor.u32 %v9185_v20, %v6203_v21 }
 0x20b   :  { %3734 = vmatpush.bf16.msrb.mxu3 %v7898_v31  ;;  %3753 = vmatpush.bf16.msra.mxu1 %v6590_v33  ;;  %v6715_v28 = vld [vmem:[#allocation5 + $0x4f0] sm:$0xf0]  ;;  %v6462_v33 = vor.u32 %v9249_v7, %v6459_v25  ;;  %v3530_v7 = vpop.f32.mrf.mxu3 }
 0x20c   :  { %3722 = vmatmul.bf16.vlgmr.msrb.gmra.mxu2 %v10180_v35  ;;  %v9377_v29 = vld [vmem:[#allocation5 + $0x6d4] sm:$0xf]  ;;  %v3503_v31 = vadd.f32 %v3502_v23, %v3490_v22 }
 0x20d   :  { %3766 = vmatpush.bf16.msra.mxu2 %v6846_v34  ;;  %3741 = vmatpush.bf16.msra.mxu0 %v6302_v47  ;;  %v6971_v30 = vld [vmem:[#allocation5 + $0x6f0] sm:$0xf0]  ;;  %v6718_v34 = vor.u32 %v9313_v27, %v6715_v28 }
 0x20e   :  { %3735 = vmatmul.bf16.vlgmr.msrb.gmra.mxu3 %v10184_v39  ;;  %v9177_v48 = vld [vmem:[#allocation5 + $0x94] sm:$0xf]  ;;  %v6974_v50 = vor.u32 %v9377_v29, %v6971_v30 }
 0x20f   :  { %3779 = vmatpush.bf16.msra.mxu3 %v7102_v8  ;;  %3754 = vmatpush.bf16.msra.mxu1 %v6558_v51  ;;  %v6171_v36 = vld [vmem:[#allocation5 + $0xb0] sm:$0xf0]  ;;  %v3515_v8 = vpop.f32.mrf.mxu2 }
 0x210   :  { %v9241_v37 = vld [vmem:[#allocation5 + $0x294] sm:$0xf]  ;;  %v3516_v44 = vadd.f32 %v3515_v8, %v3503_v31 }
 0x211   :  { %3767 = vmatpush.bf16.msra.mxu2 %v6814_v52  ;;  %3742 = vmatpush.bf16.msra.mxu0 %v6270_v62  ;;  %v6427_v40 = vld [vmem:[#allocation5 + $0x2b0] sm:$0xf0]  ;;  %v6174_v52 = vor.u32 %v9177_v48, %v6171_v36  ;;  %v3491_v54 = vpop.f32.mrf.mxu0 }
 0x212   :  { %v9305_v42 = vld [vmem:[#allocation5 + $0x494] sm:$0xf]  ;;  %v10244_v53 = vadd.f32 %v3528_v45, %v3516_v44  ;;  %v6430_v55 = vor.u32 %v9241_v37, %v6427_v40 }
 0x213   :  { %3780 = vmatpush.bf16.msra.mxu3 %v7070_v56  ;;  %3755 = vmatpush.bf16.msra.mxu1 %v6526_v63  ;;  %v6683_v43 = vld [vmem:[#allocation5 + $0x4b0] sm:$0xf0] }
 0x214   :  { %v9369_v47 = vld [vmem:[#allocation5 + $0x694] sm:$0xf]  ;;  %v6686_v56 = vor.u32 %v9305_v42, %v6683_v43 }
 0x215   :  { %3768 = vmatpush.bf16.msra.mxu2 %v6782_v1  ;;  %3743 = vmatpush.bf16.msra.mxu0 %v6238_v15  ;;  %v6939_v51 = vld [vmem:[#allocation5 + $0x6b0] sm:$0xf0] }
 0x216   :  { %v9169_v57 = vld [vmem:[#allocation5 + $0x54] sm:$0xf]  ;;  %v6942_v61 = vor.u32 %v9369_v47, %v6939_v51 }
 0x217   :  { %3781 = vmatpush.bf16.msra.mxu3 %v7038_v5  ;;  %3756 = vmatpush.bf16.msra.mxu1 %v6494_v18  ;;  %v6139_v58 = vld [vmem:[#allocation5 + $0x70] sm:$0xf0]  ;;  %v3517_v17 = vpop.f32.mrf.mxu2 }
 0x218   :  { %v9233_v59 = vld [vmem:[#allocation5 + $0x254] sm:$0xf]  ;;  %v6142_v4 = vor.u32 %v9169_v57, %v6139_v58 }
 0x219   :  { %3769 = vmatpush.bf16.msra.mxu2 %v6750_v19  ;;  %3744 = vmatpush.bf16.msra.mxu0 %v6206_v32  ;;  %v6395_v62 = vld [vmem:[#allocation5 + $0x270] sm:$0xf0] }
 0x21a   :  { %v9297_v63 = vld [vmem:[#allocation5 + $0x454] sm:$0xf]  ;;  %v6398_v11 = vor.u32 %v9233_v59, %v6395_v62 }
 0x21b   :  { %3782 = vmatpush.bf16.msra.mxu3 %v7006_v24  ;;  %3757 = vmatpush.bf16.msra.mxu1 %v6462_v33  ;;  %v6651_v1 = vld [vmem:[#allocation5 + $0x470] sm:$0xf0] }
 0x21c   :  { %v9361_v2 = vld [vmem:[#allocation5 + $0x654] sm:$0xf]  ;;  %v6654_v12 = vor.u32 %v9297_v63, %v6651_v1 }
 0x21d   :  { %3770 = vmatpush.bf16.msra.mxu2 %v6718_v34  ;;  %v6907_v3 = vld [vmem:[#allocation5 + $0x670] sm:$0xf0]  ;;  %3745 = vmatpush.bf16.msra.mxu0 %v6174_v52 }
 0x21e   :  { %v9161_v5 = vld [vmem:[#allocation5 + $0x14] sm:$0xf]  ;;  %v6910_v18 = vor.u32 %v9361_v2, %v6907_v3 }
 0x21f   :  { %3783 = vmatpush.bf16.msra.mxu3 %v6974_v50  ;;  %v6107_v6 = vld [vmem:[#allocation5 + $0x30] sm:$0xf0]  ;;  %3758 = vmatpush.bf16.msra.mxu1 %v6430_v55 }
 0x220   :  { %v9225_v13 = vld [vmem:[#allocation5 + $0x214] sm:$0xf]  ;;  %v6110_v25 = vor.u32 %v9161_v5, %v6107_v6 }
 0x221   :  { %3771 = vmatpush.bf16.msra.mxu2 %v6686_v56  ;;  %v6363_v14 = vld [vmem:[#allocation5 + $0x230] sm:$0xf0]  ;;  %3746 = vmatpush.bf16.msra.mxu0 %v6142_v4 }
 0x222   :  { %v9289_v15 = vld [vmem:[#allocation5 + $0x414] sm:$0xf]  ;;  %v6366_v30 = vor.u32 %v9225_v13, %v6363_v14 }
 0x223   :  { %3784 = vmatpush.bf16.msra.mxu3 %v6942_v61  ;;  %v6619_v19 = vld [vmem:[#allocation5 + $0x430] sm:$0xf0]  ;;  %3759 = vmatpush.bf16.msra.mxu1 %v6398_v11 }
 0x224   :  { %v9353_v20 = vld [vmem:[#allocation5 + $0x614] sm:$0xf]  ;;  %v6622_v31 = vor.u32 %v9289_v15, %v6619_v19 }
 0x225   :  { %v6875_v21 = vld [vmem:[#allocation5 + $0x630] sm:$0xf0]  ;;  %3772 = vmatpush.bf16.msra.mxu2 %v6654_v12  ;;  %3747 = vmatpush.bf16.msra.mxu0 %v6110_v25  ;;  %v647_v12 = vperm.slane %v10234_v0, 3 }
 0x226   :  { %v9473_v22 = vld [vmem:[#allocation5 + $0x9d4] sm:$0xf]  ;;  %v6878_v34 = vor.u32 %v9353_v20, %v6875_v21  ;;  %v3541_v21 = vpop.f32.mrf.mxu0 }
 0x227   :  { %v7355_v23 = vld [vmem:[#allocation5 + $0x9f0] sm:$0xf0]  ;;  %3785 = vmatpush.bf16.msra.mxu3 %v6910_v18  ;;  %3760 = vmatpush.bf16.msra.mxu1 %v6366_v30 }
 0x228   :  { %v9537_v24 = vld [vmem:[#allocation5 + $0xbd4] sm:$0xf]  ;;  %v7358_v48 = vor.u32 %v9473_v22, %v7355_v23  ;;  %3748 = vmatmul.bf16.vlgmr.msra.gmra.mxu0 %v10170_v10 }
 0x229   :  { %v7611_v27 = vld [vmem:[#allocation5 + $0xbf0] sm:$0xf0]  ;;  %3773 = vmatpush.bf16.msra.mxu2 %v6622_v31 }
 0x22a   :  { %v9601_v28 = vld [vmem:[#allocation5 + $0xdd4] sm:$0xf]  ;;  %v7614_v36 = vor.u32 %v9537_v24, %v7611_v27  ;;  %3792 = vmatpush.bf16.msrb.mxu0 %v7358_v48  ;;  %3761 = vmatmul.bf16.vlgmr.msra.gmra.mxu1 %v10177_v26  ;;  %v3542_v27 = vadd.f32 %v3541_v21, %v647_v12 }
 0x22b   :  { %v7867_v29 = vld [vmem:[#allocation5 + $0xdf0] sm:$0xf0]  ;;  %3786 = vmatpush.bf16.msra.mxu3 %v6878_v34 }
 0x22c   :  { %v9665_v32 = vld [vmem:[#allocation5 + $0xfd4] sm:$0xf]  ;;  %v7870_v37 = vor.u32 %v9601_v28, %v7867_v29  ;;  %3805 = vmatpush.bf16.msrb.mxu1 %v7614_v36  ;;  %3774 = vmatmul.bf16.vlgmr.msra.gmra.mxu2 %v10168_v9  ;;  %v3554_v28 = vpop.f32.mrf.mxu1 }
 0x22d   :  { %v8123_v33 = vld [vmem:[#allocation5 + $0xff0] sm:$0xf0]  ;;  %v3555_v34 = vadd.f32 %v3554_v28, %v3542_v27  ;;  %v6337_v27 = vld [vmem:[#allocation5 + $0x1d8] sm:$0xf] }
 0x22e   :  { %v9465_v8 = vld [vmem:[#allocation5 + $0x994] sm:$0xf]  ;;  %v8126_v42 = vor.u32 %v9665_v32, %v8123_v33  ;;  %3818 = vmatpush.bf16.msrb.mxu2 %v7870_v37  ;;  %3787 = vmatmul.bf16.vlgmr.msra.gmra.mxu3 %v10172_v16  ;;  %v9222_v28 = vld [vmem:[#allocation5 + $0x1f4] sm:$0xf0] }
 0x22f   :  { %v7323_v50 = vld [vmem:[#allocation5 + $0x9b0] sm:$0xf0] }
 0x230   :  { %v9529_v40 = vld [vmem:[#allocation5 + $0xb94] sm:$0xf]  ;;  %v7326_v52 = vor.u32 %v9465_v8, %v7323_v50  ;;  %3831 = vmatpush.bf16.msrb.mxu3 %v8126_v42  ;;  %v3567_v42 = vpop.f32.mrf.mxu2 }
 0x231   :  { %v7579_v43 = vld [vmem:[#allocation5 + $0xbb0] sm:$0xf0] }
 0x232   :  { %v9593_v44 = vld [vmem:[#allocation5 + $0xd94] sm:$0xf]  ;;  %v7582_v54 = vor.u32 %v9529_v40, %v7579_v43  ;;  %3793 = vmatpush.bf16.msrb.mxu0 %v7326_v52  ;;  %v3580_v52 = vpop.f32.mrf.mxu3 }
 0x233   :  { %v7835_v45 = vld [vmem:[#allocation5 + $0xdb0] sm:$0xf0] }
 0x234   :  { %v9657_v47 = vld [vmem:[#allocation5 + $0xf94] sm:$0xf]  ;;  %v7838_v55 = vor.u32 %v9593_v44, %v7835_v45  ;;  %3806 = vmatpush.bf16.msrb.mxu1 %v7582_v54 }
 0x235   :  { %v8091_v51 = vld [vmem:[#allocation5 + $0xfb0] sm:$0xf0] }
 0x236   :  { %v9457_v56 = vld [vmem:[#allocation5 + $0x954] sm:$0xf]  ;;  %v8094_v59 = vor.u32 %v9657_v47, %v8091_v51  ;;  %3819 = vmatpush.bf16.msrb.mxu2 %v7838_v55  ;;  %v3568_v51 = vadd.f32 %v3567_v42, %v3555_v34  ;;  %v6305_v42 = vld [vmem:[#allocation5 + $0x198] sm:$0xf] }
 0x237   :  { %v7291_v57 = vld [vmem:[#allocation5 + $0x970] sm:$0xf0] }
 0x238   :  { %v9521_v58 = vld [vmem:[#allocation5 + $0xb54] sm:$0xf]  ;;  %v7294_v2 = vor.u32 %v9457_v56, %v7291_v57  ;;  %3832 = vmatpush.bf16.msrb.mxu3 %v8094_v59  ;;  %v10251_v57 = vadd.f32 %v3580_v52, %v3568_v51  ;;  %v3569_v21 = vpop.f32.mrf.mxu2  ;;  %v6817_v51 = vld [vmem:[#allocation5 + $0x598] sm:$0xf] }
 0x239   :  { %v7547_v60 = vld [vmem:[#allocation5 + $0xb70] sm:$0xf0]  ;;  %v9342_v52 = vld [vmem:[#allocation5 + $0x5b4] sm:$0xf0] }
 0x23a   :  { %v9585_v61 = vld [vmem:[#allocation5 + $0xd54] sm:$0xf]  ;;  %v7550_v4 = vor.u32 %v9521_v58, %v7547_v60  ;;  %3794 = vmatpush.bf16.msrb.mxu0 %v7294_v2  ;;  %v3543_v58 = vpop.f32.mrf.mxu0  ;;  %v7009_v21 = vld [vmem:[#allocation5 + $0x718] sm:$0xf] }
 0x23b   :  { %v7803_v62 = vld [vmem:[#allocation5 + $0xd70] sm:$0xf0] }
 0x23c   :  { %v9649_v63 = vld [vmem:[#allocation5 + $0xf54] sm:$0xf]  ;;  %v7806_v5 = vor.u32 %v9585_v61, %v7803_v62  ;;  %3807 = vmatpush.bf16.msrb.mxu1 %v7550_v4 }
 0x23d   :  { %v8059_v1 = vld [vmem:[#allocation5 + $0xf70] sm:$0xf0] }
 0x23e   :  { %v9449_v3 = vld [vmem:[#allocation5 + $0x914] sm:$0xf]  ;;  %v8062_v13 = vor.u32 %v9649_v63, %v8059_v1  ;;  %3820 = vmatpush.bf16.msrb.mxu2 %v7806_v5  ;;  %v3556_v1 = vpop.f32.mrf.mxu1 }
 0x23f   :  { %v7259_v6 = vld [vmem:[#allocation5 + $0x930] sm:$0xf0]  ;;  %v9270_v1 = vld [vmem:[#allocation5 + $0x374] sm:$0xf0] }
 0x240   :  { %v9513_v11 = vld [vmem:[#allocation5 + $0xb14] sm:$0xf]  ;;  %v7262_v20 = vor.u32 %v9449_v3, %v7259_v6  ;;  %3833 = vmatpush.bf16.msrb.mxu3 %v8062_v13 }
 0x241   :  { %v7515_v14 = vld [vmem:[#allocation5 + $0xb30] sm:$0xf0] }
 0x242   :  { %v9577_v15 = vld [vmem:[#allocation5 + $0xd14] sm:$0xf]  ;;  %v7518_v7 = vor.u32 %v9513_v11, %v7515_v14  ;;  %3795 = vmatpush.bf16.msrb.mxu0 %v7262_v20 }
 0x243   :  { %v7771_v17 = vld [vmem:[#allocation5 + $0xd30] sm:$0xf0] }
 0x244   :  { %v9641_v18 = vld [vmem:[#allocation5 + $0xf14] sm:$0xf]  ;;  %v7774_v22 = vor.u32 %v9577_v15, %v7771_v17  ;;  %3808 = vmatpush.bf16.msrb.mxu1 %v7518_v7 }
 0x245   :  { %v8027_v19 = vld [vmem:[#allocation5 + $0xf30] sm:$0xf0] }
 0x246   :  { %v9441_v23 = vld [vmem:[#allocation5 + $0x8d4] sm:$0xf]  ;;  %v8030_v0 = vor.u32 %v9641_v18, %v8027_v19  ;;  %3821 = vmatpush.bf16.msrb.mxu2 %v7774_v22 }
 0x247   :  { %v7227_v24 = vld [vmem:[#allocation5 + $0x8f0] sm:$0xf0] }
 0x248   :  { %v9505_v25 = vld [vmem:[#allocation5 + $0xad4] sm:$0xf]  ;;  %v7230_v48 = vor.u32 %v9441_v23, %v7227_v24  ;;  %3834 = vmatpush.bf16.msrb.mxu3 %v8030_v0  ;;  %v6593_v0 = vld [vmem:[#allocation5 + $0x3d8] sm:$0xf] }
 0x249   :  { %v7483_v29 = vld [vmem:[#allocation5 + $0xaf0] sm:$0xf0] }
 0x24a   :  { %v9569_v30 = vld [vmem:[#allocation5 + $0xcd4] sm:$0xf]  ;;  %v7486_v36 = vor.u32 %v9505_v25, %v7483_v29  ;;  %3796 = vmatpush.bf16.msrb.mxu0 %v7230_v48  ;;  %v3582_v25 = vpop.f32.mrf.mxu3  ;;  %v7105_v48 = vld [vmem:[#allocation5 + $0x7d8] sm:$0xf] }
 0x24b   :  { %v7739_v31 = vld [vmem:[#allocation5 + $0xcf0] sm:$0xf0] }
 0x24c   :  { %v9633_v32 = vld [vmem:[#allocation5 + $0xed4] sm:$0xf]  ;;  %v7742_v37 = vor.u32 %v9569_v30, %v7739_v31  ;;  %3809 = vmatpush.bf16.msrb.mxu1 %v7486_v36  ;;  %v9286_v30 = vld [vmem:[#allocation5 + $0x3f4] sm:$0xf0] }
 0x24d   :  { %v7995_v33 = vld [vmem:[#allocation5 + $0xef0] sm:$0xf0]  ;;  %v6849_v31 = vld [vmem:[#allocation5 + $0x5d8] sm:$0xf] }
 0x24e   :  { %v9433_v8 = vld [vmem:[#allocation5 + $0x894] sm:$0xf]  ;;  %v7998_v43 = vor.u32 %v9633_v32, %v7995_v33  ;;  %3822 = vmatpush.bf16.msrb.mxu2 %v7742_v37  ;;  %v9350_v32 = vld [vmem:[#allocation5 + $0x5f4] sm:$0xf0] }
 0x24f   :  { %v7195_v50 = vld [vmem:[#allocation5 + $0x8b0] sm:$0xf0]  ;;  %v9414_v36 = vld [vmem:[#allocation5 + $0x7f4] sm:$0xf0] }
 0x250   :  { %v9497_v40 = vld [vmem:[#allocation5 + $0xa94] sm:$0xf]  ;;  %v7198_v56 = vor.u32 %v9433_v8, %v7195_v50  ;;  %3835 = vmatpush.bf16.msrb.mxu3 %v7998_v43  ;;  %v6338_v8 = vor.u32 %v9222_v28, %v6337_v27  ;;  %v6594_v50 = vor.u32 %v9286_v30, %v6593_v0  ;;  %v9214_v43 = vld [vmem:[#allocation5 + $0x1b4] sm:$0xf0]  ;;  %v3606_v30 = vpop.f32.mrf.mxu1 }
 0x251   :  { %v7451_v44 = vld [vmem:[#allocation5 + $0xab0] sm:$0xf0]  ;;  %v6209_v27 = vld [vmem:[#allocation5 + $0xd8] sm:$0xf] }
 0x252   :  { %v9561_v45 = vld [vmem:[#allocation5 + $0xc94] sm:$0xf]  ;;  %v7454_v59 = vor.u32 %v9497_v40, %v7451_v44  ;;  %3797 = vmatpush.bf16.msrb.mxu0 %v7198_v56  ;;  %v6850_v40 = vor.u32 %v9350_v32, %v6849_v31  ;;  %v6561_v44 = vld [vmem:[#allocation5 + $0x398] sm:$0xf]  ;;  %v6306_v56 = vor.u32 %v9214_v43, %v6305_v42 }
 0x253   :  { %v7707_v47 = vld [vmem:[#allocation5 + $0xcb0] sm:$0xf0]  ;;  %v9190_v28 = vld [vmem:[#allocation5 + $0xf4] sm:$0xf0] }
 0x254   :  { %v9625_v54 = vld [vmem:[#allocation5 + $0xe94] sm:$0xf]  ;;  %v7710_v60 = vor.u32 %v9561_v45, %v7707_v47  ;;  %3810 = vmatpush.bf16.msrb.mxu1 %v7454_v59  ;;  %v7106_v45 = vor.u32 %v9414_v36, %v7105_v48  ;;  %v9278_v47 = vld [vmem:[#allocation5 + $0x3b4] sm:$0xf0]  ;;  %v6818_v59 = vor.u32 %v9342_v52, %v6817_v51 }
 0x255   :  { %v7963_v55 = vld [vmem:[#allocation5 + $0xeb0] sm:$0xf0]  ;;  %v6562_v58 = vor.u32 %v9278_v47, %v6561_v44  ;;  %v6465_v0 = vld [vmem:[#allocation5 + $0x2d8] sm:$0xf] }
 0x256   :  { %v9425_v61 = vld [vmem:[#allocation5 + $0x854] sm:$0xf]  ;;  %v7966_v2 = vor.u32 %v9625_v54, %v7963_v55  ;;  %3823 = vmatpush.bf16.msrb.mxu2 %v7710_v60  ;;  %v7073_v54 = vld [vmem:[#allocation5 + $0x798] sm:$0xf] }
 0x257   :  { %v7163_v62 = vld [vmem:[#allocation5 + $0x870] sm:$0xf0]  ;;  %v9406_v55 = vld [vmem:[#allocation5 + $0x7b4] sm:$0xf0] }
 0x258   :  { %v9489_v63 = vld [vmem:[#allocation5 + $0xa54] sm:$0xf]  ;;  %v7166_v12 = vor.u32 %v9425_v61, %v7163_v62  ;;  %3836 = vmatpush.bf16.msrb.mxu3 %v7966_v2  ;;  %v6273_v60 = vld [vmem:[#allocation5 + $0x158] sm:$0xf] }
 0x259   :  { %v7419_v3 = vld [vmem:[#allocation5 + $0xa70] sm:$0xf0]  ;;  %v9206_v61 = vld [vmem:[#allocation5 + $0x174] sm:$0xf0] }
 0x25a   :  { %v9553_v4 = vld [vmem:[#allocation5 + $0xc54] sm:$0xf]  ;;  %v7422_v15 = vor.u32 %v9489_v63, %v7419_v3  ;;  %3798 = vmatpush.bf16.msrb.mxu0 %v7166_v12  ;;  %v6529_v62 = vld [vmem:[#allocation5 + $0x358] sm:$0xf]  ;;  %v7074_v63 = vor.u32 %v9406_v55, %v7073_v54  ;;  %v3632_v55 = vpop.f32.mrf.mxu3 }
 0x25b   :  { %v7675_v5 = vld [vmem:[#allocation5 + $0xc70] sm:$0xf0]  ;;  %v6785_v2 = vld [vmem:[#allocation5 + $0x558] sm:$0xf] }
 0x25c   :  { %v9617_v6 = vld [vmem:[#allocation5 + $0xe54] sm:$0xf]  ;;  %v7678_v17 = vor.u32 %v9553_v4, %v7675_v5  ;;  %3811 = vmatpush.bf16.msrb.mxu1 %v7422_v15  ;;  %v9334_v3 = vld [vmem:[#allocation5 + $0x574] sm:$0xf0] }
 0x25d   :  { %v7931_v11 = vld [vmem:[#allocation5 + $0xe70] sm:$0xf0]  ;;  %v7041_v4 = vld [vmem:[#allocation5 + $0x758] sm:$0xf]  ;;  %v6786_v12 = vor.u32 %v9334_v3, %v6785_v2 }
 0x25e   :  { %v9417_v13 = vld [vmem:[#allocation5 + $0x814] sm:$0xf]  ;;  %v7934_v7 = vor.u32 %v9617_v6, %v7931_v11  ;;  %3824 = vmatpush.bf16.msrb.mxu2 %v7678_v17  ;;  %v9398_v5 = vld [vmem:[#allocation5 + $0x774] sm:$0xf0]  ;;  %v6274_v6 = vor.u32 %v9206_v61, %v6273_v60  ;;  %v6530_v11 = vor.u32 %v9270_v1, %v6529_v62 }
 0x25f   :  { %v7131_v14 = vld [vmem:[#allocation5 + $0x830] sm:$0xf0]  ;;  %v6497_v15 = vld [vmem:[#allocation5 + $0x318] sm:$0xf]  ;;  %v7042_v17 = vor.u32 %v9398_v5, %v7041_v4  ;;  %v3608_v4 = vpop.f32.mrf.mxu1 }
 0x260   :  { %v9481_v18 = vld [vmem:[#allocation5 + $0xa14] sm:$0xf]  ;;  %v7134_v29 = vor.u32 %v9417_v13, %v7131_v14  ;;  %3837 = vmatpush.bf16.msrb.mxu3 %v7934_v7  ;;  %v6241_v13 = vld [vmem:[#allocation5 + $0x118] sm:$0xf] }
 0x261   :  { %v7387_v19 = vld [vmem:[#allocation5 + $0xa30] sm:$0xf0]  ;;  %v9198_v14 = vld [vmem:[#allocation5 + $0x134] sm:$0xf0] }
 0x262   :  { %v9545_v20 = vld [vmem:[#allocation5 + $0xc14] sm:$0xf]  ;;  %v7390_v33 = vor.u32 %v9481_v18, %v7387_v19  ;;  %3799 = vmatpush.bf16.msrb.mxu0 %v7134_v29  ;;  %v9262_v18 = vld [vmem:[#allocation5 + $0x334] sm:$0xf0] }
 0x263   :  { %v7643_v22 = vld [vmem:[#allocation5 + $0xc30] sm:$0xf0]  ;;  %v6753_v19 = vld [vmem:[#allocation5 + $0x518] sm:$0xf] }
 0x264   :  { %v9609_v23 = vld [vmem:[#allocation5 + $0xe14] sm:$0xf]  ;;  %v7646_v34 = vor.u32 %v9545_v20, %v7643_v22  ;;  %3812 = vmatpush.bf16.msrb.mxu1 %v7390_v33  ;;  %v9326_v20 = vld [vmem:[#allocation5 + $0x534] sm:$0xf0]  ;;  %v6242_v22 = vor.u32 %v9198_v14, %v6241_v13 }
 0x265   :  { %v7899_v24 = vld [vmem:[#allocation5 + $0xe30] sm:$0xf0]  ;;  %3800 = vmatmul.bf16.vlgmr.msrb.gmra.mxu0 %v10182_v38  ;;  %v9390_v7 = vld [vmem:[#allocation5 + $0x734] sm:$0xf0]  ;;  %v6754_v25 = vor.u32 %v9326_v20, %v6753_v19 }
 0x266   :  { %v7902_v37 = vor.u32 %v9609_v23, %v7899_v24  ;;  %3825 = vmatpush.bf16.msrb.mxu2 %v7646_v34  ;;  %3844 = vmatpush.bf16.msra.mxu0 %v6338_v8  ;;  %v3593_v23 = vpop.f32.mrf.mxu0  ;;  %v6498_v24 = vor.u32 %v9262_v18, %v6497_v15  ;;  %v7010_v31 = vor.u32 %v9390_v7, %v7009_v21  ;;  %v9254_v32 = vld [vmem:[#allocation5 + $0x2f4] sm:$0xf0] }
 0x267   :  { %3813 = vmatmul.bf16.vlgmr.msrb.gmra.mxu1 %v10186_v41  ;;  %v3594_v29 = vadd.f32 %v3593_v23, %v10251_v57  ;;  %v6721_v33 = vld [vmem:[#allocation5 + $0x4d8] sm:$0xf]  ;;  %v6210_v8 = vor.u32 %v9190_v28, %v6209_v27 }
 0x268   :  { %3838 = vmatpush.bf16.msrb.mxu3 %v7902_v37  ;;  %3857 = vmatpush.bf16.msra.mxu1 %v6594_v50  ;;  %v9318_v34 = vld [vmem:[#allocation5 + $0x4f4] sm:$0xf0]  ;;  %v6466_v50 = vor.u32 %v9254_v32, %v6465_v0  ;;  %v3634_v0 = vpop.f32.mrf.mxu3 }
 0x269   :  { %3826 = vmatmul.bf16.vlgmr.msrb.gmra.mxu2 %v10180_v35  ;;  %v6977_v48 = vld [vmem:[#allocation5 + $0x6d8] sm:$0xf]  ;;  %v3607_v37 = vadd.f32 %v3606_v30, %v3594_v29 }
 0x26a   :  { %3870 = vmatpush.bf16.msra.mxu2 %v6850_v40  ;;  %3845 = vmatpush.bf16.msra.mxu0 %v6306_v56  ;;  %v9382_v36 = vld [vmem:[#allocation5 + $0x6f4] sm:$0xf0]  ;;  %v6722_v40 = vor.u32 %v9318_v34, %v6721_v33 }
 0x26b   :  { %3839 = vmatmul.bf16.vlgmr.msrb.gmra.mxu3 %v10184_v39  ;;  %v6177_v42 = vld [vmem:[#allocation5 + $0x98] sm:$0xf]  ;;  %v6978_v57 = vor.u32 %v9382_v36, %v6977_v48 }
 0x26c   :  { %3883 = vmatpush.bf16.msra.mxu3 %v7106_v45  ;;  %3858 = vmatpush.bf16.msra.mxu1 %v6562_v58  ;;  %v9182_v43 = vld [vmem:[#allocation5 + $0xb4] sm:$0xf0]  ;;  %v3619_v45 = vpop.f32.mrf.mxu2 }
 0x26d   :  { %v6433_v44 = vld [vmem:[#allocation5 + $0x298] sm:$0xf]  ;;  %v3620_v54 = vadd.f32 %v3619_v45, %v3607_v37 }
 0x26e   :  { %3871 = vmatpush.bf16.msra.mxu2 %v6818_v59  ;;  %3846 = vmatpush.bf16.msra.mxu0 %v6274_v6  ;;  %v9246_v47 = vld [vmem:[#allocation5 + $0x2b4] sm:$0xf0]  ;;  %v6178_v59 = vor.u32 %v9182_v43, %v6177_v42  ;;  %v3595_v61 = vpop.f32.mrf.mxu0 }
 0x26f   :  { %v6689_v51 = vld [vmem:[#allocation5 + $0x498] sm:$0xf]  ;;  %v10258_v60 = vadd.f32 %v3632_v55, %v3620_v54  ;;  %v6434_v62 = vor.u32 %v9246_v47, %v6433_v44 }
 0x270   :  { %3884 = vmatpush.bf16.msra.mxu3 %v7074_v63  ;;  %3859 = vmatpush.bf16.msra.mxu1 %v6530_v11  ;;  %v9310_v52 = vld [vmem:[#allocation5 + $0x4b4] sm:$0xf0] }
 0x271   :  { %v6945_v56 = vld [vmem:[#allocation5 + $0x698] sm:$0xf]  ;;  %v6690_v63 = vor.u32 %v9310_v52, %v6689_v51 }
 0x272   :  { %3872 = vmatpush.bf16.msra.mxu2 %v6786_v12  ;;  %3847 = vmatpush.bf16.msra.mxu0 %v6242_v22  ;;  %v9374_v58 = vld [vmem:[#allocation5 + $0x6b4] sm:$0xf0] }
 0x273   :  { %v6145_v1 = vld [vmem:[#allocation5 + $0x58] sm:$0xf]  ;;  %v6946_v5 = vor.u32 %v9374_v58, %v6945_v56 }
 0x274   :  { %3885 = vmatpush.bf16.msra.mxu3 %v7042_v17  ;;  %3860 = vmatpush.bf16.msra.mxu1 %v6498_v24  ;;  %v9174_v2 = vld [vmem:[#allocation5 + $0x74] sm:$0xf0]  ;;  %v3621_v23 = vpop.f32.mrf.mxu2 }
 0x275   :  { %v6401_v3 = vld [vmem:[#allocation5 + $0x258] sm:$0xf]  ;;  %v6146_v15 = vor.u32 %v9174_v2, %v6145_v1 }
 0x276   :  { %3873 = vmatpush.bf16.msra.mxu2 %v6754_v25  ;;  %3848 = vmatpush.bf16.msra.mxu0 %v6210_v8  ;;  %v9238_v6 = vld [vmem:[#allocation5 + $0x274] sm:$0xf0]  ;;  %v3645_v0 = vpop.f32.mrf.mxu0 }
 0x277   :  { %v6657_v11 = vld [vmem:[#allocation5 + $0x458] sm:$0xf]  ;;  %v6402_v19 = vor.u32 %v9238_v6, %v6401_v3 }
 0x278   :  { %3886 = vmatpush.bf16.msra.mxu3 %v7010_v31  ;;  %3861 = vmatpush.bf16.msra.mxu1 %v6466_v50  ;;  %v9302_v12 = vld [vmem:[#allocation5 + $0x474] sm:$0xf0] }
 0x279   :  { %v6913_v13 = vld [vmem:[#allocation5 + $0x658] sm:$0xf]  ;;  %v6658_v20 = vor.u32 %v9302_v12, %v6657_v11 }
 0x27a   :  { %3874 = vmatpush.bf16.msra.mxu2 %v6722_v40  ;;  %v9366_v14 = vld [vmem:[#allocation5 + $0x674] sm:$0xf0]  ;;  %3849 = vmatpush.bf16.msra.mxu0 %v6178_v59 }
 0x27b   :  { %v6113_v17 = vld [vmem:[#allocation5 + $0x18] sm:$0xf]  ;;  %v6914_v24 = vor.u32 %v9366_v14, %v6913_v13 }
 0x27c   :  { %3887 = vmatpush.bf16.msra.mxu3 %v6978_v57  ;;  %v9166_v18 = vld [vmem:[#allocation5 + $0x34] sm:$0xf0]  ;;  %3862 = vmatpush.bf16.msra.mxu1 %v6434_v62 }
 0x27d   :  { %v6369_v21 = vld [vmem:[#allocation5 + $0x218] sm:$0xf]  ;;  %v6114_v32 = vor.u32 %v9166_v18, %v6113_v17 }
 0x27e   :  { %3875 = vmatpush.bf16.msra.mxu2 %v6690_v63  ;;  %v9230_v7 = vld [vmem:[#allocation5 + $0x234] sm:$0xf0]  ;;  %3850 = vmatpush.bf16.msra.mxu0 %v6146_v15 }
 0x27f   :  { %v6625_v22 = vld [vmem:[#allocation5 + $0x418] sm:$0xf]  ;;  %v6370_v36 = vor.u32 %v9230_v7, %v6369_v21 }
 0x280   :  { %3888 = vmatpush.bf16.msra.mxu3 %v6946_v5  ;;  %v9294_v25 = vld [vmem:[#allocation5 + $0x434] sm:$0xf0]  ;;  %3863 = vmatpush.bf16.msra.mxu1 %v6402_v19 }
 0x281   :  { %v6881_v27 = vld [vmem:[#allocation5 + $0x618] sm:$0xf]  ;;  %v6626_v37 = vor.u32 %v9294_v25, %v6625_v22 }
 0x282   :  { %v9358_v28 = vld [vmem:[#allocation5 + $0x634] sm:$0xf0]  ;;  %3876 = vmatpush.bf16.msra.mxu2 %v6658_v20  ;;  %3851 = vmatpush.bf16.msra.mxu0 %v6114_v32  ;;  %v10264_v20 = vld [vmem:[#allocation7] sm:$0xff] }
 0x283   :  { %v7361_v29 = vld [vmem:[#allocation5 + $0x9d8] sm:$0xf]  ;;  %v6882_v40 = vor.u32 %v9358_v28, %v6881_v27  ;;  %v648_v21 = vperm.slane %v10264_v20, 4 }
 0x284   :  { %v9478_v30 = vld [vmem:[#allocation5 + $0x9f4] sm:$0xf0]  ;;  %3889 = vmatpush.bf16.msra.mxu3 %v6914_v24  ;;  %3864 = vmatpush.bf16.msra.mxu1 %v6370_v36 }
 0x285   :  { %v7617_v31 = vld [vmem:[#allocation5 + $0xbd8] sm:$0xf]  ;;  %v7362_v42 = vor.u32 %v9478_v30, %v7361_v29  ;;  %3852 = vmatmul.bf16.vlgmr.msra.gmra.mxu0 %v10170_v10 }
 0x286   :  { %v9542_v33 = vld [vmem:[#allocation5 + $0xbf4] sm:$0xf0]  ;;  %3877 = vmatpush.bf16.msra.mxu2 %v6626_v37 }
 0x287   :  { %v7873_v34 = vld [vmem:[#allocation5 + $0xdd8] sm:$0xf]  ;;  %v7618_v43 = vor.u32 %v9542_v33, %v7617_v31  ;;  %3896 = vmatpush.bf16.msrb.mxu0 %v7362_v42  ;;  %3865 = vmatmul.bf16.vlgmr.msra.gmra.mxu1 %v10177_v26 }
 0x288   :  { %v9606_v48 = vld [vmem:[#allocation5 + $0xdf4] sm:$0xf0]  ;;  %3890 = vmatpush.bf16.msra.mxu3 %v6882_v40 }
 0x289   :  { %v8129_v8 = vld [vmem:[#allocation5 + $0xfd8] sm:$0xf]  ;;  %v7874_v44 = vor.u32 %v9606_v48, %v7873_v34  ;;  %3909 = vmatpush.bf16.msrb.mxu1 %v7618_v43  ;;  %3878 = vmatmul.bf16.vlgmr.msra.gmra.mxu2 %v10168_v9  ;;  %v3646_v34 = vadd.f32 %v3645_v0, %v648_v21  ;;  %v3658_v48 = vpop.f32.mrf.mxu1 }
 0x28a   :  { %v9670_v50 = vld [vmem:[#allocation5 + $0xff4] sm:$0xf0] }
 0x28b   :  { %v7329_v45 = vld [vmem:[#allocation5 + $0x998] sm:$0xf]  ;;  %v8130_v51 = vor.u32 %v9670_v50, %v8129_v8  ;;  %3922 = vmatpush.bf16.msrb.mxu2 %v7874_v44  ;;  %3891 = vmatmul.bf16.vlgmr.msra.gmra.mxu3 %v10172_v16  ;;  %v3659_v43 = vadd.f32 %v3658_v48, %v3646_v34 }
 0x28c   :  { %v9470_v57 = vld [vmem:[#allocation5 + $0x9b4] sm:$0xf0] }
 0x28d   :  { %v7585_v47 = vld [vmem:[#allocation5 + $0xb98] sm:$0xf]  ;;  %v7330_v59 = vor.u32 %v9470_v57, %v7329_v45  ;;  %3935 = vmatpush.bf16.msrb.mxu3 %v8130_v51 }
 0x28e   :  { %v9534_v52 = vld [vmem:[#allocation5 + $0xbb4] sm:$0xf0] }
 0x28f   :  { %v7841_v54 = vld [vmem:[#allocation5 + $0xd98] sm:$0xf]  ;;  %v7586_v61 = vor.u32 %v9534_v52, %v7585_v47  ;;  %3897 = vmatpush.bf16.msrb.mxu0 %v7330_v59 }
 0x290   :  { %v9598_v55 = vld [vmem:[#allocation5 + $0xdb4] sm:$0xf0] }
 0x291   :  { %v8097_v56 = vld [vmem:[#allocation5 + $0xf98] sm:$0xf]  ;;  %v7842_v62 = vor.u32 %v9598_v55, %v7841_v54  ;;  %3910 = vmatpush.bf16.msrb.mxu1 %v7586_v61  ;;  %v3671_v54 = vpop.f32.mrf.mxu2 }
 0x292   :  { %v9662_v58 = vld [vmem:[#allocation5 + $0xfb4] sm:$0xf0]  ;;  %v3672_v61 = vadd.f32 %v3671_v54, %v3659_v43  ;;  %v6851_v43 = vld [vmem:[#allocation5 + $0x5f8] sm:$0xf0] }
 0x293   :  { %v7297_v63 = vld [vmem:[#allocation5 + $0x958] sm:$0xf]  ;;  %v8098_v3 = vor.u32 %v9662_v58, %v8097_v56  ;;  %3923 = vmatpush.bf16.msrb.mxu2 %v7842_v62  ;;  %v3684_v62 = vpop.f32.mrf.mxu3 }
 0x294   :  { %v9462_v1 = vld [vmem:[#allocation5 + $0x974] sm:$0xf0] }
 0x295   :  { %v7553_v2 = vld [vmem:[#allocation5 + $0xb58] sm:$0xf]  ;;  %v7298_v13 = vor.u32 %v9462_v1, %v7297_v63  ;;  %3936 = vmatpush.bf16.msrb.mxu3 %v8098_v3  ;;  %v10267_v3 = vadd.f32 %v3684_v62, %v3672_v61  ;;  %v6563_v62 = vld [vmem:[#allocation5 + $0x3b8] sm:$0xf0] }
 0x296   :  { %v9526_v4 = vld [vmem:[#allocation5 + $0xb74] sm:$0xf0] }
 0x297   :  { %v7809_v5 = vld [vmem:[#allocation5 + $0xd58] sm:$0xf]  ;;  %v7554_v15 = vor.u32 %v9526_v4, %v7553_v2  ;;  %3898 = vmatpush.bf16.msrb.mxu0 %v7298_v13  ;;  %v3647_v4 = vpop.f32.mrf.mxu0 }
 0x298   :  { %v9590_v6 = vld [vmem:[#allocation5 + $0xd74] sm:$0xf0]  ;;  %v7075_v4 = vld [vmem:[#allocation5 + $0x7b8] sm:$0xf0] }
 0x299   :  { %v8065_v11 = vld [vmem:[#allocation5 + $0xf58] sm:$0xf]  ;;  %v7810_v17 = vor.u32 %v9590_v6, %v7809_v5  ;;  %3911 = vmatpush.bf16.msrb.mxu1 %v7554_v15 }
 0x29a   :  { %v9654_v12 = vld [vmem:[#allocation5 + $0xf74] sm:$0xf0] }
 0x29b   :  { %v7265_v14 = vld [vmem:[#allocation5 + $0x918] sm:$0xf]  ;;  %v8066_v7 = vor.u32 %v9654_v12, %v8065_v11  ;;  %3924 = vmatpush.bf16.msrb.mxu2 %v7810_v17  ;;  %v3686_v48 = vpop.f32.mrf.mxu3 }
 0x29c   :  { %v9454_v18 = vld [vmem:[#allocation5 + $0x934] sm:$0xf0] }
 0x29d   :  { %v7521_v19 = vld [vmem:[#allocation5 + $0xb18] sm:$0xf]  ;;  %v7266_v28 = vor.u32 %v9454_v18, %v7265_v14  ;;  %3937 = vmatpush.bf16.msrb.mxu3 %v8066_v7  ;;  %v3660_v14 = vpop.f32.mrf.mxu1 }
 0x29e   :  { %v9518_v22 = vld [vmem:[#allocation5 + $0xb34] sm:$0xf0]  ;;  %v9266_v14 = vld [vmem:[#allocation5 + $0x35c] sm:$0xf] }
 0x29f   :  { %v7777_v23 = vld [vmem:[#allocation5 + $0xd18] sm:$0xf]  ;;  %v7522_v29 = vor.u32 %v9518_v22, %v7521_v19  ;;  %3899 = vmatpush.bf16.msrb.mxu0 %v7266_v28  ;;  %v3697_v48 = vpop.f32.mrf.mxu0 }
 0x2a0   :  { %v9582_v24 = vld [vmem:[#allocation5 + $0xd34] sm:$0xf0] }
 0x2a1   :  { %v8033_v25 = vld [vmem:[#allocation5 + $0xf18] sm:$0xf]  ;;  %v7778_v30 = vor.u32 %v9582_v24, %v7777_v23  ;;  %3912 = vmatpush.bf16.msrb.mxu1 %v7522_v29 }
 0x2a2   :  { %v9646_v27 = vld [vmem:[#allocation5 + $0xf34] sm:$0xf0] }
 0x2a3   :  { %v7233_v31 = vld [vmem:[#allocation5 + $0x8d8] sm:$0xf]  ;;  %v8034_v36 = vor.u32 %v9646_v27, %v8033_v25  ;;  %3925 = vmatpush.bf16.msrb.mxu2 %v7778_v30  ;;  %v3673_v30 = vpop.f32.mrf.mxu2 }
 0x2a4   :  { %v9446_v32 = vld [vmem:[#allocation5 + $0x8f4] sm:$0xf0]  ;;  %v9322_v30 = vld [vmem:[#allocation5 + $0x51c] sm:$0xf] }
 0x2a5   :  { %v7489_v33 = vld [vmem:[#allocation5 + $0xad8] sm:$0xf]  ;;  %v7234_v44 = vor.u32 %v9446_v32, %v7233_v31  ;;  %3938 = vmatpush.bf16.msrb.mxu3 %v8034_v36  ;;  %v9218_v36 = vld [vmem:[#allocation5 + $0x1dc] sm:$0xf] }
 0x2a6   :  { %v9510_v37 = vld [vmem:[#allocation5 + $0xaf4] sm:$0xf0] }
 0x2a7   :  { %v7745_v8 = vld [vmem:[#allocation5 + $0xcd8] sm:$0xf]  ;;  %v7490_v45 = vor.u32 %v9510_v37, %v7489_v33  ;;  %3900 = vmatpush.bf16.msrb.mxu0 %v7234_v44  ;;  %v6339_v37 = vld [vmem:[#allocation5 + $0x1f8] sm:$0xf0] }
 0x2a8   :  { %v9574_v50 = vld [vmem:[#allocation5 + $0xcf4] sm:$0xf0] }
 0x2a9   :  { %v8001_v40 = vld [vmem:[#allocation5 + $0xed8] sm:$0xf]  ;;  %v7746_v57 = vor.u32 %v9574_v50, %v7745_v8  ;;  %3913 = vmatpush.bf16.msrb.mxu1 %v7490_v45  ;;  %v9282_v8 = vld [vmem:[#allocation5 + $0x3dc] sm:$0xf] }
 0x2aa   :  { %v9638_v42 = vld [vmem:[#allocation5 + $0xef4] sm:$0xf0] }
 0x2ab   :  { %v7201_v47 = vld [vmem:[#allocation5 + $0x898] sm:$0xf]  ;;  %v8002_v55 = vor.u32 %v9638_v42, %v8001_v40  ;;  %3926 = vmatpush.bf16.msrb.mxu2 %v7746_v57  ;;  %v6595_v40 = vld [vmem:[#allocation5 + $0x3f8] sm:$0xf0] }
 0x2ac   :  { %v9438_v51 = vld [vmem:[#allocation5 + $0x8b4] sm:$0xf0]  ;;  %v9346_v42 = vld [vmem:[#allocation5 + $0x5dc] sm:$0xf]  ;;  %v6598_v54 = vor.u32 %v9282_v8, %v6595_v40 }
 0x2ad   :  { %v7457_v52 = vld [vmem:[#allocation5 + $0xa98] sm:$0xf]  ;;  %v7202_v2 = vor.u32 %v9438_v51, %v7201_v47  ;;  %3939 = vmatpush.bf16.msrb.mxu3 %v8002_v55  ;;  %v9410_v57 = vld [vmem:[#allocation5 + $0x7dc] sm:$0xf]  ;;  %v6854_v55 = vor.u32 %v9346_v42, %v6851_v43  ;;  %v3698_v42 = vadd.f32 %v3697_v48, %v10267_v3  ;;  %v3710_v43 = vpop.f32.mrf.mxu1 }
 0x2ae   :  { %v9502_v56 = vld [vmem:[#allocation5 + $0xab4] sm:$0xf0]  ;;  %v7107_v47 = vld [vmem:[#allocation5 + $0x7f8] sm:$0xf0] }
 0x2af   :  { %v7713_v58 = vld [vmem:[#allocation5 + $0xc98] sm:$0xf]  ;;  %v7458_v5 = vor.u32 %v9502_v56, %v7457_v52  ;;  %3901 = vmatpush.bf16.msrb.mxu0 %v7202_v2  ;;  %v6342_v52 = vor.u32 %v9218_v36, %v6339_v37  ;;  %v9210_v56 = vld [vmem:[#allocation5 + $0x19c] sm:$0xf]  ;;  %v7110_v61 = vor.u32 %v9410_v57, %v7107_v47 }
 0x2b0   :  { %v9566_v59 = vld [vmem:[#allocation5 + $0xcb4] sm:$0xf0]  ;;  %v9402_v2 = vld [vmem:[#allocation5 + $0x79c] sm:$0xf] }
 0x2b1   :  { %v7969_v63 = vld [vmem:[#allocation5 + $0xe98] sm:$0xf]  ;;  %v7714_v6 = vor.u32 %v9566_v59, %v7713_v58  ;;  %3914 = vmatpush.bf16.msrb.mxu1 %v7458_v5  ;;  %v6307_v58 = vld [vmem:[#allocation5 + $0x1b8] sm:$0xf0] }
 0x2b2   :  { %v9630_v1 = vld [vmem:[#allocation5 + $0xeb4] sm:$0xf0]  ;;  %v9274_v59 = vld [vmem:[#allocation5 + $0x39c] sm:$0xf]  ;;  %v6310_v5 = vor.u32 %v9210_v56, %v6307_v58 }
 0x2b3   :  { %v7169_v11 = vld [vmem:[#allocation5 + $0x858] sm:$0xf]  ;;  %v7970_v15 = vor.u32 %v9630_v1, %v7969_v63  ;;  %3927 = vmatpush.bf16.msrb.mxu2 %v7714_v6  ;;  %v9338_v63 = vld [vmem:[#allocation5 + $0x59c] sm:$0xf]  ;;  %v6566_v6 = vor.u32 %v9274_v59, %v6563_v62 }
 0x2b4   :  { %v9430_v12 = vld [vmem:[#allocation5 + $0x874] sm:$0xf0]  ;;  %v6819_v1 = vld [vmem:[#allocation5 + $0x5b8] sm:$0xf0] }
 0x2b5   :  { %v7425_v13 = vld [vmem:[#allocation5 + $0xa58] sm:$0xf]  ;;  %v7170_v22 = vor.u32 %v9430_v12, %v7169_v11  ;;  %3940 = vmatpush.bf16.msrb.mxu3 %v7970_v15  ;;  %v6822_v11 = vor.u32 %v9338_v63, %v6819_v1  ;;  %v9202_v12 = vld [vmem:[#allocation5 + $0x15c] sm:$0xf]  ;;  %v7078_v15 = vor.u32 %v9402_v2, %v7075_v4  ;;  %v3723_v63 = vpop.f32.mrf.mxu2 }
 0x2b6   :  { %v9494_v17 = vld [vmem:[#allocation5 + $0xa74] sm:$0xf0]  ;;  %v9186_v8 = vld [vmem:[#allocation5 + $0xdc] sm:$0xf] }
 0x2b7   :  { %v7681_v18 = vld [vmem:[#allocation5 + $0xc58] sm:$0xf]  ;;  %v7426_v25 = vor.u32 %v9494_v17, %v7425_v13  ;;  %3902 = vmatpush.bf16.msrb.mxu0 %v7170_v22  ;;  %v6275_v13 = vld [vmem:[#allocation5 + $0x178] sm:$0xf0] }
 0x2b8   :  { %v9558_v19 = vld [vmem:[#allocation5 + $0xc74] sm:$0xf0]  ;;  %v6531_v17 = vld [vmem:[#allocation5 + $0x378] sm:$0xf0]  ;;  %v6278_v22 = vor.u32 %v9202_v12, %v6275_v13 }
 0x2b9   :  { %v7937_v21 = vld [vmem:[#allocation5 + $0xe58] sm:$0xf]  ;;  %v7682_v27 = vor.u32 %v9558_v19, %v7681_v18  ;;  %3915 = vmatpush.bf16.msrb.mxu1 %v7426_v25  ;;  %v9330_v18 = vld [vmem:[#allocation5 + $0x55c] sm:$0xf] }
 0x2ba   :  { %v9622_v7 = vld [vmem:[#allocation5 + $0xe74] sm:$0xf0]  ;;  %v6787_v19 = vld [vmem:[#allocation5 + $0x578] sm:$0xf0] }
 0x2bb   :  { %v7137_v23 = vld [vmem:[#allocation5 + $0x818] sm:$0xf]  ;;  %v7938_v31 = vor.u32 %v9622_v7, %v7937_v21  ;;  %3928 = vmatpush.bf16.msrb.mxu2 %v7682_v27  ;;  %v9394_v21 = vld [vmem:[#allocation5 + $0x75c] sm:$0xf] }
 0x2bc   :  { %v9422_v24 = vld [vmem:[#allocation5 + $0x834] sm:$0xf0]  ;;  %v7043_v7 = vld [vmem:[#allocation5 + $0x778] sm:$0xf0] }
 0x2bd   :  { %v7393_v28 = vld [vmem:[#allocation5 + $0xa18] sm:$0xf]  ;;  %v7138_v50 = vor.u32 %v9422_v24, %v7137_v23  ;;  %3941 = vmatpush.bf16.msrb.mxu3 %v7938_v31  ;;  %v6534_v23 = vor.u32 %v9266_v14, %v6531_v17  ;;  %v6790_v24 = vor.u32 %v9330_v18, %v6787_v19  ;;  %v9194_v25 = vld [vmem:[#allocation5 + $0x11c] sm:$0xf] }
 0x2be   :  { %v9486_v0 = vld [vmem:[#allocation5 + $0xa34] sm:$0xf0]  ;;  %v6243_v27 = vld [vmem:[#allocation5 + $0x138] sm:$0xf0] }
 0x2bf   :  { %v7649_v29 = vld [vmem:[#allocation5 + $0xc18] sm:$0xf]  ;;  %v7394_v44 = vor.u32 %v9486_v0, %v7393_v28  ;;  %3903 = vmatpush.bf16.msrb.mxu0 %v7138_v50  ;;  %v9258_v28 = vld [vmem:[#allocation5 + $0x31c] sm:$0xf]  ;;  %v7046_v0 = vor.u32 %v9394_v21, %v7043_v7 }
 0x2c0   :  { %v9550_v32 = vld [vmem:[#allocation5 + $0xc34] sm:$0xf0]  ;;  %v6755_v31 = vld [vmem:[#allocation5 + $0x538] sm:$0xf0] }
 0x2c1   :  { %v7905_v33 = vld [vmem:[#allocation5 + $0xe18] sm:$0xf]  ;;  %v7650_v45 = vor.u32 %v9550_v32, %v7649_v29  ;;  %3916 = vmatpush.bf16.msrb.mxu1 %v7394_v44  ;;  %v6499_v29 = vld [vmem:[#allocation5 + $0x338] sm:$0xf0]  ;;  %v6758_v37 = vor.u32 %v9322_v30, %v6755_v31 }
 0x2c2   :  { %v9614_v34 = vld [vmem:[#allocation5 + $0xe34] sm:$0xf0]  ;;  %3904 = vmatmul.bf16.vlgmr.msrb.gmra.mxu0 %v10182_v38  ;;  %v9386_v32 = vld [vmem:[#allocation5 + $0x71c] sm:$0xf]  ;;  %v6502_v36 = vor.u32 %v9258_v28, %v6499_v29 }
 0x2c3   :  { %v7906_v51 = vor.u32 %v9614_v34, %v7905_v33  ;;  %3929 = vmatpush.bf16.msrb.mxu2 %v7650_v45  ;;  %3948 = vmatpush.bf16.msra.mxu0 %v6342_v52  ;;  %v7011_v33 = vld [vmem:[#allocation5 + $0x738] sm:$0xf0]  ;;  %v6246_v34 = vor.u32 %v9194_v25, %v6243_v27 }
 0x2c4   :  { %3917 = vmatmul.bf16.vlgmr.msrb.gmra.mxu1 %v10186_v41  ;;  %v6211_v50 = vld [vmem:[#allocation5 + $0xf8] sm:$0xf0]  ;;  %v7014_v44 = vor.u32 %v9386_v32, %v7011_v33 }
 0x2c5   :  { %3942 = vmatpush.bf16.msrb.mxu3 %v7906_v51  ;;  %3961 = vmatpush.bf16.msra.mxu1 %v6598_v54  ;;  %v9250_v40 = vld [vmem:[#allocation5 + $0x2dc] sm:$0xf]  ;;  %v3711_v54 = vadd.f32 %v3710_v43, %v3698_v42 }
 0x2c6   :  { %3930 = vmatmul.bf16.vlgmr.msrb.gmra.mxu2 %v10180_v35  ;;  %v6467_v45 = vld [vmem:[#allocation5 + $0x2f8] sm:$0xf0] }
 0x2c7   :  { %3974 = vmatpush.bf16.msra.mxu2 %v6854_v55  ;;  %3949 = vmatpush.bf16.msra.mxu0 %v6310_v5  ;;  %v9314_v57 = vld [vmem:[#allocation5 + $0x4dc] sm:$0xf]  ;;  %v6214_v55 = vor.u32 %v9186_v8, %v6211_v50  ;;  %v6470_v56 = vor.u32 %v9250_v40, %v6467_v45  ;;  %v3724_v5 = vadd.f32 %v3723_v63, %v3711_v54 }
 0x2c8   :  { %3943 = vmatmul.bf16.vlgmr.msrb.gmra.mxu3 %v10184_v39  ;;  %v6723_v47 = vld [vmem:[#allocation5 + $0x4f8] sm:$0xf0] }
 0x2c9   :  { %3987 = vmatpush.bf16.msra.mxu3 %v7110_v61  ;;  %3962 = vmatpush.bf16.msra.mxu1 %v6566_v6  ;;  %v9378_v51 = vld [vmem:[#allocation5 + $0x6dc] sm:$0xf]  ;;  %v6726_v58 = vor.u32 %v9314_v57, %v6723_v47  ;;  %v3736_v6 = vpop.f32.mrf.mxu3 }
 0x2ca   :  { %v6979_v52 = vld [vmem:[#allocation5 + $0x6f8] sm:$0xf0]  ;;  %v10274_v14 = vadd.f32 %v3736_v6, %v3724_v5 }
 0x2cb   :  { %3975 = vmatpush.bf16.msra.mxu2 %v6822_v11  ;;  %3950 = vmatpush.bf16.msra.mxu0 %v6278_v22  ;;  %v9178_v59 = vld [vmem:[#allocation5 + $0x9c] sm:$0xf]  ;;  %v6982_v3 = vor.u32 %v9378_v51, %v6979_v52  ;;  %v3712_v22 = vpop.f32.mrf.mxu1 }
 0x2cc   :  { %v6179_v61 = vld [vmem:[#allocation5 + $0xb8] sm:$0xf0] }
 0x2cd   :  { %3988 = vmatpush.bf16.msra.mxu3 %v7078_v15  ;;  %3963 = vmatpush.bf16.msra.mxu1 %v6534_v23  ;;  %v9242_v62 = vld [vmem:[#allocation5 + $0x29c] sm:$0xf]  ;;  %v6182_v13 = vor.u32 %v9178_v59, %v6179_v61  ;;  %v3699_v15 = vpop.f32.mrf.mxu0 }
 0x2ce   :  { %v6435_v1 = vld [vmem:[#allocation5 + $0x2b8] sm:$0xf0] }
 0x2cf   :  { %3976 = vmatpush.bf16.msra.mxu2 %v6790_v24  ;;  %3951 = vmatpush.bf16.msra.mxu0 %v6246_v34  ;;  %v9306_v2 = vld [vmem:[#allocation5 + $0x49c] sm:$0xf]  ;;  %v6438_v17 = vor.u32 %v9242_v62, %v6435_v1 }
 0x2d0   :  { %v6691_v4 = vld [vmem:[#allocation5 + $0x4b8] sm:$0xf0] }
 0x2d1   :  { %3989 = vmatpush.bf16.msra.mxu3 %v7046_v0  ;;  %3964 = vmatpush.bf16.msra.mxu1 %v6502_v36  ;;  %v9370_v11 = vld [vmem:[#allocation5 + $0x69c] sm:$0xf]  ;;  %v6694_v18 = vor.u32 %v9306_v2, %v6691_v4  ;;  %v3738_v43 = vpop.f32.mrf.mxu3 }
 0x2d2   :  { %v6947_v12 = vld [vmem:[#allocation5 + $0x6b8] sm:$0xf0] }
 0x2d3   :  { %3977 = vmatpush.bf16.msra.mxu2 %v6758_v37  ;;  %3952 = vmatpush.bf16.msra.mxu0 %v6214_v55  ;;  %v9170_v19 = vld [vmem:[#allocation5 + $0x5c] sm:$0xf]  ;;  %v6950_v23 = vor.u32 %v9370_v11, %v6947_v12  ;;  %v3725_v37 = vpop.f32.mrf.mxu2 }
 0x2d4   :  { %v6147_v21 = vld [vmem:[#allocation5 + $0x78] sm:$0xf0] }
 0x2d5   :  { %3990 = vmatpush.bf16.msra.mxu3 %v7014_v44  ;;  %3965 = vmatpush.bf16.msra.mxu1 %v6470_v56  ;;  %v9234_v7 = vld [vmem:[#allocation5 + $0x25c] sm:$0xf]  ;;  %v6150_v29 = vor.u32 %v9170_v19, %v6147_v21 }
 0x2d6   :  { %v6403_v24 = vld [vmem:[#allocation5 + $0x278] sm:$0xf0] }
 0x2d7   :  { %3978 = vmatpush.bf16.msra.mxu2 %v6726_v58  ;;  %v9298_v25 = vld [vmem:[#allocation5 + $0x45c] sm:$0xf]  ;;  %3953 = vmatpush.bf16.msra.mxu0 %v6182_v13  ;;  %v6406_v32 = vor.u32 %v9234_v7, %v6403_v24 }
 0x2d8   :  { %v6659_v27 = vld [vmem:[#allocation5 + $0x478] sm:$0xf0] }
 0x2d9   :  { %3991 = vmatpush.bf16.msra.mxu3 %v6982_v3  ;;  %v9362_v28 = vld [vmem:[#allocation5 + $0x65c] sm:$0xf]  ;;  %3966 = vmatpush.bf16.msra.mxu1 %v6438_v17  ;;  %v6662_v33 = vor.u32 %v9298_v25, %v6659_v27 }
 0x2da   :  { %v6915_v0 = vld [vmem:[#allocation5 + $0x678] sm:$0xf0] }
 0x2db   :  { %v9162_v30 = vld [vmem:[#allocation5 + $0x1c] sm:$0xf]  ;;  %3979 = vmatpush.bf16.msra.mxu2 %v6694_v18  ;;  %v6918_v8 = vor.u32 %v9362_v28, %v6915_v0  ;;  %3954 = vmatpush.bf16.msra.mxu0 %v6150_v29 }
 0x2dc   :  { %v6115_v31 = vld [vmem:[#allocation5 + $0x38] sm:$0xf0] }
 0x2dd   :  { %v9226_v34 = vld [vmem:[#allocation5 + $0x21c] sm:$0xf]  ;;  %3992 = vmatpush.bf16.msra.mxu3 %v6950_v23  ;;  %v6118_v47 = vor.u32 %v9162_v30, %v6115_v31  ;;  %3967 = vmatpush.bf16.msra.mxu1 %v6406_v32 }
 0x2de   :  { %v6371_v48 = vld [vmem:[#allocation5 + $0x238] sm:$0xf0] }
 0x2df   :  { %v9290_v36 = vld [vmem:[#allocation5 + $0x41c] sm:$0xf]  ;;  %3980 = vmatpush.bf16.msra.mxu2 %v6662_v33  ;;  %v6374_v55 = vor.u32 %v9226_v34, %v6371_v48  ;;  %3955 = vmatpush.bf16.msra.mxu0 %v6118_v47 }
 0x2e0   :  { %v6627_v50 = vld [vmem:[#allocation5 + $0x438] sm:$0xf0] }
 0x2e1   :  { %v9354_v40 = vld [vmem:[#allocation5 + $0x61c] sm:$0xf]  ;;  %v6630_v56 = vor.u32 %v9290_v36, %v6627_v50  ;;  %3993 = vmatpush.bf16.msra.mxu3 %v6918_v8  ;;  %3968 = vmatpush.bf16.msra.mxu1 %v6374_v55  ;;  %v10280_v50 = vpop.f32.mrf.mxu0 }
 0x2e2   :  { %v6883_v42 = vld [vmem:[#allocation5 + $0x638] sm:$0xf0]  ;;  %3956 = vmatmul.bf16.vlgmr.msra.gmra.mxu0 %v10170_v10 }
 0x2e3   :  { %v9474_v44 = vld [vmem:[#allocation5 + $0x9dc] sm:$0xf]  ;;  %v6886_v61 = vor.u32 %v9354_v40, %v6883_v42  ;;  %3981 = vmatpush.bf16.msra.mxu2 %v6630_v56 }
 0x2e4   :  { %v7363_v45 = vld [vmem:[#allocation5 + $0x9f8] sm:$0xf0]  ;;  %3969 = vmatmul.bf16.vlgmr.msra.gmra.mxu1 %v10177_v26 }
 0x2e5   :  { %v9538_v57 = vld [vmem:[#allocation5 + $0xbdc] sm:$0xf]  ;;  %v7366_v62 = vor.u32 %v9474_v44, %v7363_v45  ;;  %3994 = vmatpush.bf16.msra.mxu3 %v6886_v61  ;;  %v10282_v45 = vpop.f32.mrf.mxu1 }
 0x2e6   :  { %v7619_v51 = vld [vmem:[#allocation5 + $0xbf8] sm:$0xf0]  ;;  %3982 = vmatmul.bf16.vlgmr.msra.gmra.mxu2 %v10168_v9 }
 0x2e7   :  { %v9602_v52 = vld [vmem:[#allocation5 + $0xddc] sm:$0xf]  ;;  %v7622_v63 = vor.u32 %v9538_v57, %v7619_v51  ;;  %4000 = vmatpush.bf16.msrb.mxu0 %v7366_v62 }
 0x2e8   :  { %v7875_v54 = vld [vmem:[#allocation5 + $0xdf8] sm:$0xf0]  ;;  %3995 = vmatmul.bf16.vlgmr.msra.gmra.mxu3 %v10172_v16 }
 0x2e9   :  { %v9666_v58 = vld [vmem:[#allocation5 + $0xfdc] sm:$0xf]  ;;  %v7878_v3 = vor.u32 %v9602_v52, %v7875_v54  ;;  %4013 = vmatpush.bf16.msrb.mxu1 %v7622_v63 }
 0x2ea   :  { %v8131_v59 = vld [vmem:[#allocation5 + $0xff8] sm:$0xf0] }
 0x2eb   :  { %v9466_v1 = vld [vmem:[#allocation5 + $0x99c] sm:$0xf]  ;;  %v8134_v5 = vor.u32 %v9666_v58, %v8131_v59  ;;  %4026 = vmatpush.bf16.msrb.mxu2 %v7878_v3  ;;  %v10284_v3 = vpop.f32.mrf.mxu2 }
 0x2ec   :  { %v7331_v2 = vld [vmem:[#allocation5 + $0x9b8] sm:$0xf0] }
 0x2ed   :  { %v9530_v4 = vld [vmem:[#allocation5 + $0xb9c] sm:$0xf]  ;;  %v7334_v17 = vor.u32 %v9466_v1, %v7331_v2  ;;  %4039 = vmatpush.bf16.msrb.mxu3 %v8134_v5 }
 0x2ee   :  { %v7587_v6 = vld [vmem:[#allocation5 + $0xbb8] sm:$0xf0] }
 0x2ef   :  { %v9594_v11 = vld [vmem:[#allocation5 + $0xd9c] sm:$0xf]  ;;  %v7590_v18 = vor.u32 %v9530_v4, %v7587_v6  ;;  %4001 = vmatpush.bf16.msrb.mxu0 %v7334_v17  ;;  %v10286_v6 = vpop.f32.mrf.mxu3 }
 0x2f0   :  { %v7843_v12 = vld [vmem:[#allocation5 + $0xdb8] sm:$0xf0] }
 0x2f1   :  { %v9658_v13 = vld [vmem:[#allocation5 + $0xf9c] sm:$0xf]  ;;  %v7846_v19 = vor.u32 %v9594_v11, %v7843_v12  ;;  %4014 = vmatpush.bf16.msrb.mxu1 %v7590_v18 }
 0x2f2   :  { %v8099_v15 = vld [vmem:[#allocation5 + $0xfb8] sm:$0xf0] }
 0x2f3   :  { %v9458_v21 = vld [vmem:[#allocation5 + $0x95c] sm:$0xf]  ;;  %v8102_v23 = vor.u32 %v9658_v13, %v8099_v15  ;;  %4027 = vmatpush.bf16.msrb.mxu2 %v7846_v19  ;;  %v3751_v15 = vpop.f32.mrf.mxu0 }
 0x2f4   :  { %v7299_v7 = vld [vmem:[#allocation5 + $0x978] sm:$0xf0]  ;;  %v9793_v15 = vld [vmem:[#allocation8 + $0x3cc] sm:$0xf0] }
 0x2f5   :  { %v9522_v22 = vld [vmem:[#allocation5 + $0xb5c] sm:$0xf]  ;;  %v7302_v29 = vor.u32 %v9458_v21, %v7299_v7  ;;  %4040 = vmatpush.bf16.msrb.mxu3 %v8102_v23 }
 0x2f6   :  { %v7555_v24 = vld [vmem:[#allocation5 + $0xb78] sm:$0xf0] }
 0x2f7   :  { %v9586_v25 = vld [vmem:[#allocation5 + $0xd5c] sm:$0xf]  ;;  %v7558_v30 = vor.u32 %v9522_v22, %v7555_v24  ;;  %4002 = vmatpush.bf16.msrb.mxu0 %v7302_v29  ;;  %v3764_v22 = vpop.f32.mrf.mxu1 }
 0x2f8   :  { %v7811_v27 = vld [vmem:[#allocation5 + $0xd78] sm:$0xf0]  ;;  %v8345_v22 = vld [vmem:[#allocation8 + $0x1a0] sm:$0xf] }
 0x2f9   :  { %v9650_v28 = vld [vmem:[#allocation5 + $0xf5c] sm:$0xf]  ;;  %v7814_v31 = vor.u32 %v9586_v25, %v7811_v27  ;;  %4015 = vmatpush.bf16.msrb.mxu1 %v7558_v30 }
 0x2fa   :  { %v8067_v0 = vld [vmem:[#allocation5 + $0xf78] sm:$0xf0] }
 0x2fb   :  { %v9450_v32 = vld [vmem:[#allocation5 + $0x91c] sm:$0xf]  ;;  %v8070_v34 = vor.u32 %v9650_v28, %v8067_v0  ;;  %4028 = vmatpush.bf16.msrb.mxu2 %v7814_v31 }
 0x2fc   :  { %v7267_v33 = vld [vmem:[#allocation5 + $0x938] sm:$0xf0] }
 0x2fd   :  { %v9514_v9 = vld [vmem:[#allocation5 + $0xb1c] sm:$0xf]  ;;  %v7270_v16 = vor.u32 %v9450_v32, %v7267_v33  ;;  %4041 = vmatpush.bf16.msrb.mxu3 %v8070_v34 }
 0x2fe   :  { %v7523_v48 = vld [vmem:[#allocation5 + $0xb38] sm:$0xf0] }
 0x2ff   :  { %v9578_v36 = vld [vmem:[#allocation5 + $0xd1c] sm:$0xf]  ;;  %v7526_v26 = vor.u32 %v9514_v9, %v7523_v48  ;;  %4003 = vmatpush.bf16.msrb.mxu0 %v7270_v16 }
 0x300   :  { %v7779_v37 = vld [vmem:[#allocation5 + $0xd38] sm:$0xf0] }
 0x301   :  { %v9642_v8 = vld [vmem:[#allocation5 + $0xf1c] sm:$0xf]  ;;  %v7782_v40 = vor.u32 %v9578_v36, %v7779_v37  ;;  %4016 = vmatpush.bf16.msrb.mxu1 %v7526_v26  ;;  %v3777_v36 = vpop.f32.mrf.mxu2  ;;  %v3790_v26 = vpop.f32.mrf.mxu3 }
 0x302   :  { %v8035_v10 = vld [vmem:[#allocation5 + $0xf38] sm:$0xf0]  ;;  %v8585_v36 = vld [vmem:[#allocation8 + $0x380] sm:$0xf]  ;;  %v9685_v26 = vld [vmem:[#allocation8 + $0x6c] sm:$0xf0] }
 0x303   :  { %v9442_v42 = vld [vmem:[#allocation5 + $0x8dc] sm:$0xf]  ;;  %v8038_v57 = vor.u32 %v9642_v8, %v8035_v10  ;;  %4029 = vmatpush.bf16.msrb.mxu2 %v7782_v40  ;;  %v8249_v40 = vld [vmem:[#allocation8 + $0xe0] sm:$0xf] }
 0x304   :  { %v7235_v43 = vld [vmem:[#allocation5 + $0x8f8] sm:$0xf0] }
 0x305   :  { %v9506_v44 = vld [vmem:[#allocation5 + $0xadc] sm:$0xf]  ;;  %v7238_v56 = vor.u32 %v9442_v42, %v7235_v43  ;;  %4042 = vmatpush.bf16.msrb.mxu3 %v8038_v57  ;;  %v9701_v42 = vld [vmem:[#allocation8 + $0xec] sm:$0xf0]  ;;  %v8377_v43 = vld [vmem:[#allocation8 + $0x1e0] sm:$0xf] }
 0x306   :  { %v7491_v47 = vld [vmem:[#allocation5 + $0xaf8] sm:$0xf0]  ;;  %v9733_v57 = vld [vmem:[#allocation8 + $0x1ec] sm:$0xf0] }
 0x307   :  { %v9570_v51 = vld [vmem:[#allocation5 + $0xcdc] sm:$0xf]  ;;  %v7494_v58 = vor.u32 %v9506_v44, %v7491_v47  ;;  %4004 = vmatpush.bf16.msrb.mxu0 %v7238_v56  ;;  %v8505_v47 = vld [vmem:[#allocation8 + $0x2e0] sm:$0xf]  ;;  %v9797_v56 = vld [vmem:[#allocation8 + $0x3ec] sm:$0xf0] }
 0x308   :  { %v7747_v52 = vld [vmem:[#allocation5 + $0xcf8] sm:$0xf0] }
 0x309   :  { %v9634_v54 = vld [vmem:[#allocation5 + $0xedc] sm:$0xf]  ;;  %v7750_v59 = vor.u32 %v9570_v51, %v7747_v52  ;;  %4017 = vmatpush.bf16.msrb.mxu1 %v7494_v58  ;;  %v9765_v51 = vld [vmem:[#allocation8 + $0x2ec] sm:$0xf0] }
 0x30a   :  { %v8003_v55 = vld [vmem:[#allocation5 + $0xef8] sm:$0xf0] }
 0x30b   :  { %v9434_v61 = vld [vmem:[#allocation5 + $0x89c] sm:$0xf]  ;;  %v8006_v1 = vor.u32 %v9634_v54, %v8003_v55  ;;  %4030 = vmatpush.bf16.msrb.mxu2 %v7750_v59  ;;  %v8633_v55 = vld [vmem:[#allocation8 + $0x3e0] sm:$0xf]  ;;  %v8250_v59 = vor.u32 %v9701_v42, %v8249_v40  ;;  %v10294_v42 = vpop.f32.mrf.mxu1 }
 0x30c   :  { %v7203_v62 = vld [vmem:[#allocation5 + $0x8b8] sm:$0xf0]  ;;  %v8313_v40 = vld [vmem:[#allocation8 + $0x160] sm:$0xf] }
 0x30d   :  { %v9498_v63 = vld [vmem:[#allocation5 + $0xa9c] sm:$0xf]  ;;  %v7206_v13 = vor.u32 %v9434_v61, %v7203_v62  ;;  %4043 = vmatpush.bf16.msrb.mxu3 %v8006_v1  ;;  %v8378_v61 = vor.u32 %v9733_v57, %v8377_v43  ;;  %v8506_v62 = vor.u32 %v9765_v51, %v8505_v47  ;;  %v9697_v1 = vld [vmem:[#allocation8 + $0xcc] sm:$0xf0]  ;;  %v8441_v57 = vld [vmem:[#allocation8 + $0x260] sm:$0xf] }
 0x30e   :  { %v7459_v2 = vld [vmem:[#allocation5 + $0xab8] sm:$0xf0]  ;;  %v9749_v47 = vld [vmem:[#allocation8 + $0x26c] sm:$0xf0]  ;;  %v8569_v51 = vld [vmem:[#allocation8 + $0x360] sm:$0xf] }
 0x30f   :  { %v9562_v4 = vld [vmem:[#allocation5 + $0xc9c] sm:$0xf]  ;;  %v7462_v17 = vor.u32 %v9498_v63, %v7459_v2  ;;  %4005 = vmatpush.bf16.msrb.mxu0 %v7206_v13  ;;  %v8233_v63 = vld [vmem:[#allocation8 + $0xc0] sm:$0xf] }
 0x310   :  { %v7715_v5 = vld [vmem:[#allocation5 + $0xcb8] sm:$0xf0]  ;;  %v8361_v2 = vld [vmem:[#allocation8 + $0x1c0] sm:$0xf] }
 0x311   :  { %v9626_v11 = vld [vmem:[#allocation5 + $0xe9c] sm:$0xf]  ;;  %v7718_v18 = vor.u32 %v9562_v4, %v7715_v5  ;;  %4018 = vmatpush.bf16.msrb.mxu1 %v7462_v17  ;;  %v8634_v4 = vor.u32 %v9797_v56, %v8633_v55  ;;  %v9729_v5 = vld [vmem:[#allocation8 + $0x1cc] sm:$0xf0]  ;;  %v8617_v13 = vld [vmem:[#allocation8 + $0x3c0] sm:$0xf]  ;;  %v8234_v17 = vor.u32 %v9697_v1, %v8233_v63  ;;  %v8442_v56 = vor.u32 %v9749_v47, %v8441_v57 }
 0x312   :  { %v7971_v12 = vld [vmem:[#allocation5 + $0xeb8] sm:$0xf0]  ;;  %v9713_v1 = vld [vmem:[#allocation8 + $0x14c] sm:$0xf0]  ;;  %v9017_v57 = vld [vmem:[#allocation8 + $0x6e0] sm:$0xf] }
 0x313   :  { %v9426_v19 = vld [vmem:[#allocation5 + $0x85c] sm:$0xf]  ;;  %v7974_v23 = vor.u32 %v9626_v11, %v7971_v12  ;;  %4031 = vmatpush.bf16.msrb.mxu2 %v7718_v18  ;;  %v8489_v11 = vld [vmem:[#allocation8 + $0x2c0] sm:$0xf]  ;;  %v9761_v12 = vld [vmem:[#allocation8 + $0x2cc] sm:$0xf0]  ;;  %v8362_v18 = vor.u32 %v9729_v5, %v8361_v2  ;;  %v10298_v5 = vpop.f32.mrf.mxu3 }
 0x314   :  { %v7171_v21 = vld [vmem:[#allocation5 + $0x878] sm:$0xf0]  ;;  %v8425_v2 = vld [vmem:[#allocation8 + $0x240] sm:$0xf]  ;;  %v9893_v47 = vld [vmem:[#allocation8 + $0x6ec] sm:$0xf0] }
 0x315   :  { %v9490_v7 = vld [vmem:[#allocation5 + $0xa5c] sm:$0xf]  ;;  %v7174_v29 = vor.u32 %v9426_v19, %v7171_v21  ;;  %4044 = vmatpush.bf16.msrb.mxu3 %v7974_v23  ;;  %v8490_v19 = vor.u32 %v9761_v12, %v8489_v11  ;;  %v8217_v21 = vld [vmem:[#allocation8 + $0xa0] sm:$0xf]  ;;  %v8618_v23 = vor.u32 %v9793_v15, %v8617_v13  ;;  %v9777_v12 = vld [vmem:[#allocation8 + $0x34c] sm:$0xf0] }
 0x316   :  { %v7427_v24 = vld [vmem:[#allocation5 + $0xa78] sm:$0xf0]  ;;  %v8553_v11 = vld [vmem:[#allocation8 + $0x340] sm:$0xf] }
 0x317   :  { %v9554_v25 = vld [vmem:[#allocation5 + $0xc5c] sm:$0xf]  ;;  %v7430_v32 = vor.u32 %v9490_v7, %v7427_v24  ;;  %4006 = vmatpush.bf16.msrb.mxu0 %v7174_v29  ;;  %v9693_v7 = vld [vmem:[#allocation8 + $0xac] sm:$0xf0] }
 0x318   :  { %v7683_v27 = vld [vmem:[#allocation5 + $0xc78] sm:$0xf0]  ;;  %v9725_v24 = vld [vmem:[#allocation8 + $0x1ac] sm:$0xf0]  ;;  %v8218_v29 = vor.u32 %v9693_v7, %v8217_v21  ;;  %v8281_v7 = vld [vmem:[#allocation8 + $0x120] sm:$0xf] }
 0x319   :  { %v9618_v28 = vld [vmem:[#allocation5 + $0xe5c] sm:$0xf]  ;;  %v7686_v33 = vor.u32 %v9554_v25, %v7683_v27  ;;  %4019 = vmatpush.bf16.msrb.mxu1 %v7430_v32  ;;  %v8473_v25 = vld [vmem:[#allocation8 + $0x2a0] sm:$0xf]  ;;  %v9757_v27 = vld [vmem:[#allocation8 + $0x2ac] sm:$0xf0] }
 0x31a   :  { %v7939_v0 = vld [vmem:[#allocation5 + $0xe78] sm:$0xf0]  ;;  %v8201_v32 = vld [vmem:[#allocation8 + $0x80] sm:$0xf]  ;;  %v9677_v21 = vld [vmem:[#allocation8 + $0x2c] sm:$0xf0] }
 0x31b   :  { %v9418_v30 = vld [vmem:[#allocation5 + $0x81c] sm:$0xf]  ;;  %v7942_v37 = vor.u32 %v9618_v28, %v7939_v0  ;;  %4032 = vmatpush.bf16.msrb.mxu2 %v7686_v33  ;;  %v8601_v28 = vld [vmem:[#allocation8 + $0x3a0] sm:$0xf]  ;;  %v9789_v0 = vld [vmem:[#allocation8 + $0x3ac] sm:$0xf0] }
 0x31c   :  { %v7139_v31 = vld [vmem:[#allocation5 + $0x838] sm:$0xf0]  ;;  %v8329_v33 = vld [vmem:[#allocation8 + $0x180] sm:$0xf] }
 0x31d   :  { %v9482_v9 = vld [vmem:[#allocation5 + $0xa1c] sm:$0xf]  ;;  %v7142_v44 = vor.u32 %v9418_v30, %v7139_v31  ;;  %4045 = vmatpush.bf16.msrb.mxu3 %v7942_v37  ;;  %v8346_v30 = vor.u32 %v9725_v24, %v8345_v22  ;;  %v8474_v31 = vor.u32 %v9757_v27, %v8473_v25  ;;  %v3816_v22 = vpop.f32.mrf.mxu1  ;;  %v9709_v24 = vld [vmem:[#allocation8 + $0x12c] sm:$0xf0]  ;;  %v8409_v25 = vld [vmem:[#allocation8 + $0x220] sm:$0xf] }
 0x31e   :  { %v7395_v34 = vld [vmem:[#allocation5 + $0xa38] sm:$0xf0]  ;;  %v9741_v27 = vld [vmem:[#allocation8 + $0x22c] sm:$0xf0]  ;;  %v8857_v22 = vld [vmem:[#allocation8 + $0x5a0] sm:$0xf] }
 0x31f   :  { %v9546_v48 = vld [vmem:[#allocation5 + $0xc1c] sm:$0xf]  ;;  %v7398_v52 = vor.u32 %v9482_v9, %v7395_v34  ;;  %4007 = vmatpush.bf16.msrb.mxu0 %v7142_v44  ;;  %v8602_v9 = vor.u32 %v9789_v0, %v8601_v28  ;;  %v9721_v34 = vld [vmem:[#allocation8 + $0x18c] sm:$0xf0]  ;;  %v649_v28 = vperm.slane %v10264_v20, 5  ;;  %v3842_v20 = vpop.f32.mrf.mxu3 }
 0x320   :  { %v7651_v8 = vld [vmem:[#allocation5 + $0xc38] sm:$0xf0]  ;;  %v9717_v44 = vld [vmem:[#allocation8 + $0x16c] sm:$0xf0]  ;;  %v8537_v0 = vld [vmem:[#allocation8 + $0x320] sm:$0xf] }
 0x321   :  { %v9610_v10 = vld [vmem:[#allocation5 + $0xe1c] sm:$0xf]  ;;  %v7654_v54 = vor.u32 %v9546_v48, %v7651_v8  ;;  %4020 = vmatpush.bf16.msrb.mxu1 %v7398_v52  ;;  %v8457_v48 = vld [vmem:[#allocation8 + $0x280] sm:$0xf]  ;;  %v10292_v8 = vpop.f32.mrf.mxu0  ;;  %v9781_v52 = vld [vmem:[#allocation8 + $0x36c] sm:$0xf0]  ;;  %v8314_v55 = vor.u32 %v9717_v44, %v8313_v40 }
 0x322   :  { %v7907_v16 = vld [vmem:[#allocation5 + $0xe38] sm:$0xf0]  ;;  %4008 = vmatmul.bf16.vlgmr.msrb.gmra.mxu0 %v10182_v38  ;;  %v9689_v38 = vld [vmem:[#allocation8 + $0x8c] sm:$0xf0]  ;;  %v8570_v63 = vor.u32 %v9781_v52, %v8569_v51  ;;  %v8889_v40 = vld [vmem:[#allocation8 + $0x5e0] sm:$0xf] }
 0x323   :  { %v7910_v58 = vor.u32 %v9610_v10, %v7907_v16  ;;  %4033 = vmatpush.bf16.msrb.mxu2 %v7654_v54  ;;  %5614 = vmatpush.bf16.msra.mxu0 %v8250_v59  ;;  %v8202_v37 = vor.u32 %v9689_v38, %v8201_v32  ;;  %v8185_v16 = vld [vmem:[#allocation8 + $0x60] sm:$0xf]  ;;  %v9681_v59 = vld [vmem:[#allocation8 + $0x4c] sm:$0xf0]  ;;  %v8282_v38 = vor.u32 %v9709_v24, %v8281_v7  ;;  %v4052_v51 = vmax.f32 %v10214_v49, 0.0 }
 0x324   :  { %4021 = vmatmul.bf16.vlgmr.msrb.gmra.mxu1 %v10186_v41  ;;  %v9753_v41 = vld [vmem:[#allocation8 + $0x28c] sm:$0xf0]  ;;  %v8186_v54 = vor.u32 %v9685_v26, %v8185_v16  ;;  %v8761_v16 = vld [vmem:[#allocation8 + $0x4e0] sm:$0xf]  ;;  %v4053_v52 = vmax.f32 %v10228_v46, 0.0 }
 0x325   :  { %4046 = vmatpush.bf16.msrb.mxu3 %v7910_v58  ;;  %5627 = vmatpush.bf16.msra.mxu1 %v8378_v61  ;;  %v8458_v10 = vor.u32 %v9753_v41, %v8457_v48  ;;  %v8169_v58 = vld [vmem:[#allocation8 + $0x40] sm:$0xf]  ;;  %v9673_v32 = vld [vmem:[#allocation8 + $0xc] sm:$0xf0] }
 0x326   :  { %4034 = vmatmul.bf16.vlgmr.msrb.gmra.mxu2 %v10180_v35  ;;  %v9785_v35 = vld [vmem:[#allocation8 + $0x38c] sm:$0xf0]  ;;  %v8297_v61 = vld [vmem:[#allocation8 + $0x140] sm:$0xf]  ;;  %v8170_v13 = vor.u32 %v9681_v59, %v8169_v58 }
 0x327   :  { %5640 = vmatpush.bf16.msra.mxu2 %v8506_v62  ;;  %5615 = vmatpush.bf16.msra.mxu0 %v8234_v17  ;;  %v8586_v43 = vor.u32 %v9785_v35, %v8585_v36  ;;  %v10296_v62 = vpop.f32.mrf.mxu2  ;;  %v8298_v17 = vor.u32 %v9713_v1, %v8297_v61  ;;  %v8393_v48 = vld [vmem:[#allocation8 + $0x200] sm:$0xf]  ;;  %v9737_v35 = vld [vmem:[#allocation8 + $0x20c] sm:$0xf0]  ;;  %v9018_v1 = vor.u32 %v9893_v47, %v9017_v57 }
 0x328   :  { %4047 = vmatmul.bf16.vlgmr.msrb.gmra.mxu3 %v10184_v39  ;;  %v8330_v39 = vor.u32 %v9721_v34, %v8329_v33  ;;  %v8410_v33 = vor.u32 %v9741_v27, %v8409_v25  ;;  %v9705_v34 = vld [vmem:[#allocation8 + $0x10c] sm:$0xf0]  ;;  %v8873_v49 = vld [vmem:[#allocation8 + $0x5c0] sm:$0xf] }
 0x329   :  { %5653 = vmatpush.bf16.msra.mxu3 %v8634_v4  ;;  %5628 = vmatpush.bf16.msra.mxu1 %v8362_v18  ;;  %v9745_v4 = vld [vmem:[#allocation8 + $0x24c] sm:$0xf0]  ;;  %v3803_v15 = vpop.f32.mrf.mxu0  ;;  %v8985_v24 = vld [vmem:[#allocation8 + $0x6a0] sm:$0xf] }
 0x32a   :  { %v8426_v18 = vor.u32 %v9745_v4, %v8425_v2  ;;  %v9829_v26 = vld [vmem:[#allocation8 + $0x4ec] sm:$0xf0]  ;;  %v8745_v2 = vld [vmem:[#allocation8 + $0x4c0] sm:$0xf]  ;;  %v10309_v15 = vpack.c.bf16 %v4053_v52, %v4053_v52 }
 0x32b   :  { %5641 = vmatpush.bf16.msra.mxu2 %v8490_v19  ;;  %5616 = vmatpush.bf16.msra.mxu0 %v8218_v29  ;;  %v8153_v19 = vld [vmem:[#allocation8 + $0x20] sm:$0xf]  ;;  %v9773_v29 = vld [vmem:[#allocation8 + $0x32c] sm:$0xf0]  ;;  %v8762_v59 = vor.u32 %v9829_v26, %v8761_v16 }
 0x32c   :  { %v8538_v36 = vor.u32 %v9773_v29, %v8537_v0  ;;  %v9861_v44 = vld [vmem:[#allocation8 + $0x5ec] sm:$0xf0]  ;;  %v8713_v29 = vld [vmem:[#allocation8 + $0x480] sm:$0xf] }
 0x32d   :  { %5654 = vmatpush.bf16.msra.mxu3 %v8618_v23  ;;  %5629 = vmatpush.bf16.msra.mxu1 %v8346_v30  ;;  %v8554_v23 = vor.u32 %v9777_v12, %v8553_v11  ;;  %v8154_v30 = vor.u32 %v9677_v21, %v8153_v19  ;;  %v9825_v4 = vld [vmem:[#allocation8 + $0x4cc] sm:$0xf0]  ;;  %v9001_v11 = vld [vmem:[#allocation8 + $0x6c0] sm:$0xf] }
 0x32e   :  { %v9857_v46 = vld [vmem:[#allocation8 + $0x5cc] sm:$0xf0]  ;;  %v8729_v21 = vld [vmem:[#allocation8 + $0x4a0] sm:$0xf] }
 0x32f   :  { %5642 = vmatpush.bf16.msra.mxu2 %v8474_v31  ;;  %5617 = vmatpush.bf16.msra.mxu0 %v8202_v37  ;;  %v8137_v31 = vld [vmem:[#allocation8] sm:$0xf]  ;;  %v3829_v41 = vpop.f32.mrf.mxu2  ;;  %v9889_v12 = vld [vmem:[#allocation8 + $0x6cc] sm:$0xf0] }
 0x330   :  { %v8521_v37 = vld [vmem:[#allocation8 + $0x300] sm:$0xf]  ;;  %v9002_v19 = vor.u32 %v9889_v12, %v9001_v11  ;;  %v9821_v7 = vld [vmem:[#allocation8 + $0x4ac] sm:$0xf0]  ;;  %v10332_v12 = vld [vmem:[#allocation7] sm:$0xff] }
 0x331   :  { %5655 = vmatpush.bf16.msra.mxu3 %v8602_v9  ;;  %5630 = vmatpush.bf16.msra.mxu1 %v8330_v39  ;;  %v8265_v9 = vld [vmem:[#allocation8 + $0x100] sm:$0xf]  ;;  %v9769_v39 = vld [vmem:[#allocation8 + $0x30c] sm:$0xf0] }
 0x332   :  { %v8522_v58 = vor.u32 %v9769_v39, %v8521_v37  ;;  %v9885_v25 = vld [vmem:[#allocation8 + $0x6ac] sm:$0xf0]  ;;  %v8825_v37 = vld [vmem:[#allocation8 + $0x560] sm:$0xf]  ;;  %v10324_v39 = vpop.f32.mrf.mxu1 }
 0x333   :  { %5643 = vmatpush.bf16.msra.mxu2 %v8458_v10  ;;  %5618 = vmatpush.bf16.msra.mxu0 %v8186_v54  ;;  %v3750_v10 = vadd.f32 %v10280_v50, %v649_v28  ;;  %v8266_v54 = vor.u32 %v9705_v34, %v8265_v9  ;;  %v4055_v50 = vmax.f32 %v10258_v60, 0.0  ;;  %v8986_v0 = vor.u32 %v9885_v25, %v8985_v24  ;;  %v10321_v34 = vpop.f32.mrf.mxu0  ;;  %v9845_v20 = vld [vmem:[#allocation8 + $0x56c] sm:$0xf0]  ;;  %v8809_v47 = vld [vmem:[#allocation8 + $0x540] sm:$0xf] }
 0x334   :  { %v9877_v16 = vld [vmem:[#allocation8 + $0x66c] sm:$0xf0]  ;;  %v8905_v24 = vld [vmem:[#allocation8 + $0x600] sm:$0xf] }
 0x335   :  { %5656 = vmatpush.bf16.msra.mxu3 %v8586_v43  ;;  %5631 = vmatpush.bf16.msra.mxu1 %v8314_v55  ;;  %v8138_v43 = vor.u32 %v9673_v32, %v8137_v31  ;;  %v8394_v55 = vor.u32 %v9737_v35, %v8393_v48  ;;  %v3763_v61 = vadd.f32 %v10282_v45, %v3750_v10  ;;  %v8841_v31 = vld [vmem:[#allocation8 + $0x580] sm:$0xf]  ;;  %v9849_v32 = vld [vmem:[#allocation8 + $0x58c] sm:$0xf0] }
 0x336   :  { %v10313_v60 = vpack.c.bf16 %v4055_v50, %v4055_v50  ;;  %v8746_v45 = vor.u32 %v9825_v4, %v8745_v2  ;;  %v8842_v41 = vor.u32 %v9849_v32, %v8841_v31  ;;  %v9813_v35 = vld [vmem:[#allocation8 + $0x46c] sm:$0xf0]  ;;  %v8953_v10 = vld [vmem:[#allocation8 + $0x660] sm:$0xf]  ;;  %v8251_v31 = vld [vmem:[#allocation8 + $0xf0] sm:$0xf0] }
 0x337   :  { %5644 = vmatpush.bf16.msra.mxu2 %v8442_v56  ;;  %5619 = vmatpush.bf16.msra.mxu0 %v8170_v13  ;;  %v4054_v56 = vmax.f32 %v10244_v53, 0.0  ;;  %v10307_v13 = vpack.c.bf16 %v4052_v51, %v4052_v51  ;;  %v9809_v57 = vld [vmem:[#allocation8 + $0x44c] sm:$0xf0]  ;;  %v10327_v51 = vpop.f32.mrf.mxu2  ;;  %v8793_v2 = vld [vmem:[#allocation8 + $0x520] sm:$0xf] }
 0x338   :  { %v9841_v52 = vld [vmem:[#allocation8 + $0x54c] sm:$0xf0]  ;;  %v9731_v32 = vld [vmem:[#allocation8 + $0x1e4] sm:$0xf] }
 0x339   :  { %5657 = vmatpush.bf16.msra.mxu3 %v8570_v63  ;;  %5632 = vmatpush.bf16.msra.mxu1 %v8298_v17  ;;  %v8890_v63 = vor.u32 %v9861_v44, %v8889_v40  ;;  %v10311_v53 = vpack.c.bf16 %v4054_v56, %v4054_v56  ;;  %v3776_v17 = vadd.f32 %v10284_v3, %v3763_v61  ;;  %v8681_v44 = vld [vmem:[#allocation8 + $0x440] sm:$0xf]  ;;  %v10329_v56 = vpop.f32.mrf.mxu3  ;;  %v9869_v11 = vld [vmem:[#allocation8 + $0x62c] sm:$0xf0] }
 0x33a   :  { %v8730_v3 = vor.u32 %v9821_v7, %v8729_v21  ;;  %v8682_v50 = vor.u32 %v9809_v57, %v8681_v44  ;;  %v3868_v4 = vpop.f32.mrf.mxu1  ;;  %v9865_v25 = vld [vmem:[#allocation8 + $0x60c] sm:$0xf0]  ;;  %v9759_v57 = vld [vmem:[#allocation8 + $0x2c4] sm:$0xf] }
 0x33b   :  { %5645 = vmatpush.bf16.msra.mxu2 %v8426_v18  ;;  %5620 = vmatpush.bf16.msra.mxu0 %v8154_v30  ;;  %v8874_v18 = vor.u32 %v9857_v46, %v8873_v49  ;;  %v3789_v27 = vadd.f32 %v10286_v6, %v3776_v17  ;;  %v9817_v30 = vld [vmem:[#allocation8 + $0x48c] sm:$0xf0]  ;;  %v8921_v46 = vld [vmem:[#allocation8 + $0x620] sm:$0xf]  ;;  %v9755_v4 = vld [vmem:[#allocation8 + $0x2a4] sm:$0xf] }
 0x33c   :  { %v8714_v9 = vor.u32 %v9817_v30, %v8713_v29  ;;  %v9837_v49 = vld [vmem:[#allocation8 + $0x52c] sm:$0xf0] }
 0x33d   :  { %5658 = vmatpush.bf16.msra.mxu3 %v8554_v23  ;;  %5633 = vmatpush.bf16.msra.mxu1 %v8282_v38  ;;  %v9853_v23 = vld [vmem:[#allocation8 + $0x5ac] sm:$0xf0]  ;;  %v8969_v38 = vld [vmem:[#allocation8 + $0x680] sm:$0xf]  ;;  %v3802_v48 = vadd.f32 %v10292_v8, %v3789_v27  ;;  %v8954_v8 = vor.u32 %v9877_v16, %v8953_v10  ;;  %v8794_v7 = vor.u32 %v9837_v49, %v8793_v2  ;;  %v9699_v27 = vld [vmem:[#allocation8 + $0xe4] sm:$0xf] }
 0x33e   :  { %v8858_v28 = vor.u32 %v9853_v23, %v8857_v22  ;;  %v8922_v22 = vor.u32 %v9869_v11, %v8921_v46  ;;  %v9833_v23 = vld [vmem:[#allocation8 + $0x50c] sm:$0xf0]  ;;  %v9695_v10 = vld [vmem:[#allocation8 + $0xc4] sm:$0xf]  ;;  %v8235_v16 = vld [vmem:[#allocation8 + $0xd0] sm:$0xf0] }
 0x33f   :  { %5646 = vmatpush.bf16.msra.mxu2 %v8410_v33  ;;  %5621 = vmatpush.bf16.msra.mxu0 %v8138_v43  ;;  %v9881_v33 = vld [vmem:[#allocation8 + $0x68c] sm:$0xf0]  ;;  %v3815_v40 = vadd.f32 %v10294_v42, %v3802_v48  ;;  %v8826_v43 = vor.u32 %v9845_v20, %v8825_v37  ;;  %v8810_v42 = vor.u32 %v9841_v52, %v8809_v47  ;;  %v8507_v48 = vld [vmem:[#allocation8 + $0x2f0] sm:$0xf0] }
 0x340   :  { %v8970_v6 = vor.u32 %v9881_v33, %v8969_v38  ;;  %v9925_v29 = vld [vmem:[#allocation8 + $0x7ec] sm:$0xf0]  ;;  %v8379_v38 = vld [vmem:[#allocation8 + $0x1f0] sm:$0xf0]  ;;  %v8254_v37 = vor.u32 %v9699_v27, %v8251_v31 }
 0x341   :  { %5659 = vmatpush.bf16.msra.mxu3 %v8538_v36  ;;  %5634 = vmatpush.bf16.msra.mxu1 %v8266_v54  ;;  %v8697_v36 = vld [vmem:[#allocation8 + $0x460] sm:$0xf]  ;;  %v8382_v20 = vor.u32 %v9731_v32, %v8379_v38  ;;  %v9921_v44 = vld [vmem:[#allocation8 + $0x7cc] sm:$0xf0]  ;;  %v8475_v49 = vld [vmem:[#allocation8 + $0x2b0] sm:$0xf0] }
 0x342   :  { %5622 = vmatmul.bf16.vlgmr.msra.gmra.mxu0 %v10307_v13  ;;  %v8698_v26 = vor.u32 %v9813_v35, %v8697_v36  ;;  %v8937_v54 = vld [vmem:[#allocation8 + $0x640] sm:$0xf]  ;;  %v8906_v35 = vor.u32 %v9865_v25, %v8905_v24  ;;  %v9917_v2 = vld [vmem:[#allocation8 + $0x7ac] sm:$0xf0]  ;;  %v8459_v24 = vld [vmem:[#allocation8 + $0x290] sm:$0xf0]  ;;  %v3918_v32 = vpop.f32.mrf.mxu1 }
 0x343   :  { %5647 = vmatpush.bf16.msra.mxu2 %v8394_v55  ;;  %5666 = vmatpush.bf16.msrb.mxu0 %v8762_v59  ;;  %v9873_v55 = vld [vmem:[#allocation8 + $0x64c] sm:$0xf0]  ;;  %v3828_v59 = vadd.f32 %v10296_v62, %v3815_v40  ;;  %v8777_v62 = vld [vmem:[#allocation8 + $0x500] sm:$0xf]  ;;  %v8187_v38 = vld [vmem:[#allocation8 + $0x70] sm:$0xf0] }
 0x344   :  { %5635 = vmatmul.bf16.vlgmr.msra.gmra.mxu1 %v10309_v15  ;;  %v8938_v61 = vor.u32 %v9873_v55, %v8937_v54  ;;  %v8778_v36 = vor.u32 %v9833_v23, %v8777_v62  ;;  %v8238_v55 = vor.u32 %v9695_v10, %v8235_v16  ;;  %v8478_v62 = vor.u32 %v9755_v4, %v8475_v49  ;;  %v9751_v23 = vld [vmem:[#allocation8 + $0x284] sm:$0xf]  ;;  %v9905_v10 = vld [vmem:[#allocation8 + $0x74c] sm:$0xf0]  ;;  %v8283_v4 = vld [vmem:[#allocation8 + $0x130] sm:$0xf0] }
 0x345   :  { %5660 = vmatpush.bf16.msra.mxu3 %v8522_v58  ;;  %5679 = vmatpush.bf16.msrb.mxu1 %v8890_v63  ;;  %v3855_v58 = vpop.f32.mrf.mxu0  ;;  %v8665_v63 = vld [vmem:[#allocation8 + $0x420] sm:$0xf]  ;;  %v3841_v21 = vadd.f32 %v10298_v5, %v3828_v59  ;;  %v9723_v59 = vld [vmem:[#allocation8 + $0x1a4] sm:$0xf]  ;;  %v8462_v31 = vor.u32 %v9751_v23, %v8459_v24 }
 0x346   :  { %5648 = vmatmul.bf16.vlgmr.msra.gmra.mxu2 %v10311_v53  ;;  %v9691_v58 = vld [vmem:[#allocation8 + $0xa4] sm:$0xf]  ;;  %v9033_v24 = vld [vmem:[#allocation8 + $0x700] sm:$0xf] }
 0x347   :  { %5692 = vmatpush.bf16.msrb.mxu2 %v9018_v1  ;;  %5667 = vmatpush.bf16.msrb.mxu0 %v8746_v45  ;;  %v9805_v1 = vld [vmem:[#allocation8 + $0x42c] sm:$0xf0]  ;;  %v650_v45 = vperm.slane %v10332_v12, 6  ;;  %v9735_v23 = vld [vmem:[#allocation8 + $0x204] sm:$0xf] }
 0x348   :  { %5661 = vmatmul.bf16.vlgmr.msra.gmra.mxu3 %v10313_v60  ;;  %v8666_v17 = vor.u32 %v9805_v1, %v8665_v63  ;;  %v8347_v63 = vld [vmem:[#allocation8 + $0x1b0] sm:$0xf0]  ;;  %v9113_v1 = vld [vmem:[#allocation8 + $0x7a0] sm:$0xf] }
 0x349   :  { %5680 = vmatpush.bf16.msrb.mxu1 %v8874_v18  ;;  %v8649_v18 = vld [vmem:[#allocation8 + $0x400] sm:$0xf]  ;;  %v3854_v30 = vadd.f32 %v10321_v34, %v650_v45  ;;  %v9727_v34 = vld [vmem:[#allocation8 + $0x1c4] sm:$0xf]  ;;  %v9114_v46 = vor.u32 %v9917_v2, %v9113_v1  ;;  %v8350_v45 = vor.u32 %v9723_v59, %v8347_v63  ;;  %v8155_v1 = vld [vmem:[#allocation8 + $0x30] sm:$0xf0] }
 0x34a   :  { %v9707_v2 = vld [vmem:[#allocation8 + $0x124] sm:$0xf]  ;;  %v3920_v49 = vpop.f32.mrf.mxu1 }
 0x34b   :  { %5693 = vmatpush.bf16.msrb.mxu2 %v9002_v19  ;;  %5668 = vmatpush.bf16.msrb.mxu0 %v8730_v3  ;;  %v9801_v19 = vld [vmem:[#allocation8 + $0x40c] sm:$0xf0]  ;;  %v3881_v3 = vpop.f32.mrf.mxu2  ;;  %v9815_v49 = vld [vmem:[#allocation8 + $0x484] sm:$0xf] }
 0x34c   :  { %v8650_v5 = vor.u32 %v9801_v19, %v8649_v18  ;;  %v9097_v18 = vld [vmem:[#allocation8 + $0x780] sm:$0xf]  ;;  %v9913_v19 = vld [vmem:[#allocation8 + $0x78c] sm:$0xf0] }
 0x34d   :  { %5681 = vmatpush.bf16.msrb.mxu1 %v8858_v28  ;;  %v3894_v28 = vpop.f32.mrf.mxu3  ;;  %v9098_v25 = vor.u32 %v9913_v19, %v9097_v18  ;;  %v9671_v18 = vld [vmem:[#allocation8 + $0x4] sm:$0xf]  ;;  %v8139_v19 = vld [vmem:[#allocation8 + $0x10] sm:$0xf0] }
 0x34e   :  { %v3905_v28 = vpop.f32.mrf.mxu0 }
 0x34f   :  { %5694 = vmatpush.bf16.msrb.mxu2 %v8986_v0  ;;  %5669 = vmatpush.bf16.msrb.mxu0 %v8714_v9  ;;  %v9145_v0 = vld [vmem:[#allocation8 + $0x7e0] sm:$0xf]  ;;  %v9763_v9 = vld [vmem:[#allocation8 + $0x2e4] sm:$0xf] }
 0x350   :  { %v9146_v33 = vor.u32 %v9925_v29, %v9145_v0  ;;  %v8510_v40 = vor.u32 %v9763_v9, %v8507_v48  ;;  %v9683_v0 = vld [vmem:[#allocation8 + $0x64] sm:$0xf]  ;;  %v9081_v29 = vld [vmem:[#allocation8 + $0x760] sm:$0xf]  ;;  %v8443_v48 = vld [vmem:[#allocation8 + $0x270] sm:$0xf0] }
 0x351   :  { %5682 = vmatpush.bf16.msrb.mxu1 %v8842_v41  ;;  %v4056_v41 = vmax.f32 %v10274_v14, 0.0  ;;  %v8491_v14 = vld [vmem:[#allocation8 + $0x2d0] sm:$0xf0]  ;;  %v9747_v9 = vld [vmem:[#allocation8 + $0x264] sm:$0xf] }
 0x352   :  { %5705 = vmatpush.bf16.msrb.mxu3 %v9146_v33  ;;  %v9715_v33 = vld [vmem:[#allocation8 + $0x164] sm:$0xf]  ;;  %v8446_v16 = vor.u32 %v9747_v9, %v8443_v48  ;;  %v9019_v9 = vld [vmem:[#allocation8 + $0x6f0] sm:$0xf0] }
 0x353   :  { %5695 = vmatpush.bf16.msrb.mxu2 %v8970_v6  ;;  %5670 = vmatpush.bf16.msrb.mxu0 %v8698_v26  ;;  %v4057_v6 = vmax.f32 %v3841_v21, 0.0  ;;  %v3867_v26 = vadd.f32 %v10324_v39, %v3854_v30  ;;  %v10339_v52 = vpack.c.bf16 %v4056_v41, %v4056_v41  ;;  %v8219_v39 = vld [vmem:[#allocation8 + $0xb0] sm:$0xf0]  ;;  %v9909_v30 = vld [vmem:[#allocation8 + $0x76c] sm:$0xf0] }
 0x354   :  { %v8222_v11 = vor.u32 %v9691_v58, %v8219_v39  ;;  %v8203_v21 = vld [vmem:[#allocation8 + $0x90] sm:$0xf0]  ;;  %v9082_v41 = vor.u32 %v9909_v30, %v9081_v29  ;;  %v9675_v39 = vld [vmem:[#allocation8 + $0x24] sm:$0xf] }
 0x355   :  { %5683 = vmatpush.bf16.msrb.mxu1 %v8826_v43  ;;  %v8363_v43 = vld [vmem:[#allocation8 + $0x1d0] sm:$0xf0]  ;;  %v10341_v54 = vpack.c.bf16 %v4057_v6, %v4057_v6  ;;  %v9827_v30 = vld [vmem:[#allocation8 + $0x4e4] sm:$0xf] }
 0x356   :  { %v3907_v59 = vpop.f32.mrf.mxu0  ;;  %v8635_v29 = vld [vmem:[#allocation8 + $0x3f0] sm:$0xf0] }
 0x357   :  { %5696 = vmatpush.bf16.msrb.mxu2 %v8954_v8  ;;  %5671 = vmatpush.bf16.msrb.mxu0 %v8682_v50  ;;  %v9129_v8 = vld [vmem:[#allocation8 + $0x7c0] sm:$0xf]  ;;  %v8366_v50 = vor.u32 %v9727_v34, %v8363_v43  ;;  %v3931_v34 = vpop.f32.mrf.mxu2  ;;  %v8299_v43 = vld [vmem:[#allocation8 + $0x150] sm:$0xf0] }
 0x358   :  { %v9130_v47 = vor.u32 %v9921_v44, %v9129_v8  ;;  %v3944_v44 = vpop.f32.mrf.mxu3  ;;  %v8859_v59 = vld [vmem:[#allocation8 + $0x5b0] sm:$0xf0] }
 0x359   :  { %5684 = vmatpush.bf16.msrb.mxu1 %v8810_v42  ;;  %v3880_v42 = vadd.f32 %v10327_v51, %v3867_v26  ;;  %v8171_v26 = vld [vmem:[#allocation8 + $0x50] sm:$0xf0] }
 0x35a   :  { %5706 = vmatpush.bf16.msrb.mxu3 %v9130_v47 }
 0x35b   :  { %5697 = vmatpush.bf16.msrb.mxu2 %v8938_v61  ;;  %5672 = vmatpush.bf16.msrb.mxu0 %v8666_v17  ;;  %v8494_v61 = vor.u32 %v9759_v57, %v8491_v14  ;;  %v9687_v17 = vld [vmem:[#allocation8 + $0x84] sm:$0xf]  ;;  %v3893_v51 = vadd.f32 %v10329_v56, %v3880_v42  ;;  %v8427_v14 = vld [vmem:[#allocation8 + $0x250] sm:$0xf0]  ;;  %v9049_v42 = vld [vmem:[#allocation8 + $0x720] sm:$0xf] }
 0x35c   :  { %v8206_v3 = vor.u32 %v9687_v17, %v8203_v21  ;;  %v9743_v57 = vld [vmem:[#allocation8 + $0x244] sm:$0xf] }
 0x35d   :  { %5685 = vmatpush.bf16.msrb.mxu1 %v8794_v7  ;;  %v9719_v7 = vld [vmem:[#allocation8 + $0x184] sm:$0xf]  ;;  %v3906_v56 = vadd.f32 %v3905_v28, %v3893_v51  ;;  %v8430_v63 = vor.u32 %v9743_v57, %v8427_v14 }
 0x35e   :  { %5707 = vmatpush.bf16.msrb.mxu3 %v9114_v46  ;;  %v9703_v51 = vld [vmem:[#allocation8 + $0x104] sm:$0xf] }
 0x35f   :  { %5698 = vmatpush.bf16.msrb.mxu2 %v8922_v22  ;;  %5673 = vmatpush.bf16.msrb.mxu0 %v8650_v5  ;;  %v8331_v22 = vld [vmem:[#allocation8 + $0x190] sm:$0xf0]  ;;  %v3919_v6 = vadd.f32 %v3918_v32, %v3906_v56  ;;  %v3933_v28 = vpop.f32.mrf.mxu2  ;;  %v9859_v56 = vld [vmem:[#allocation8 + $0x5e4] sm:$0xf] }
 0x360   :  { %v8334_v27 = vor.u32 %v9719_v7, %v8331_v22  ;;  %v8315_v5 = vld [vmem:[#allocation8 + $0x170] sm:$0xf0]  ;;  %v8158_v7 = vor.u32 %v9675_v39, %v8155_v1  ;;  %v8286_v22 = vor.u32 %v9707_v2, %v8283_v4  ;;  %v3946_v32 = vpop.f32.mrf.mxu3  ;;  %v9851_v39 = vld [vmem:[#allocation8 + $0x5a4] sm:$0xf] }
 0x361   :  { %5686 = vmatpush.bf16.msrb.mxu1 %v8778_v36  ;;  %v8190_v36 = vor.u32 %v9683_v0, %v8187_v38  ;;  %v3932_v8 = vadd.f32 %v3931_v34, %v3919_v6  ;;  %v9795_v0 = vld [vmem:[#allocation8 + $0x3e4] sm:$0xf]  ;;  %v8603_v1 = vld [vmem:[#allocation8 + $0x3b0] sm:$0xf0] }
 0x362   :  { %5674 = vmatmul.bf16.vlgmr.msrb.gmra.mxu0 %v10339_v52  ;;  %5708 = vmatpush.bf16.msrb.mxu3 %v9098_v25  ;;  %v9897_v25 = vld [vmem:[#allocation8 + $0x70c] sm:$0xf0]  ;;  %v8638_v48 = vor.u32 %v9795_v0, %v8635_v29  ;;  %v9855_v34 = vld [vmem:[#allocation8 + $0x5c4] sm:$0xf]  ;;  %v8827_v0 = vld [vmem:[#allocation8 + $0x570] sm:$0xf0] }
 0x363   :  { %5699 = vmatpush.bf16.msrb.mxu2 %v8906_v35  ;;  %5718 = vmatpush.bf16.msra.mxu0 %v8254_v37  ;;  %v8318_v35 = vor.u32 %v9715_v33, %v8315_v5  ;;  %v9679_v37 = vld [vmem:[#allocation8 + $0x44] sm:$0xf]  ;;  %v9034_v38 = vor.u32 %v9897_v25, %v9033_v24  ;;  %v8891_v33 = vld [vmem:[#allocation8 + $0x5f0] sm:$0xf0] }
 0x364   :  { %5687 = vmatmul.bf16.vlgmr.msrb.gmra.mxu1 %v10341_v54  ;;  %v9891_v5 = vld [vmem:[#allocation8 + $0x6e4] sm:$0xf]  ;;  %v8699_v25 = vld [vmem:[#allocation8 + $0x470] sm:$0xf0] }
 0x365   :  { %5731 = vmatpush.bf16.msra.mxu1 %v8382_v20  ;;  %v9065_v20 = vld [vmem:[#allocation8 + $0x740] sm:$0xf]  ;;  %v9811_v24 = vld [vmem:[#allocation8 + $0x464] sm:$0xf] }
 0x366   :  { %5709 = vmatpush.bf16.msrb.mxu3 %v9082_v41  ;;  %v9066_v47 = vor.u32 %v9905_v10, %v9065_v20  ;;  %v8142_v41 = vor.u32 %v9671_v18, %v8139_v19  ;;  %v8747_v20 = vld [vmem:[#allocation8 + $0x4d0] sm:$0xf0]  ;;  %v8894_v10 = vor.u32 %v9859_v56, %v8891_v33  ;;  %v9783_v18 = vld [vmem:[#allocation8 + $0x384] sm:$0xf]  ;;  %v10355_v56 = vpop.f32.mrf.mxu1 }
 0x367   :  { %5744 = vmatpush.bf16.msra.mxu2 %v8510_v40  ;;  %5719 = vmatpush.bf16.msra.mxu0 %v8238_v55  ;;  %v9711_v40 = vld [vmem:[#allocation8 + $0x144] sm:$0xf]  ;;  %v3945_v55 = vadd.f32 %v3944_v44, %v3932_v8  ;;  %v9003_v44 = vld [vmem:[#allocation8 + $0x6d0] sm:$0xf0] }
 0x368   :  { %v8302_v58 = vor.u32 %v9711_v40, %v8299_v43  ;;  %v8619_v40 = vld [vmem:[#allocation8 + $0x3d0] sm:$0xf0]  ;;  %v9887_v8 = vld [vmem:[#allocation8 + $0x6c4] sm:$0xf] }
 0x369   :  { %5732 = vmatpush.bf16.msra.mxu1 %v8366_v50  ;;  %v8174_v50 = vor.u32 %v9679_v37, %v8171_v26  ;;  %v4058_v46 = vmax.f32 %v3945_v55, 0.0  ;;  %v9823_v37 = vld [vmem:[#allocation8 + $0x4c4] sm:$0xf]  ;;  %v8875_v43 = vld [vmem:[#allocation8 + $0x5d0] sm:$0xf0] }
 0x36a   :  { %5710 = vmatpush.bf16.msrb.mxu3 %v9066_v47  ;;  %v9791_v26 = vld [vmem:[#allocation8 + $0x3c4] sm:$0xf]  ;;  %v8750_v14 = vor.u32 %v9823_v37, %v8747_v20  ;;  %v8731_v55 = vld [vmem:[#allocation8 + $0x4b0] sm:$0xf0] }
 0x36b   :  { %5745 = vmatpush.bf16.msra.mxu2 %v8494_v61  ;;  %5720 = vmatpush.bf16.msra.mxu0 %v8222_v11  ;;  %v9901_v61 = vld [vmem:[#allocation8 + $0x72c] sm:$0xf0]  ;;  %v9739_v11 = vld [vmem:[#allocation8 + $0x224] sm:$0xf]  ;;  %v10347_v21 = vpack.c.bf16 %v4058_v46, %v4058_v46  ;;  %v8622_v57 = vor.u32 %v9791_v26, %v8619_v40  ;;  %v8715_v46 = vld [vmem:[#allocation8 + $0x490] sm:$0xf0]  ;;  %v10359_v26 = vpop.f32.mrf.mxu3 }
 0x36c   :  { %v9050_v17 = vor.u32 %v9901_v61, %v9049_v42  ;;  %v9819_v47 = vld [vmem:[#allocation8 + $0x4a4] sm:$0xf]  ;;  %v8987_v61 = vld [vmem:[#allocation8 + $0x6b0] sm:$0xf0] }
 0x36d   :  { %5733 = vmatpush.bf16.msra.mxu1 %v8350_v45  ;;  %v8411_v45 = vld [vmem:[#allocation8 + $0x230] sm:$0xf0]  ;;  %5700 = vmatmul.bf16.vlgmr.msrb.gmra.mxu2 %v10347_v21  ;;  %v9883_v42 = vld [vmem:[#allocation8 + $0x6a4] sm:$0xf]  ;;  %v8734_v4 = vor.u32 %v9819_v47, %v8731_v55 }
 0x36e   :  { %5711 = vmatpush.bf16.msrb.mxu3 %v9050_v17  ;;  %v9847_v17 = vld [vmem:[#allocation8 + $0x584] sm:$0xf]  ;;  %v8587_v19 = vld [vmem:[#allocation8 + $0x390] sm:$0xf0] }
 0x36f   :  { %5746 = vmatpush.bf16.msra.mxu2 %v8478_v62  ;;  %5721 = vmatpush.bf16.msra.mxu0 %v8206_v3  ;;  %v8267_v62 = vld [vmem:[#allocation8 + $0x110] sm:$0xf0]  ;;  %v8414_v3 = vor.u32 %v9739_v11, %v8411_v45  ;;  %v8862_v11 = vor.u32 %v9851_v39, %v8859_v59  ;;  %v8990_v45 = vor.u32 %v9883_v42, %v8987_v61  ;;  %v9843_v28 = vld [vmem:[#allocation8 + $0x564] sm:$0xf]  ;;  %v3972_v59 = vpop.f32.mrf.mxu1 }
 0x370   :  { %v8270_v6 = vor.u32 %v9703_v51, %v8267_v62  ;;  %v8843_v51 = vld [vmem:[#allocation8 + $0x590] sm:$0xf0]  ;;  %v9879_v62 = vld [vmem:[#allocation8 + $0x684] sm:$0xf]  ;;  %v9722_v59 = vld [vmem:[#allocation8 + $0x194] sm:$0xf0] }
 0x371   :  { %5734 = vmatpush.bf16.msra.mxu1 %v8334_v27  ;;  %v8395_v27 = vld [vmem:[#allocation8 + $0x210] sm:$0xf0]  ;;  %v9875_v29 = vld [vmem:[#allocation8 + $0x664] sm:$0xf] }
 0x372   :  { %5712 = vmatpush.bf16.msrb.mxu3 %v9034_v38  ;;  %v9779_v32 = vld [vmem:[#allocation8 + $0x364] sm:$0xf]  ;;  %v8571_v38 = vld [vmem:[#allocation8 + $0x370] sm:$0xf0] }
 0x373   :  { %5747 = vmatpush.bf16.msra.mxu2 %v8462_v31  ;;  %5722 = vmatpush.bf16.msra.mxu0 %v8190_v36  ;;  %v8763_v31 = vld [vmem:[#allocation8 + $0x4f0] sm:$0xf0]  ;;  %v8398_v36 = vor.u32 %v9735_v23, %v8395_v27  ;;  %v8718_v23 = vor.u32 %v9815_v49, %v8715_v46  ;;  %v8574_v33 = vor.u32 %v9779_v32, %v8571_v38  ;;  %v9835_v47 = vld [vmem:[#allocation8 + $0x524] sm:$0xf] }
 0x374   :  { %v8555_v37 = vld [vmem:[#allocation8 + $0x350] sm:$0xf0]  ;;  %v9771_v42 = vld [vmem:[#allocation8 + $0x324] sm:$0xf] }
 0x375   :  { %5735 = vmatpush.bf16.msra.mxu1 %v8318_v35  ;;  %v8766_v35 = vor.u32 %v9827_v30, %v8763_v31  ;;  %v10352_v30 = vpop.f32.mrf.mxu0  ;;  %v8955_v31 = vld [vmem:[#allocation8 + $0x670] sm:$0xf0]  ;;  %v9831_v46 = vld [vmem:[#allocation8 + $0x504] sm:$0xf] }
 0x376   :  { %5757 = vmatpush.bf16.msra.mxu3 %v8638_v48  ;;  %v8683_v48 = vld [vmem:[#allocation8 + $0x450] sm:$0xf0] }
 0x377   :  { %5748 = vmatpush.bf16.msra.mxu2 %v8446_v16  ;;  %5723 = vmatpush.bf16.msra.mxu0 %v8174_v50  ;;  %v9022_v16 = vor.u32 %v9891_v5, %v9019_v9  ;;  %v8878_v50 = vor.u32 %v9855_v34, %v8875_v43  ;;  %v8702_v5 = vor.u32 %v9811_v24, %v8699_v25  ;;  %v9807_v9 = vld [vmem:[#allocation8 + $0x444] sm:$0xf]  ;;  %v8811_v20 = vld [vmem:[#allocation8 + $0x550] sm:$0xf0]  ;;  %v10357_v34 = vpop.f32.mrf.mxu2  ;;  %v9734_v24 = vld [vmem:[#allocation8 + $0x1f4] sm:$0xf0]  ;;  %v3998_v25 = vpop.f32.mrf.mxu3 }
 0x378   :  { %v8686_v43 = vor.u32 %v9807_v9, %v8683_v48  ;;  %v8795_v55 = vld [vmem:[#allocation8 + $0x530] sm:$0xf0]  ;;  %v9698_v48 = vld [vmem:[#allocation8 + $0xd4] sm:$0xf0] }
 0x379   :  { %5736 = vmatpush.bf16.msra.mxu1 %v8302_v58  ;;  %v9006_v58 = vor.u32 %v9887_v8, %v9003_v44  ;;  %v9803_v8 = vld [vmem:[#allocation8 + $0x424] sm:$0xf]  ;;  %v8667_v44 = vld [vmem:[#allocation8 + $0x430] sm:$0xf0] }
 0x37a   :  { %5758 = vmatpush.bf16.msra.mxu3 %v8622_v57  ;;  %v8923_v39 = vld [vmem:[#allocation8 + $0x630] sm:$0xf0] }
 0x37b   :  { %5749 = vmatpush.bf16.msra.mxu2 %v8430_v63  ;;  %5724 = vmatpush.bf16.msra.mxu0 %v8158_v7  ;;  %v9787_v63 = vld [vmem:[#allocation8 + $0x3a4] sm:$0xf]  ;;  %v8971_v7 = vld [vmem:[#allocation8 + $0x690] sm:$0xf0] }
 0x37c   :  { %v8606_v2 = vor.u32 %v9787_v63, %v8603_v1  ;;  %v8974_v27 = vor.u32 %v9879_v62, %v8971_v7  ;;  %v8539_v61 = vld [vmem:[#allocation8 + $0x330] sm:$0xf0]  ;;  %v651_v63 = vperm.slane %v10332_v12, 7  ;;  %v9767_v7 = vld [vmem:[#allocation8 + $0x304] sm:$0xf] }
 0x37d   :  { %5737 = vmatpush.bf16.msra.mxu1 %v8286_v22  ;;  %v8590_v22 = vor.u32 %v9783_v18, %v8587_v19  ;;  %v8542_v1 = vor.u32 %v9771_v42, %v8539_v61  ;;  %v8651_v49 = vld [vmem:[#allocation8 + $0x410] sm:$0xf0]  ;;  %v9863_v18 = vld [vmem:[#allocation8 + $0x604] sm:$0xf]  ;;  %v8385_v12 = vld [vmem:[#allocation8 + $0x1e8] sm:$0xf] }
 0x37e   :  { %5759 = vmatpush.bf16.msra.mxu3 %v8606_v2  ;;  %v8670_v2 = vor.u32 %v9803_v8, %v8667_v44  ;;  %v8907_v19 = vld [vmem:[#allocation8 + $0x610] sm:$0xf0]  ;;  %v3958_v32 = vadd.f32 %v10352_v30, %v651_v63  ;;  %v8225_v30 = vld [vmem:[#allocation8 + $0xa8] sm:$0xf]  ;;  %v9726_v8 = vld [vmem:[#allocation8 + $0x1b4] sm:$0xf0] }
 0x37f   :  { %5750 = vmatpush.bf16.msra.mxu2 %v8414_v3  ;;  %5725 = vmatpush.bf16.msra.mxu0 %v8142_v41  ;;  %v8846_v3 = vor.u32 %v9847_v17, %v8843_v51  ;;  %v8830_v41 = vor.u32 %v9843_v28, %v8827_v0  ;;  %v8779_v17 = vld [vmem:[#allocation8 + $0x510] sm:$0xf0]  ;;  %v8257_v51 = vld [vmem:[#allocation8 + $0xe8] sm:$0xf]  ;;  %v3985_v62 = vpop.f32.mrf.mxu2  ;;  %v9766_v0 = vld [vmem:[#allocation8 + $0x2f4] sm:$0xf0] }
 0x380   :  { %v8513_v28 = vld [vmem:[#allocation8 + $0x2e8] sm:$0xf]  ;;  %v9754_v61 = vld [vmem:[#allocation8 + $0x294] sm:$0xf0] }
 0x381   :  { %5738 = vmatpush.bf16.msra.mxu1 %v8270_v6  ;;  %v8958_v6 = vor.u32 %v9875_v29, %v8955_v31  ;;  %v8782_v29 = vor.u32 %v9831_v46, %v8779_v17  ;;  %v8910_v31 = vor.u32 %v9863_v18, %v8907_v19  ;;  %v8514_v9 = vor.u32 %v9766_v0, %v8513_v28  ;;  %v8481_v44 = vld [vmem:[#allocation8 + $0x2a8] sm:$0xf]  ;;  %v9718_v17 = vld [vmem:[#allocation8 + $0x174] sm:$0xf0] }
 0x382   :  { %5726 = vmatmul.bf16.vlgmr.msra.gmra.mxu0 %v10307_v13  ;;  %5760 = vmatpush.bf16.msra.mxu3 %v8590_v22  ;;  %v8523_v22 = vld [vmem:[#allocation8 + $0x310] sm:$0xf0]  ;;  %v8465_v42 = vld [vmem:[#allocation8 + $0x288] sm:$0xf] }
 0x383   :  { %5751 = vmatpush.bf16.msra.mxu2 %v8398_v36  ;;  %5770 = vmatpush.bf16.msrb.mxu0 %v8766_v35  ;;  %v9839_v36 = vld [vmem:[#allocation8 + $0x544] sm:$0xf]  ;;  %v8466_v46 = vor.u32 %v9754_v61, %v8465_v42  ;;  %v8449_v19 = vld [vmem:[#allocation8 + $0x268] sm:$0xf]  ;;  %v9862_v61 = vld [vmem:[#allocation8 + $0x5f4] sm:$0xf0] }
 0x384   :  { %5739 = vmatmul.bf16.vlgmr.msra.gmra.mxu1 %v10309_v15  ;;  %v9775_v35 = vld [vmem:[#allocation8 + $0x344] sm:$0xf]  ;;  %v8814_v57 = vor.u32 %v9839_v36, %v8811_v20  ;;  %v8497_v36 = vld [vmem:[#allocation8 + $0x2c8] sm:$0xf] }
 0x385   :  { %5783 = vmatpush.bf16.msrb.mxu1 %v8894_v10  ;;  %v9871_v10 = vld [vmem:[#allocation8 + $0x644] sm:$0xf]  ;;  %v8558_v40 = vor.u32 %v9775_v35, %v8555_v37  ;;  %v9762_v35 = vld [vmem:[#allocation8 + $0x2d4] sm:$0xf0]  ;;  %v3971_v37 = vadd.f32 %v10355_v56, %v3958_v32 }
 0x386   :  { %5752 = vmatmul.bf16.vlgmr.msra.gmra.mxu2 %v10311_v53  ;;  %5761 = vmatpush.bf16.msra.mxu3 %v8574_v33  ;;  %v8386_v33 = vor.u32 %v9734_v24, %v8385_v12  ;;  %v8305_v12 = vld [vmem:[#allocation8 + $0x148] sm:$0xf]  ;;  %v9714_v24 = vld [vmem:[#allocation8 + $0x154] sm:$0xf0] }
 0x387   :  { %5796 = vmatpush.bf16.msrb.mxu2 %v9022_v16  ;;  %5771 = vmatpush.bf16.msrb.mxu0 %v8750_v14  ;;  %v8939_v16 = vld [vmem:[#allocation8 + $0x650] sm:$0xf0]  ;;  %v3984_v56 = vadd.f32 %v10357_v34, %v3971_v37  ;;  %v8193_v34 = vld [vmem:[#allocation8 + $0x68] sm:$0xf]  ;;  %v9742_v37 = vld [vmem:[#allocation8 + $0x234] sm:$0xf0] }
 0x388   :  { %v8942_v14 = vor.u32 %v9871_v10, %v8939_v16  ;;  %v8498_v16 = vor.u32 %v9762_v35, %v8497_v36  ;;  %v8417_v35 = vld [vmem:[#allocation8 + $0x228] sm:$0xf] }
 0x389   :  { %5784 = vmatpush.bf16.msrb.mxu1 %v8878_v50  ;;  %v9867_v50 = vld [vmem:[#allocation8 + $0x624] sm:$0xf]  ;;  %v3997_v63 = vadd.f32 %v10359_v26, %v3984_v56  ;;  %v8177_v26 = vld [vmem:[#allocation8 + $0x48] sm:$0xf]  ;;  %v9706_v56 = vld [vmem:[#allocation8 + $0x114] sm:$0xf0] }
 0x38a   :  { %5762 = vmatpush.bf16.msra.mxu3 %v8558_v40  ;;  %v9694_v40 = vld [vmem:[#allocation8 + $0xb4] sm:$0xf0] }
 0x38b   :  { %5797 = vmatpush.bf16.msrb.mxu2 %v9006_v58  ;;  %5772 = vmatpush.bf16.msrb.mxu0 %v8734_v4  ;;  %v3959_v58 = vpop.f32.mrf.mxu0  ;;  %v9799_v4 = vld [vmem:[#allocation8 + $0x404] sm:$0xf] }
 0x38c   :  { %v9690_v58 = vld [vmem:[#allocation8 + $0x94] sm:$0xf0] }
 0x38d   :  { %5785 = vmatpush.bf16.msrb.mxu1 %v8862_v11  ;;  %v8798_v11 = vor.u32 %v9835_v47, %v8795_v55  ;;  %v8209_v55 = vld [vmem:[#allocation8 + $0x88] sm:$0xf] }
 0x38e   :  { %5763 = vmatpush.bf16.msra.mxu3 %v8542_v1 }
 0x38f   :  { %5798 = vmatpush.bf16.msrb.mxu2 %v8990_v45  ;;  %5773 = vmatpush.bf16.msrb.mxu0 %v8718_v23  ;;  %v8926_v45 = vor.u32 %v9867_v50, %v8923_v39  ;;  %v9702_v23 = vld [vmem:[#allocation8 + $0xf4] sm:$0xf0]  ;;  %v8337_v39 = vld [vmem:[#allocation8 + $0x188] sm:$0xf] }
 0x390   :  { %v8258_v38 = vor.u32 %v9702_v23, %v8257_v51  ;;  %v9750_v51 = vld [vmem:[#allocation8 + $0x274] sm:$0xf0] }
 0x391   :  { %5786 = vmatpush.bf16.msrb.mxu1 %v8846_v3  ;;  %v8526_v3 = vor.u32 %v9767_v7, %v8523_v22  ;;  %v8450_v22 = vor.u32 %v9750_v51, %v8449_v19  ;;  %v9682_v23 = vld [vmem:[#allocation8 + $0x54] sm:$0xf0]  ;;  %v8753_v19 = vld [vmem:[#allocation8 + $0x4c8] sm:$0xf] }
 0x392   :  { %v8178_v32 = vor.u32 %v9682_v23, %v8177_v26  ;;  %v9826_v51 = vld [vmem:[#allocation8 + $0x4d4] sm:$0xf0] }
 0x393   :  { %5799 = vmatpush.bf16.msrb.mxu2 %v8974_v27  ;;  %5774 = vmatpush.bf16.msrb.mxu0 %v8702_v5  ;;  %v8654_v27 = vor.u32 %v9799_v4, %v8651_v49  ;;  %v8241_v5 = vld [vmem:[#allocation8 + $0xc8] sm:$0xf]  ;;  %v8338_v4 = vor.u32 %v9722_v59, %v8337_v39  ;;  %v9830_v39 = vld [vmem:[#allocation8 + $0x4f4] sm:$0xf0] }
 0x394   :  { %5764 = vmatpush.bf16.msra.mxu3 %v8526_v3  ;;  %v8242_v20 = vor.u32 %v9698_v48, %v8241_v5  ;;  %v8433_v3 = vld [vmem:[#allocation8 + $0x248] sm:$0xf]  ;;  %v9678_v48 = vld [vmem:[#allocation8 + $0x34] sm:$0xf0] }
 0x395   :  { %5787 = vmatpush.bf16.msrb.mxu1 %v8830_v41  ;;  %v8369_v41 = vld [vmem:[#allocation8 + $0x1c8] sm:$0xf]  ;;  %v9858_v26 = vld [vmem:[#allocation8 + $0x5d4] sm:$0xf0] }
 0x396   :  { %v8897_v59 = vld [vmem:[#allocation8 + $0x5e8] sm:$0xf]  ;;  %v9890_v23 = vld [vmem:[#allocation8 + $0x6d4] sm:$0xf0] }
 0x397   :  { %5800 = vmatpush.bf16.msrb.mxu2 %v8958_v6  ;;  %5775 = vmatpush.bf16.msrb.mxu0 %v8686_v43  ;;  %v9730_v6 = vld [vmem:[#allocation8 + $0x1d4] sm:$0xf0]  ;;  %v8353_v43 = vld [vmem:[#allocation8 + $0x1a8] sm:$0xf] }
 0x398   :  { %v8370_v10 = vor.u32 %v9730_v6, %v8369_v41  ;;  %v8354_v47 = vor.u32 %v9726_v8, %v8353_v43  ;;  %v8289_v41 = vld [vmem:[#allocation8 + $0x128] sm:$0xf]  ;;  %v9710_v6 = vld [vmem:[#allocation8 + $0x134] sm:$0xf0] }
 0x399   :  { %5788 = vmatpush.bf16.msrb.mxu1 %v8814_v57  ;;  %v9758_v57 = vld [vmem:[#allocation8 + $0x2b4] sm:$0xf0]  ;;  %v8290_v43 = vor.u32 %v9710_v6, %v8289_v41  ;;  %v8721_v6 = vld [vmem:[#allocation8 + $0x488] sm:$0xf] }
 0x39a   :  { %v8482_v50 = vor.u32 %v9758_v57, %v8481_v44  ;;  %v9674_v8 = vld [vmem:[#allocation8 + $0x14] sm:$0xf0]  ;;  %v8273_v44 = vld [vmem:[#allocation8 + $0x108] sm:$0xf]  ;;  %v8418_v57 = vor.u32 %v9742_v37, %v8417_v35 }
 0x39b   :  { %5801 = vmatpush.bf16.msrb.mxu2 %v8942_v14  ;;  %5776 = vmatpush.bf16.msrb.mxu0 %v8670_v2  ;;  %v8226_v14 = vor.u32 %v9694_v40, %v8225_v30  ;;  %v8210_v2 = vor.u32 %v9690_v58, %v8209_v55  ;;  %v8145_v30 = vld [vmem:[#allocation8 + $0x8] sm:$0xf] }
 0x39c   :  { %v8769_v58 = vld [vmem:[#allocation8 + $0x4e8] sm:$0xf] }
 0x39d   :  { %5789 = vmatpush.bf16.msrb.mxu1 %v8798_v11  ;;  %v9686_v11 = vld [vmem:[#allocation8 + $0x74] sm:$0xf0] }
 0x39e   :  { %v8194_v62 = vor.u32 %v9686_v11, %v8193_v34  ;;  %v8274_v34 = vor.u32 %v9706_v56, %v8273_v44  ;;  %v9083_v44 = vld [vmem:[#allocation8 + $0x770] sm:$0xf0] }
 0x39f   :  { %5802 = vmatpush.bf16.msrb.mxu2 %v8926_v45  ;;  %5777 = vmatpush.bf16.msrb.mxu0 %v8654_v27  ;;  %v4009_v1 = vpop.f32.mrf.mxu0  ;;  %v8321_v45 = vld [vmem:[#allocation8 + $0x168] sm:$0xf]  ;;  %v9746_v27 = vld [vmem:[#allocation8 + $0x254] sm:$0xf0] }
 0x3a0   :  { %v4010_v18 = vadd.f32 %v4009_v1, %v3997_v63  ;;  %v8322_v7 = vor.u32 %v9718_v17, %v8321_v45  ;;  %v9025_v63 = vld [vmem:[#allocation8 + $0x6e8] sm:$0xf]  ;;  %v9894_v1 = vld [vmem:[#allocation8 + $0x6f4] sm:$0xf0]  ;;  %v8770_v45 = vor.u32 %v9830_v39, %v8769_v58  ;;  %v8898_v17 = vor.u32 %v9862_v61, %v8897_v59 }
 0x3a1   :  { %5790 = vmatpush.bf16.msrb.mxu1 %v8782_v29  ;;  %v4022_v49 = vpop.f32.mrf.mxu1  ;;  %v8705_v58 = vld [vmem:[#allocation8 + $0x468] sm:$0xf]  ;;  %v9814_v39 = vld [vmem:[#allocation8 + $0x474] sm:$0xf0] }
 0x3a2   :  { %5778 = vmatmul.bf16.vlgmr.msrb.gmra.mxu0 %v10339_v52  ;;  %v4023_v25 = vadd.f32 %v4022_v49, %v4010_v18  ;;  %v9919_v49 = vld [vmem:[#allocation8 + $0x7c4] sm:$0xf]  ;;  %v9026_v18 = vor.u32 %v9894_v1, %v9025_v63  ;;  %v8833_v59 = vld [vmem:[#allocation8 + $0x568] sm:$0xf]  ;;  %v9846_v63 = vld [vmem:[#allocation8 + $0x574] sm:$0xf0] }
 0x3a3   :  { %5803 = vmatpush.bf16.msrb.mxu2 %v8910_v31  ;;  %5822 = vmatpush.bf16.msra.mxu0 %v8258_v38  ;;  %v8306_v38 = vor.u32 %v9714_v24, %v8305_v12  ;;  %v9915_v12 = vld [vmem:[#allocation8 + $0x7a4] sm:$0xf]  ;;  %v9115_v24 = vld [vmem:[#allocation8 + $0x7b0] sm:$0xf0]  ;;  %v8961_v1 = vld [vmem:[#allocation8 + $0x668] sm:$0xf] }
 0x3a4   :  { %5791 = vmatmul.bf16.vlgmr.msrb.gmra.mxu1 %v10341_v54 }
 0x3a5   :  { %5835 = vmatpush.bf16.msra.mxu1 %v8386_v33  ;;  %v8161_v33 = vld [vmem:[#allocation8 + $0x28] sm:$0xf] }
 0x3a6   :  { %5804 = vmatmul.bf16.vlgmr.msrb.gmra.mxu2 %v10347_v21  ;;  %v8162_v40 = vor.u32 %v9678_v48, %v8161_v33  ;;  %v9886_v33 = vld [vmem:[#allocation8 + $0x6b4] sm:$0xf0]  ;;  %v9099_v48 = vld [vmem:[#allocation8 + $0x790] sm:$0xf0] }
 0x3a7   :  { %5848 = vmatpush.bf16.msra.mxu2 %v8514_v9  ;;  %5823 = vmatpush.bf16.msra.mxu0 %v8242_v20  ;;  %v4011_v31 = vpop.f32.mrf.mxu0  ;;  %v8434_v9 = vor.u32 %v9746_v27, %v8433_v3  ;;  %v9923_v20 = vld [vmem:[#allocation8 + $0x7e4] sm:$0xf]  ;;  %v8737_v3 = vld [vmem:[#allocation8 + $0x4a8] sm:$0xf] }
 0x3a8   :  { %v9854_v31 = vld [vmem:[#allocation8 + $0x5b4] sm:$0xf0] }
 0x3a9   :  { %5836 = vmatpush.bf16.msra.mxu1 %v8370_v10  ;;  %v4035_v28 = vpop.f32.mrf.mxu2  ;;  %v4024_v5 = vpop.f32.mrf.mxu1  ;;  %v9147_v10 = vld [vmem:[#allocation8 + $0x7f0] sm:$0xf0] }
 0x3aa   :  { %v4036_v0 = vadd.f32 %v4035_v28, %v4023_v25  ;;  %v8754_v25 = vor.u32 %v9826_v51, %v8753_v19  ;;  %v10373_v5 = vld [vmem:[#allocation10] sm:$0xf]  ;;  %v8817_v19 = vld [vmem:[#allocation8 + $0x548] sm:$0xf] }
 0x3ab   :  { %5849 = vmatpush.bf16.msra.mxu2 %v8498_v16  ;;  %5824 = vmatpush.bf16.msra.mxu0 %v8226_v14  ;;  %v4048_v29 = vpop.f32.mrf.mxu3  ;;  %v8401_v14 = vld [vmem:[#allocation8 + $0x208] sm:$0xf]  ;;  %v4326_v37 = vperm.slane %v10373_v5, 0 }
 0x3ac   :  { %v4049_v36 = vadd.f32 %v4048_v29, %v4036_v0  ;;  %v9822_v0 = vld [vmem:[#allocation8 + $0x4b4] sm:$0xf0]  ;;  %v8865_v29 = vld [vmem:[#allocation8 + $0x5a8] sm:$0xf] }
 0x3ad   :  { %5837 = vmatpush.bf16.msra.mxu1 %v8354_v47  ;;  %v9738_v47 = vld [vmem:[#allocation8 + $0x214] sm:$0xf0]  ;;  %v8738_v41 = vor.u32 %v9822_v0, %v8737_v3 }
 0x3ae   :  { %v4059_v16 = vmax.f32 %v4049_v36, 0.0  ;;  %v8402_v11 = vor.u32 %v9738_v47, %v8401_v14  ;;  %v8866_v36 = vor.u32 %v9854_v31, %v8865_v29  ;;  %v8673_v31 = vld [vmem:[#allocation8 + $0x428] sm:$0xf] }
 0x3af   :  { %5850 = vmatpush.bf16.msra.mxu2 %v8482_v50  ;;  %5825 = vmatpush.bf16.msra.mxu0 %v8210_v2  ;;  %v9150_v50 = vor.u32 %v9923_v20, %v9147_v10  ;;  %v9818_v20 = vld [vmem:[#allocation8 + $0x494] sm:$0xf0]  ;;  %v8849_v10 = vld [vmem:[#allocation8 + $0x588] sm:$0xf] }
 0x3b0   :  { %v10369_v55 = vpack.c.bf16 %v4059_v16, %v4059_v16  ;;  %v9850_v16 = vld [vmem:[#allocation8 + $0x594] sm:$0xf0] }
 0x3b1   :  { %5838 = vmatpush.bf16.msra.mxu1 %v8338_v4  ;;  %v4037_v42 = vpop.f32.mrf.mxu2  ;;  %v8146_v4 = vor.u32 %v9674_v8, %v8145_v30  ;;  %v9907_v8 = vld [vmem:[#allocation8 + $0x764] sm:$0xf]  ;;  %v8850_v47 = vor.u32 %v9850_v16, %v8849_v10  ;;  %v9798_v10 = vld [vmem:[#allocation8 + $0x3f4] sm:$0xf0] }
 0x3b2   :  { %5713 = vmatmul.bf16.vlgmr.msrb.gmra.mxu3 %v10369_v55  ;;  %v9086_v61 = vor.u32 %v9907_v8, %v9083_v44  ;;  %v8785_v8 = vld [vmem:[#allocation8 + $0x508] sm:$0xf] }
 0x3b3   :  { %5851 = vmatpush.bf16.msra.mxu2 %v8466_v46  ;;  %5826 = vmatpush.bf16.msra.mxu0 %v8194_v62  ;;  %v4050_v2 = vpop.f32.mrf.mxu3  ;;  %v9131_v46 = vld [vmem:[#allocation8 + $0x7d0] sm:$0xf0]  ;;  %v8881_v62 = vld [vmem:[#allocation8 + $0x5c8] sm:$0xf] }
 0x3b4   :  { %5809 = vmatpush.bf16.msrb.mxu3 %v9150_v50  ;;  %v8882_v27 = vor.u32 %v9858_v26, %v8881_v62  ;;  %v9878_v2 = vld [vmem:[#allocation8 + $0x674] sm:$0xf0] }
 0x3b5   :  { %5839 = vmatpush.bf16.msra.mxu1 %v8322_v7  ;;  %v9134_v7 = vor.u32 %v9919_v49, %v9131_v46  ;;  %v8706_v46 = vor.u32 %v9814_v39, %v8705_v58  ;;  %v9842_v62 = vld [vmem:[#allocation8 + $0x554] sm:$0xf0]  ;;  %v8259_v58 = vld [vmem:[#allocation8 + $0xf8] sm:$0xf0]  ;;  %v9732_v39 = vld [vmem:[#allocation8 + $0x1ec] sm:$0xf] }
 0x3b6   :  { %v9874_v26 = vld [vmem:[#allocation8 + $0x654] sm:$0xf0]  ;;  %v8818_v0 = vor.u32 %v9842_v62, %v8817_v19  ;;  %v8243_v19 = vld [vmem:[#allocation8 + $0xd8] sm:$0xf0] }
 0x3b7   :  { %5852 = vmatpush.bf16.msra.mxu2 %v8450_v22  ;;  %5827 = vmatpush.bf16.msra.mxu0 %v8178_v32  ;;  %v9009_v22 = vld [vmem:[#allocation8 + $0x6c8] sm:$0xf]  ;;  %v9118_v32 = vor.u32 %v9915_v12, %v9115_v24 }
 0x3b8   :  { %v9010_v28 = vor.u32 %v9890_v23, %v9009_v22  ;;  %5810 = vmatpush.bf16.msrb.mxu3 %v9134_v7  ;;  %v8945_v7 = vld [vmem:[#allocation8 + $0x648] sm:$0xf]  ;;  %v9899_v22 = vld [vmem:[#allocation8 + $0x724] sm:$0xf]  ;;  %v9051_v23 = vld [vmem:[#allocation8 + $0x730] sm:$0xf0] }
 0x3b9   :  { %5840 = vmatpush.bf16.msra.mxu1 %v8306_v38  ;;  %v8993_v38 = vld [vmem:[#allocation8 + $0x6a8] sm:$0xf]  ;;  %v8946_v29 = vor.u32 %v9874_v26, %v8945_v7  ;;  %v8371_v7 = vld [vmem:[#allocation8 + $0x1d8] sm:$0xf0]  ;;  %v9760_v26 = vld [vmem:[#allocation8 + $0x2cc] sm:$0xf] }
 0x3ba   :  { %v8994_v35 = vor.u32 %v9886_v33, %v8993_v38  ;;  %v8801_v38 = vld [vmem:[#allocation8 + $0x528] sm:$0xf]  ;;  %v9054_v33 = vor.u32 %v9899_v22, %v9051_v23  ;;  %v8499_v22 = vld [vmem:[#allocation8 + $0x2d8] sm:$0xf0] }
 0x3bb   :  { %5853 = vmatpush.bf16.msra.mxu2 %v8434_v9  ;;  %5828 = vmatpush.bf16.msra.mxu0 %v8162_v40  ;;  %v9911_v9 = vld [vmem:[#allocation8 + $0x784] sm:$0xf]  ;;  %v8977_v40 = vld [vmem:[#allocation8 + $0x688] sm:$0xf] }
 0x3bc   :  { %5811 = vmatpush.bf16.msrb.mxu3 %v9118_v32  ;;  %v9102_v30 = vor.u32 %v9911_v9, %v9099_v48  ;;  %v9806_v32 = vld [vmem:[#allocation8 + $0x434] sm:$0xf0]  ;;  %v8929_v48 = vld [vmem:[#allocation8 + $0x628] sm:$0xf] }
 0x3bd   :  { %5841 = vmatpush.bf16.msra.mxu1 %v8290_v43  ;;  %v9882_v43 = vld [vmem:[#allocation8 + $0x694] sm:$0xf0]  ;;  %v8609_v23 = vld [vmem:[#allocation8 + $0x3a8] sm:$0xf] }
 0x3be   :  { %v8978_v50 = vor.u32 %v9882_v43, %v8977_v40  ;;  %v9838_v9 = vld [vmem:[#allocation8 + $0x534] sm:$0xf0]  ;;  %v8657_v40 = vld [vmem:[#allocation8 + $0x408] sm:$0xf] }
 0x3bf   :  { %5854 = vmatpush.bf16.msra.mxu2 %v8418_v57  ;;  %5829 = vmatpush.bf16.msra.mxu0 %v8146_v4  ;;  %v8722_v57 = vor.u32 %v9818_v20, %v8721_v6  ;;  %v5623_v56 = vpop.f32.mrf.mxu0  ;;  %v9903_v4 = vld [vmem:[#allocation8 + $0x744] sm:$0xf]  ;;  %v8641_v20 = vld [vmem:[#allocation8 + $0x3e8] sm:$0xf]  ;;  %v9802_v43 = vld [vmem:[#allocation8 + $0x414] sm:$0xf0] }
 0x3c0   :  { %5812 = vmatpush.bf16.msrb.mxu3 %v9102_v30  ;;  %v5624_v42 = vadd.f32 %v5623_v56, %v4326_v37  ;;  %v8674_v37 = vor.u32 %v9806_v32, %v8673_v31  ;;  %v8802_v30 = vor.u32 %v9838_v9, %v8801_v38  ;;  %v8913_v56 = vld [vmem:[#allocation8 + $0x608] sm:$0xf]  ;;  %v8355_v31 = vld [vmem:[#allocation8 + $0x1b8] sm:$0xf0]  ;;  %v9756_v32 = vld [vmem:[#allocation8 + $0x2ac] sm:$0xf] }
 0x3c1   :  { %5842 = vmatpush.bf16.msra.mxu1 %v8274_v34  ;;  %v5636_v14 = vpop.f32.mrf.mxu1  ;;  %v9067_v34 = vld [vmem:[#allocation8 + $0x750] sm:$0xf0]  ;;  %v8483_v38 = vld [vmem:[#allocation8 + $0x2b8] sm:$0xf0]  ;;  %v9786_v9 = vld [vmem:[#allocation8 + $0x394] sm:$0xf0] }
 0x3c2   :  { %5830 = vmatmul.bf16.vlgmr.msra.gmra.mxu0 %v10307_v13  ;;  %v5637_v49 = vadd.f32 %v5636_v14, %v5624_v42  ;;  %5765 = vmatmul.bf16.vlgmr.msra.gmra.mxu3 %v10313_v60  ;;  %v9070_v51 = vor.u32 %v9903_v4, %v9067_v34  ;;  %v9866_v14 = vld [vmem:[#allocation8 + $0x614] sm:$0xf0] }
 0x3c3   :  { %5855 = vmatpush.bf16.msra.mxu2 %v8402_v11  ;;  %5874 = vmatpush.bf16.msrb.mxu0 %v8770_v45  ;;  %v8834_v11 = vor.u32 %v9846_v63, %v8833_v59  ;;  %v8962_v45 = vor.u32 %v9878_v2, %v8961_v1  ;;  %v8387_v63 = vld [vmem:[#allocation8 + $0x1f8] sm:$0xf0]  ;;  %v9764_v1 = vld [vmem:[#allocation8 + $0x2ec] sm:$0xf]  ;;  %v8914_v34 = vor.u32 %v9866_v14, %v8913_v56 }
 0x3c4   :  { %5843 = vmatmul.bf16.vlgmr.msra.gmra.mxu1 %v10309_v15  ;;  %5813 = vmatpush.bf16.msrb.mxu3 %v9086_v61  ;;  %v8658_v61 = vor.u32 %v9802_v43, %v8657_v40  ;;  %v8515_v2 = vld [vmem:[#allocation8 + $0x2f8] sm:$0xf0]  ;;  %v8577_v43 = vld [vmem:[#allocation8 + $0x368] sm:$0xf] }
 0x3c5   :  { %5887 = vmatpush.bf16.msrb.mxu1 %v8898_v17  ;;  %v8689_v17 = vld [vmem:[#allocation8 + $0x448] sm:$0xf]  ;;  %v8467_v40 = vld [vmem:[#allocation8 + $0x298] sm:$0xf0] }
 0x3c6   :  { %5856 = vmatmul.bf16.vlgmr.msra.gmra.mxu2 %v10311_v53 }
 0x3c7   :  { %5900 = vmatpush.bf16.msrb.mxu2 %v9026_v18  ;;  %5875 = vmatpush.bf16.msrb.mxu0 %v8754_v25  ;;  %v9810_v18 = vld [vmem:[#allocation8 + $0x454] sm:$0xf0] }
 0x3c8   :  { %v8690_v25 = vor.u32 %v9810_v18, %v8689_v17  ;;  %5814 = vmatpush.bf16.msrb.mxu3 %v9070_v51  ;;  %v8518_v17 = vor.u32 %v9764_v1, %v8515_v2  ;;  %v9696_v18 = vld [vmem:[#allocation8 + $0xcc] sm:$0xf]  ;;  %v8451_v1 = vld [vmem:[#allocation8 + $0x278] sm:$0xf0] }
 0x3c9   :  { %5888 = vmatpush.bf16.msrb.mxu1 %v8882_v27  ;;  %v5649_v12 = vpop.f32.mrf.mxu2  ;;  %v5625_v27 = vpop.f32.mrf.mxu0  ;;  %v9728_v51 = vld [vmem:[#allocation8 + $0x1cc] sm:$0xf] }
 0x3ca   :  { %v5650_v3 = vadd.f32 %v5649_v12, %v5637_v49  ;;  %v8625_v49 = vld [vmem:[#allocation8 + $0x3c8] sm:$0xf]  ;;  %v9790_v12 = vld [vmem:[#allocation8 + $0x3b4] sm:$0xf0]  ;;  %v9692_v27 = vld [vmem:[#allocation8 + $0xac] sm:$0xf] }
 0x3cb   :  { %5901 = vmatpush.bf16.msrb.mxu2 %v9010_v28  ;;  %5876 = vmatpush.bf16.msrb.mxu0 %v8738_v41  ;;  %v5662_v24 = vpop.f32.mrf.mxu3  ;;  %v5638_v28 = vpop.f32.mrf.mxu1  ;;  %v9870_v41 = vld [vmem:[#allocation8 + $0x634] sm:$0xf0] }
 0x3cc   :  { %v10379_v6 = vadd.f32 %v5662_v24, %v5650_v3  ;;  %v8930_v16 = vor.u32 %v9870_v41, %v8929_v48  ;;  %5815 = vmatpush.bf16.msrb.mxu3 %v9054_v33  ;;  %v8246_v24 = vor.u32 %v9696_v18, %v8243_v19  ;;  %v8502_v3 = vor.u32 %v9760_v26, %v8499_v22  ;;  %v8227_v28 = vld [vmem:[#allocation8 + $0xb8] sm:$0xf0]  ;;  %v8593_v33 = vld [vmem:[#allocation8 + $0x388] sm:$0xf]  ;;  %v9774_v26 = vld [vmem:[#allocation8 + $0x334] sm:$0xf0] }
 0x3cd   :  { %5889 = vmatpush.bf16.msrb.mxu1 %v8866_v36  ;;  %v9895_v36 = vld [vmem:[#allocation8 + $0x704] sm:$0xf]  ;;  %v8230_v48 = vor.u32 %v9692_v27, %v8227_v28  ;;  %v8307_v19 = vld [vmem:[#allocation8 + $0x158] sm:$0xf0]  ;;  %v9708_v28 = vld [vmem:[#allocation8 + $0x12c] sm:$0xf] }
 0x3ce   :  { %v8163_v27 = vld [vmem:[#allocation8 + $0x38] sm:$0xf0] }
 0x3cf   :  { %5902 = vmatpush.bf16.msrb.mxu2 %v8994_v35  ;;  %5877 = vmatpush.bf16.msrb.mxu0 %v8722_v57  ;;  %v9035_v35 = vld [vmem:[#allocation8 + $0x710] sm:$0xf0]  ;;  %v9834_v57 = vld [vmem:[#allocation8 + $0x514] sm:$0xf0] }
 0x3d0   :  { %v9038_v44 = vor.u32 %v9895_v36, %v9035_v35  ;;  %v8786_v4 = vor.u32 %v9834_v57, %v8785_v8  ;;  %v8486_v36 = vor.u32 %v9756_v32, %v8483_v38  ;;  %v9688_v35 = vld [vmem:[#allocation8 + $0x8c] sm:$0xf]  ;;  %v9782_v8 = vld [vmem:[#allocation8 + $0x374] sm:$0xf0]  ;;  %v8419_v32 = vld [vmem:[#allocation8 + $0x238] sm:$0xf0] }
 0x3d1   :  { %5890 = vmatpush.bf16.msrb.mxu1 %v8850_v47  ;;  %v8642_v47 = vor.u32 %v9798_v10, %v8641_v20  ;;  %v5651_v59 = vpop.f32.mrf.mxu2  ;;  %v9720_v20 = vld [vmem:[#allocation8 + $0x18c] sm:$0xf]  ;;  %v8594_v10 = vor.u32 %v9786_v9, %v8593_v33  ;;  %v8529_v38 = vld [vmem:[#allocation8 + $0x308] sm:$0xf]  ;;  %v9770_v33 = vld [vmem:[#allocation8 + $0x314] sm:$0xf0] }
 0x3d2   :  { %5816 = vmatpush.bf16.msrb.mxu3 %v9038_v44  ;;  %v9716_v59 = vld [vmem:[#allocation8 + $0x16c] sm:$0xf] }
 0x3d3   :  { %5903 = vmatpush.bf16.msrb.mxu2 %v8978_v50  ;;  %5878 = vmatpush.bf16.msrb.mxu0 %v8706_v46  ;;  %v9700_v50 = vld [vmem:[#allocation8 + $0xec] sm:$0xf]  ;;  %v5664_v42 = vpop.f32.mrf.mxu3  ;;  %v9794_v46 = vld [vmem:[#allocation8 + $0x3d4] sm:$0xf0] }
 0x3d4   :  { %v8626_v62 = vor.u32 %v9794_v46, %v8625_v49  ;;  %v8578_v42 = vor.u32 %v9782_v8, %v8577_v43  ;;  %v8403_v43 = vld [vmem:[#allocation8 + $0x218] sm:$0xf0] }
 0x3d5   :  { %5891 = vmatpush.bf16.msrb.mxu1 %v8834_v11  ;;  %v8262_v11 = vor.u32 %v9700_v50, %v8259_v58  ;;  %5817 = vmatmul.bf16.vlgmr.msrb.gmra.mxu3 %v10369_v55  ;;  %v9684_v58 = vld [vmem:[#allocation8 + $0x6c] sm:$0xf] }
 0x3d6   :  { %5861 = vmatpush.bf16.msra.mxu3 %v8642_v47 }
 0x3d7   :  { %5904 = vmatpush.bf16.msrb.mxu2 %v8962_v45  ;;  %5879 = vmatpush.bf16.msrb.mxu0 %v8690_v25  ;;  %v8390_v45 = vor.u32 %v9732_v39, %v8387_v63  ;;  %v8374_v25 = vor.u32 %v9728_v51, %v8371_v7  ;;  %v8195_v39 = vld [vmem:[#allocation8 + $0x78] sm:$0xf0]  ;;  %v9748_v63 = vld [vmem:[#allocation8 + $0x26c] sm:$0xf]  ;;  %v8545_v7 = vld [vmem:[#allocation8 + $0x328] sm:$0xf] }
 0x3d8   :  { %v8198_v49 = vor.u32 %v9684_v58, %v8195_v39  ;;  %v8454_v46 = vor.u32 %v9748_v63, %v8451_v1  ;;  %v9744_v51 = vld [vmem:[#allocation8 + $0x24c] sm:$0xf]  ;;  %v9027_v58 = vld [vmem:[#allocation8 + $0x6f8] sm:$0xf0] }
 0x3d9   :  { %5892 = vmatpush.bf16.msrb.mxu1 %v8818_v0  ;;  %v9724_v0 = vld [vmem:[#allocation8 + $0x1ac] sm:$0xf] }
 0x3da   :  { %5862 = vmatpush.bf16.msra.mxu3 %v8626_v62  ;;  %v8358_v41 = vor.u32 %v9724_v0, %v8355_v31  ;;  %v8435_v62 = vld [vmem:[#allocation8 + $0x258] sm:$0xf0]  ;;  %v8546_v0 = vor.u32 %v9774_v26, %v8545_v7  ;;  %v9740_v31 = vld [vmem:[#allocation8 + $0x22c] sm:$0xf] }
 0x3db   :  { %5905 = vmatpush.bf16.msrb.mxu2 %v8946_v29  ;;  %5880 = vmatpush.bf16.msrb.mxu0 %v8674_v37  ;;  %v8610_v29 = vor.u32 %v9790_v12, %v8609_v23  ;;  %v8211_v37 = vld [vmem:[#allocation8 + $0x98] sm:$0xf0]  ;;  %v9820_v26 = vld [vmem:[#allocation8 + $0x4ac] sm:$0xf] }
 0x3dc   :  { %v8214_v57 = vor.u32 %v9688_v35, %v8211_v37  ;;  %v8422_v35 = vor.u32 %v9740_v31, %v8419_v32  ;;  %v9672_v37 = vld [vmem:[#allocation8 + $0xc] sm:$0xf] }
 0x3dd   :  { %5893 = vmatpush.bf16.msrb.mxu1 %v8802_v30  ;;  %v8339_v30 = vld [vmem:[#allocation8 + $0x198] sm:$0xf0] }
 0x3de   :  { %5863 = vmatpush.bf16.msra.mxu3 %v8610_v29  ;;  %v8342_v47 = vor.u32 %v9720_v20, %v8339_v30  ;;  %v8291_v29 = vld [vmem:[#allocation8 + $0x138] sm:$0xf0]  ;;  %v8530_v30 = vor.u32 %v9770_v33, %v8529_v38 }
 0x3df   :  { %5906 = vmatpush.bf16.msrb.mxu2 %v8930_v16  ;;  %5881 = vmatpush.bf16.msrb.mxu0 %v8658_v61  ;;  %v9752_v16 = vld [vmem:[#allocation8 + $0x28c] sm:$0xf]  ;;  %v5675_v44 = vpop.f32.mrf.mxu0  ;;  %v8323_v61 = vld [vmem:[#allocation8 + $0x178] sm:$0xf0] }
 0x3e0   :  { %v5676_v56 = vadd.f32 %v5675_v44, %v10379_v6  ;;  %v8470_v50 = vor.u32 %v9752_v16, %v8467_v40  ;;  %v8326_v6 = vor.u32 %v9716_v59, %v8323_v61  ;;  %v8147_v20 = vld [vmem:[#allocation8 + $0x18] sm:$0xf0]  ;;  %v9736_v40 = vld [vmem:[#allocation8 + $0x20c] sm:$0xf]  ;;  %v9137_v59 = vld [vmem:[#allocation8 + $0x7c8] sm:$0xf] }
 0x3e1   :  { %5894 = vmatpush.bf16.msrb.mxu1 %v8786_v4  ;;  %v5688_v14 = vpop.f32.mrf.mxu1  ;;  %v8561_v4 = vld [vmem:[#allocation8 + $0x348] sm:$0xf]  ;;  %v8275_v16 = vld [vmem:[#allocation8 + $0x118] sm:$0xf0]  ;;  %v9828_v44 = vld [vmem:[#allocation8 + $0x4ec] sm:$0xf]  ;;  %v8406_v61 = vor.u32 %v9736_v40, %v8403_v43 }
 0x3e2   :  { %5882 = vmatmul.bf16.vlgmr.msrb.gmra.mxu0 %v10339_v52  ;;  %5864 = vmatpush.bf16.msra.mxu3 %v8594_v10  ;;  %v10386_v2 = vadd.f32 %v5688_v14, %v5676_v56  ;;  %v9704_v10 = vld [vmem:[#allocation8 + $0x10c] sm:$0xf]  ;;  %v8150_v14 = vor.u32 %v9672_v37, %v8147_v20  ;;  %v8723_v33 = vld [vmem:[#allocation8 + $0x498] sm:$0xf0]  ;;  %v9910_v37 = vld [vmem:[#allocation8 + $0x774] sm:$0xf0] }
 0x3e3   :  { %5907 = vmatpush.bf16.msrb.mxu2 %v8914_v34  ;;  %5926 = vmatpush.bf16.msra.mxu0 %v8262_v11  ;;  %v9778_v34 = vld [vmem:[#allocation8 + $0x354] sm:$0xf0]  ;;  %v9680_v11 = vld [vmem:[#allocation8 + $0x4c] sm:$0xf]  ;;  %v8278_v39 = vor.u32 %v9704_v10, %v8275_v16 }
 0x3e4   :  { %5895 = vmatmul.bf16.vlgmr.msrb.gmra.mxu1 %v10341_v54  ;;  %v8562_v18 = vor.u32 %v9778_v34, %v8561_v4  ;;  %v9860_v56 = vld [vmem:[#allocation8 + $0x5ec] sm:$0xf] }
 0x3e5   :  { %5939 = vmatpush.bf16.msra.mxu1 %v8390_v45  ;;  %v8179_v45 = vld [vmem:[#allocation8 + $0x58] sm:$0xf0]  ;;  %v9824_v34 = vld [vmem:[#allocation8 + $0x4cc] sm:$0xf] }
 0x3e6   :  { %5908 = vmatmul.bf16.vlgmr.msrb.gmra.mxu2 %v10347_v21  ;;  %5865 = vmatpush.bf16.msra.mxu3 %v8578_v42  ;;  %v8182_v23 = vor.u32 %v9680_v11, %v8179_v45  ;;  %v9922_v42 = vld [vmem:[#allocation8 + $0x7d4] sm:$0xf0]  ;;  %v8883_v11 = vld [vmem:[#allocation8 + $0x5d8] sm:$0xf0]  ;;  %v9888_v45 = vld [vmem:[#allocation8 + $0x6cc] sm:$0xf] }
 0x3e7   :  { %5952 = vmatpush.bf16.msra.mxu2 %v8518_v17  ;;  %5927 = vmatpush.bf16.msra.mxu0 %v8246_v24  ;;  %v9712_v17 = vld [vmem:[#allocation8 + $0x14c] sm:$0xf]  ;;  %v5677_v22 = vpop.f32.mrf.mxu0 }
 0x3e8   :  { %v8310_v24 = vor.u32 %v9712_v17, %v8307_v19  ;;  %v9011_v17 = vld [vmem:[#allocation8 + $0x6d8] sm:$0xf0]  ;;  %v9918_v19 = vld [vmem:[#allocation8 + $0x7b4] sm:$0xf0] }
 0x3e9   :  { %5940 = vmatpush.bf16.msra.mxu1 %v8374_v25  ;;  %v5690_v12 = vpop.f32.mrf.mxu1  ;;  %v8438_v25 = vor.u32 %v9744_v51, %v8435_v62  ;;  %v9014_v7 = vor.u32 %v9888_v45, %v9011_v17  ;;  %v8739_v22 = vld [vmem:[#allocation8 + $0x4b8] sm:$0xf0]  ;;  %v9057_v45 = vld [vmem:[#allocation8 + $0x728] sm:$0xf]  ;;  %v9902_v17 = vld [vmem:[#allocation8 + $0x734] sm:$0xf0] }
 0x3ea   :  { %5866 = vmatpush.bf16.msra.mxu3 %v8562_v18  ;;  %v9121_v18 = vld [vmem:[#allocation8 + $0x7a8] sm:$0xf] }
 0x3eb   :  { %5953 = vmatpush.bf16.msra.mxu2 %v8502_v3  ;;  %5928 = vmatpush.bf16.msra.mxu0 %v8230_v48  ;;  %v9676_v3 = vld [vmem:[#allocation8 + $0x2c] sm:$0xf]  ;;  %v9153_v48 = vld [vmem:[#allocation8 + $0x7e8] sm:$0xf]  ;;  %v9122_v12 = vor.u32 %v9918_v19, %v9121_v18 }
 0x3ec   :  { %v8166_v9 = vor.u32 %v9676_v3, %v8163_v27  ;;  %v8995_v3 = vld [vmem:[#allocation8 + $0x6b8] sm:$0xf0]  ;;  %v9105_v27 = vld [vmem:[#allocation8 + $0x788] sm:$0xf] }
 0x3ed   :  { %5941 = vmatpush.bf16.msra.mxu1 %v8358_v41  ;;  %v9926_v41 = vld [vmem:[#allocation8 + $0x7f4] sm:$0xf0] }
 0x3ee   :  { %5867 = vmatpush.bf16.msra.mxu3 %v8546_v0  ;;  %v9154_v8 = vor.u32 %v9926_v41, %v9153_v48  ;;  %v8742_v0 = vor.u32 %v9820_v26, %v8739_v22  ;;  %v9880_v41 = vld [vmem:[#allocation8 + $0x68c] sm:$0xf]  ;;  %v8675_v22 = vld [vmem:[#allocation8 + $0x438] sm:$0xf0] }
 0x3ef   :  { %5954 = vmatpush.bf16.msra.mxu2 %v8486_v36  ;;  %5929 = vmatpush.bf16.msra.mxu0 %v8214_v57  ;;  %v8294_v36 = vor.u32 %v9708_v28, %v8291_v29  ;;  %v8771_v57 = vld [vmem:[#allocation8 + $0x4f8] sm:$0xf0]  ;;  %v9914_v28 = vld [vmem:[#allocation8 + $0x794] sm:$0xf0]  ;;  %v4327_v29 = vperm.slane %v10373_v5, 1 }
 0x3f0   :  { %v8774_v63 = vor.u32 %v9828_v44, %v8771_v57  ;;  %v5701_v38 = vpop.f32.mrf.mxu2  ;;  %v9106_v48 = vor.u32 %v9914_v28, %v9105_v27  ;;  %v8707_v44 = vld [vmem:[#allocation8 + $0x478] sm:$0xf0]  ;;  %v9844_v57 = vld [vmem:[#allocation8 + $0x56c] sm:$0xf]  ;;  %v9041_v27 = vld [vmem:[#allocation8 + $0x708] sm:$0xf] }
 0x3f1   :  { %5942 = vmatpush.bf16.msra.mxu1 %v8342_v47  ;;  %v8899_v47 = vld [vmem:[#allocation8 + $0x5f8] sm:$0xf0]  ;;  %v9804_v26 = vld [vmem:[#allocation8 + $0x42c] sm:$0xf]  ;;  %v9898_v28 = vld [vmem:[#allocation8 + $0x714] sm:$0xf0] }
 0x3f2   :  { %5868 = vmatpush.bf16.msra.mxu3 %v8530_v30  ;;  %v8902_v1 = vor.u32 %v9860_v56, %v8899_v47  ;;  %v8835_v56 = vld [vmem:[#allocation8 + $0x578] sm:$0xf0] }
 0x3f3   :  { %5955 = vmatpush.bf16.msra.mxu2 %v8470_v50  ;;  %5930 = vmatpush.bf16.msra.mxu0 %v8198_v49  ;;  %v9892_v50 = vld [vmem:[#allocation8 + $0x6ec] sm:$0xf]  ;;  %v8755_v49 = vld [vmem:[#allocation8 + $0x4d8] sm:$0xf0] }
 0x3f4   :  { %v9030_v4 = vor.u32 %v9892_v50, %v9027_v58  ;;  %v8758_v51 = vor.u32 %v9824_v34, %v8755_v49  ;;  %v8963_v47 = vld [vmem:[#allocation8 + $0x678] sm:$0xf0]  ;;  %v9073_v58 = vld [vmem:[#allocation8 + $0x748] sm:$0xf]  ;;  %v9840_v34 = vld [vmem:[#allocation8 + $0x54c] sm:$0xf] }
 0x3f5   :  { %5943 = vmatpush.bf16.msra.mxu1 %v8326_v6  ;;  %v9856_v6 = vld [vmem:[#allocation8 + $0x5cc] sm:$0xf]  ;;  %5869 = vmatmul.bf16.vlgmr.msra.gmra.mxu3 %v10313_v60 }
 0x3f6   :  { %5913 = vmatpush.bf16.msrb.mxu3 %v9154_v8  ;;  %v8886_v62 = vor.u32 %v9856_v6, %v8883_v11  ;;  %v9812_v8 = vld [vmem:[#allocation8 + $0x46c] sm:$0xf]  ;;  %v8819_v6 = vld [vmem:[#allocation8 + $0x558] sm:$0xf0] }
 0x3f7   :  { %5956 = vmatpush.bf16.msra.mxu2 %v8454_v46  ;;  %5931 = vmatpush.bf16.msra.mxu0 %v8182_v23  ;;  %v9138_v46 = vor.u32 %v9922_v42, %v9137_v59  ;;  %v9852_v23 = vld [vmem:[#allocation8 + $0x5ac] sm:$0xf]  ;;  %v8710_v59 = vor.u32 %v9812_v8, %v8707_v44  ;;  %v8838_v42 = vor.u32 %v9844_v57, %v8835_v56  ;;  %v8947_v11 = vld [vmem:[#allocation8 + $0x658] sm:$0xf0] }
 0x3f8   :  { %v9788_v44 = vld [vmem:[#allocation8 + $0x3ac] sm:$0xf]  ;;  %v8611_v57 = vld [vmem:[#allocation8 + $0x3b8] sm:$0xf0] }
 0x3f9   :  { %5944 = vmatpush.bf16.msra.mxu1 %v8310_v24  ;;  %v8867_v24 = vld [vmem:[#allocation8 + $0x5b8] sm:$0xf0]  ;;  %v8614_v56 = vor.u32 %v9788_v44, %v8611_v57 }
 0x3fa   :  { %5914 = vmatpush.bf16.msrb.mxu3 %v9138_v46  ;;  %v8870_v31 = vor.u32 %v9852_v23, %v8867_v24  ;;  %v9872_v46 = vld [vmem:[#allocation8 + $0x64c] sm:$0xf]  ;;  %v8803_v24 = vld [vmem:[#allocation8 + $0x538] sm:$0xf0] }
 0x3fb   :  { %5957 = vmatpush.bf16.msra.mxu2 %v8438_v25  ;;  %5932 = vmatpush.bf16.msra.mxu0 %v8166_v9  ;;  %v9884_v25 = vld [vmem:[#allocation8 + $0x6ac] sm:$0xf] }
 0x3fc   :  { %v8998_v32 = vor.u32 %v9884_v25, %v8995_v3  ;;  %v9848_v9 = vld [vmem:[#allocation8 + $0x58c] sm:$0xf]  ;;  %v8931_v3 = vld [vmem:[#allocation8 + $0x638] sm:$0xf0] }
 0x3fd   :  { %5945 = vmatpush.bf16.msra.mxu1 %v8294_v36  ;;  %v8979_v36 = vld [vmem:[#allocation8 + $0x698] sm:$0xf0]  ;;  %v9836_v23 = vld [vmem:[#allocation8 + $0x52c] sm:$0xf] }
 0x3fe   :  { %5915 = vmatpush.bf16.msrb.mxu3 %v9122_v12  ;;  %v8982_v43 = vor.u32 %v9880_v41, %v8979_v36  ;;  %v9058_v12 = vor.u32 %v9902_v17, %v9057_v45  ;;  %v9868_v25 = vld [vmem:[#allocation8 + $0x62c] sm:$0xf]  ;;  %v8787_v41 = vld [vmem:[#allocation8 + $0x518] sm:$0xf0] }
 0x3ff   :  { %5958 = vmatpush.bf16.msra.mxu2 %v8422_v35  ;;  %5933 = vmatpush.bf16.msra.mxu0 %v8150_v14  ;;  %v9089_v35 = vld [vmem:[#allocation8 + $0x768] sm:$0xf]  ;;  %v5727_v20 = vpop.f32.mrf.mxu0  ;;  %v9876_v14 = vld [vmem:[#allocation8 + $0x66c] sm:$0xf]  ;;  %v9155_v17 = vld [vmem:[#allocation8 + $0x7f8] sm:$0xf0] }
 0x400   :  { %v5728_v16 = vadd.f32 %v5727_v20, %v4327_v29  ;;  %v9796_v29 = vld [vmem:[#allocation8 + $0x3ec] sm:$0xf]  ;;  %v8915_v20 = vld [vmem:[#allocation8 + $0x618] sm:$0xf0] }
 0x401   :  { %5946 = vmatpush.bf16.msra.mxu1 %v8278_v39  ;;  %v5740_v10 = vpop.f32.mrf.mxu1  ;;  %v9906_v39 = vld [vmem:[#allocation8 + $0x754] sm:$0xf0]  ;;  %v9924_v45 = vld [vmem:[#allocation8 + $0x7ec] sm:$0xf] }
 0x402   :  { %5934 = vmatmul.bf16.vlgmr.msra.gmra.mxu0 %v10307_v13  ;;  %v9816_v13 = vld [vmem:[#allocation8 + $0x48c] sm:$0xf]  ;;  %5916 = vmatpush.bf16.msrb.mxu3 %v9106_v48  ;;  %v5741_v50 = vadd.f32 %v5740_v10, %v5728_v16  ;;  %v9074_v49 = vor.u32 %v9906_v39, %v9073_v58  ;;  %v8627_v16 = vld [vmem:[#allocation8 + $0x3d8] sm:$0xf0] }
 0x403   :  { %5959 = vmatpush.bf16.msra.mxu2 %v8406_v61  ;;  %5978 = vmatpush.bf16.msrb.mxu0 %v8774_v63  ;;  %v8726_v30 = vor.u32 %v9816_v13, %v8723_v33  ;;  %v8966_v61 = vor.u32 %v9876_v14, %v8963_v47  ;;  %v5703_v63 = vpop.f32.mrf.mxu2  ;;  %v9800_v13 = vld [vmem:[#allocation8 + $0x40c] sm:$0xf]  ;;  %v8659_v33 = vld [vmem:[#allocation8 + $0x418] sm:$0xf0] }
 0x404   :  { %5947 = vmatmul.bf16.vlgmr.msra.gmra.mxu1 %v10309_v15  ;;  %v10394_v15 = vadd.f32 %v5701_v38, %v10386_v2  ;;  %v9090_v2 = vor.u32 %v9910_v37, %v9089_v35  ;;  %v8934_v38 = vor.u32 %v9868_v25, %v8931_v3  ;;  %v9864_v37 = vld [vmem:[#allocation8 + $0x60c] sm:$0xf]  ;;  %v8662_v10 = vor.u32 %v9800_v13, %v8659_v33  ;;  %v8595_v47 = vld [vmem:[#allocation8 + $0x398] sm:$0xf0] }
 0x405   :  { %5991 = vmatpush.bf16.msrb.mxu1 %v8902_v1  ;;  %v9808_v1 = vld [vmem:[#allocation8 + $0x44c] sm:$0xf]  ;;  %v8579_v39 = vld [vmem:[#allocation8 + $0x378] sm:$0xf0] }
 0x406   :  { %5960 = vmatmul.bf16.vlgmr.msra.gmra.mxu2 %v10311_v53  ;;  %v8851_v53 = vld [vmem:[#allocation8 + $0x598] sm:$0xf0]  ;;  %5917 = vmatpush.bf16.msrb.mxu3 %v9090_v2  ;;  %v9784_v14 = vld [vmem:[#allocation8 + $0x38c] sm:$0xf] }
 0x407   :  { %6004 = vmatpush.bf16.msrb.mxu2 %v9030_v4  ;;  %5979 = vmatpush.bf16.msrb.mxu0 %v8758_v51  ;;  %v8854_v40 = vor.u32 %v9848_v9, %v8851_v53  ;;  %v8691_v4 = vld [vmem:[#allocation8 + $0x458] sm:$0xf0]  ;;  %v5729_v18 = vpop.f32.mrf.mxu0  ;;  %v9042_v9 = vor.u32 %v9898_v28, %v9041_v27  ;;  %v9832_v53 = vld [vmem:[#allocation8 + $0x50c] sm:$0xf]  ;;  %v4328_v27 = vperm.slane %v10373_v5, 2 }
 0x408   :  { %v8694_v51 = vor.u32 %v9808_v1, %v8691_v4  ;;  %v9780_v58 = vld [vmem:[#allocation8 + $0x36c] sm:$0xf]  ;;  %v8563_v1 = vld [vmem:[#allocation8 + $0x358] sm:$0xf0] }
 0x409   :  { %5992 = vmatpush.bf16.msrb.mxu1 %v8886_v62  ;;  %v5742_v19 = vpop.f32.mrf.mxu1  ;;  %v8822_v62 = vor.u32 %v9840_v34, %v8819_v6  ;;  %v9776_v63 = vld [vmem:[#allocation8 + $0x34c] sm:$0xf]  ;;  %v8547_v34 = vld [vmem:[#allocation8 + $0x338] sm:$0xf0] }
 0x40a   :  { %5918 = vmatpush.bf16.msrb.mxu3 %v9074_v49  ;;  %v9107_v25 = vld [vmem:[#allocation8 + $0x798] sm:$0xf0]  ;;  %v9908_v28 = vld [vmem:[#allocation8 + $0x76c] sm:$0xf] }
 0x40b   :  { %6005 = vmatpush.bf16.msrb.mxu2 %v9014_v7  ;;  %5980 = vmatpush.bf16.msrb.mxu0 %v8742_v0  ;;  %v8950_v7 = vor.u32 %v9872_v46, %v8947_v11  ;;  %v8678_v0 = vor.u32 %v9804_v26, %v8675_v22  ;;  %v5753_v48 = vpop.f32.mrf.mxu2  ;;  %v9768_v46 = vld [vmem:[#allocation8 + $0x30c] sm:$0xf]  ;;  %v8531_v11 = vld [vmem:[#allocation8 + $0x318] sm:$0xf0] }
 0x40c   :  { %v10396_v35 = vadd.f32 %v5753_v48, %v5741_v50  ;;  %v8598_v50 = vor.u32 %v9784_v14, %v8595_v47  ;;  %v8534_v18 = vor.u32 %v9768_v46, %v8531_v11  ;;  %v9916_v22 = vld [vmem:[#allocation8 + $0x7ac] sm:$0xf] }
 0x40d   :  { %5993 = vmatpush.bf16.msrb.mxu1 %v8870_v31  ;;  %v8643_v31 = vld [vmem:[#allocation8 + $0x3f8] sm:$0xf0] }
 0x40e   :  { %5919 = vmatpush.bf16.msrb.mxu3 %v9058_v12  ;;  %v8646_v36 = vor.u32 %v9796_v29, %v8643_v31 }
 0x40f   :  { %6006 = vmatpush.bf16.msrb.mxu2 %v8998_v32  ;;  %5981 = vmatpush.bf16.msrb.mxu0 %v8726_v30  ;;  %v8806_v32 = vor.u32 %v9836_v23, %v8803_v24  ;;  %v9792_v30 = vld [vmem:[#allocation8 + $0x3cc] sm:$0xf]  ;;  %v9123_v23 = vld [vmem:[#allocation8 + $0x7b8] sm:$0xf0] }
 0x410   :  { %v8630_v8 = vor.u32 %v9792_v30, %v8627_v16  ;;  %v9126_v12 = vor.u32 %v9916_v22, %v9123_v23  ;;  %v9912_v24 = vld [vmem:[#allocation8 + $0x78c] sm:$0xf] }
 0x411   :  { %5994 = vmatpush.bf16.msrb.mxu1 %v8854_v40  ;;  %v8790_v40 = vor.u32 %v9832_v53, %v8787_v41  ;;  %v9110_v3 = vor.u32 %v9912_v24, %v9107_v25  ;;  %v9900_v41 = vld [vmem:[#allocation8 + $0x72c] sm:$0xf] }
 0x412   :  { %5920 = vmatpush.bf16.msrb.mxu3 %v9042_v9  ;;  %v9904_v9 = vld [vmem:[#allocation8 + $0x74c] sm:$0xf] }
 0x413   :  { %6007 = vmatpush.bf16.msrb.mxu2 %v8982_v43  ;;  %5982 = vmatpush.bf16.msrb.mxu0 %v8710_v59  ;;  %v8918_v43 = vor.u32 %v9864_v37, %v8915_v20  ;;  %v5755_v2 = vpop.f32.mrf.mxu2 }
 0x415   :  { %5995 = vmatpush.bf16.msrb.mxu1 %v8838_v42  ;;  %5921 = vmatmul.bf16.vlgmr.msrb.gmra.mxu3 %v10369_v55 }
 0x416   :  { %5965 = vmatpush.bf16.msra.mxu3 %v8646_v36  ;;  %v9059_v36 = vld [vmem:[#allocation8 + $0x738] sm:$0xf0] }
 0x417   :  { %6008 = vmatpush.bf16.msrb.mxu2 %v8966_v61  ;;  %5983 = vmatpush.bf16.msrb.mxu0 %v8694_v51  ;;  %v8582_v61 = vor.u32 %v9780_v58, %v8579_v39  ;;  %v9158_v51 = vor.u32 %v9924_v45, %v9155_v17 }
 0x419   :  { %5996 = vmatpush.bf16.msrb.mxu1 %v8822_v62  ;;  %v9920_v62 = vld [vmem:[#allocation8 + $0x7cc] sm:$0xf] }
 0x41a   :  { %5966 = vmatpush.bf16.msra.mxu3 %v8630_v8  ;;  %v9043_v8 = vld [vmem:[#allocation8 + $0x718] sm:$0xf0] }
 0x41b   :  { %6009 = vmatpush.bf16.msrb.mxu2 %v8950_v7  ;;  %5984 = vmatpush.bf16.msrb.mxu0 %v8678_v0  ;;  %v9139_v7 = vld [vmem:[#allocation8 + $0x7d8] sm:$0xf0] }
 0x41c   :  { %v9142_v26 = vor.u32 %v9920_v62, %v9139_v7  ;;  %v9091_v0 = vld [vmem:[#allocation8 + $0x778] sm:$0xf0] }
 0x41d   :  { %5997 = vmatpush.bf16.msrb.mxu1 %v8806_v32  ;;  %v9094_v33 = vor.u32 %v9908_v28, %v9091_v0 }
 0x41e   :  { %5967 = vmatpush.bf16.msra.mxu3 %v8614_v56 }
 0x41f   :  { %6010 = vmatpush.bf16.msrb.mxu2 %v8934_v38  ;;  %5985 = vmatpush.bf16.msrb.mxu0 %v8662_v10  ;;  %v10402_v59 = vpop.f32.mrf.mxu0 }
 0x421   :  { %5998 = vmatpush.bf16.msrb.mxu1 %v8790_v40  ;;  %v10404_v42 = vpop.f32.mrf.mxu1  ;;  %v9062_v40 = vor.u32 %v9900_v41, %v9059_v36 }
 0x422   :  { %5986 = vmatmul.bf16.vlgmr.msrb.gmra.mxu0 %v10339_v52  ;;  %5968 = vmatpush.bf16.msra.mxu3 %v8598_v50  ;;  %v8566_v52 = vor.u32 %v9776_v63, %v8563_v1 }
 0x423   :  { %6011 = vmatpush.bf16.msrb.mxu2 %v8918_v43  ;;  %v9896_v43 = vld [vmem:[#allocation8 + $0x70c] sm:$0xf] }
 0x424   :  { %5999 = vmatmul.bf16.vlgmr.msrb.gmra.mxu1 %v10341_v54  ;;  %v9772_v54 = vld [vmem:[#allocation8 + $0x32c] sm:$0xf]  ;;  %v9046_v44 = vor.u32 %v9896_v43, %v9043_v8 }
 0x425   :  { %v8550_v6 = vor.u32 %v9772_v54, %v8547_v34 }
 0x426   :  { %6012 = vmatmul.bf16.vlgmr.msrb.gmra.mxu2 %v10347_v21  ;;  %5969 = vmatpush.bf16.msra.mxu3 %v8582_v61  ;;  %v6034_v61 = vld [vmem:[#allocation11] sm:$0xf] }
 0x427   :  { %v5781_v49 = vpop.f32.mrf.mxu0  ;;  %v6037_v34 = vperm.slane %v6034_v61, 1  ;;  %v6039_v43 = vperm.slane %v6034_v61, 3 }
 0x429   :  { %v10406_v4 = vpop.f32.mrf.mxu2  ;;  %v5794_v21 = vpop.f32.mrf.mxu1 }
 0x42a   :  { %5970 = vmatpush.bf16.msra.mxu3 %v8566_v52  ;;  %v6036_v52 = vperm.slane %v6034_v61, 0 }
 0x42e   :  { %5971 = vmatpush.bf16.msra.mxu3 %v8550_v6 }
 0x431   :  { %v5807_v19 = vpop.f32.mrf.mxu2 }
 0x432   :  { %5972 = vmatpush.bf16.msra.mxu3 %v8534_v18 }
 0x435   :  { %5973 = vmatmul.bf16.vlgmr.msra.gmra.mxu3 %v10313_v60  ;;  %v5714_v31 = vpop.f32.mrf.mxu3  ;;  %v9075_v60 = vld [vmem:[#allocation8 + $0x758] sm:$0xf0] }
 0x436   :  { %6017 = vmatpush.bf16.msrb.mxu3 %v9158_v51  ;;  %v5715_v13 = vadd.f32 %v5714_v31, %v10394_v15  ;;  %v9078_v53 = vor.u32 %v9904_v9, %v9075_v60 }
 0x438   :  { %v6030_v1 = vmax.f32 %v5715_v13, 0.0 }
 0x43a   :  { %6018 = vmatpush.bf16.msrb.mxu3 %v9142_v26  ;;  %v6044_v6 = vmul.f32 %v6036_v52, %v6030_v1 }
 0x43d   :  { %v5716_v30 = vpop.f32.mrf.mxu3 }
 0x43e   :  { %6019 = vmatpush.bf16.msrb.mxu3 %v9126_v12 }
 0x43f   :  { %v5831_v29 = vpop.f32.mrf.mxu0 }
 0x440   :  { %v5832_v32 = vadd.f32 %v5831_v29, %v4328_v27 }
 0x441   :  { %v5844_v38 = vpop.f32.mrf.mxu1 }
 0x442   :  { %6020 = vmatpush.bf16.msrb.mxu3 %v9110_v3  ;;  %v5845_v48 = vadd.f32 %v5844_v38, %v5832_v32 }
 0x445   :  { %v5766_v57 = vpop.f32.mrf.mxu3 }
 0x446   :  { %6021 = vmatpush.bf16.msrb.mxu3 %v9094_v33  ;;  %v5767_v2 = vadd.f32 %v5766_v57, %v10396_v35 }
 0x447   :  { %v5833_v10 = vpop.f32.mrf.mxu0 }
 0x448   :  { %v5780_v56 = vadd.f32 %v10402_v59, %v5767_v2  ;;  %v9937_v2 = vld [vmem:[#allocation2] ss:$0 sm:$0xff] }
 0x449   :  { %v5857_v37 = vpop.f32.mrf.mxu2  ;;  %v5846_v16 = vpop.f32.mrf.mxu1 }
 0x44a   :  { %v5858_v20 = vadd.f32 %v5857_v37, %v5845_v48  ;;  %6022 = vmatpush.bf16.msrb.mxu3 %v9078_v53  ;;  %v5793_v14 = vadd.f32 %v10404_v42, %v5780_v56 }
 0x44c   :  { %v5806_v47 = vadd.f32 %v10406_v4, %v5793_v14  ;;  %v4329_v4 = vperm.slane %v10373_v5, 3  ;;  %v6038_v5 = vperm.slane %v6034_v61, 2 }
 0x44d   :  { %v5768_v50 = vpop.f32.mrf.mxu3 }
 0x44e   :  { %6023 = vmatpush.bf16.msrb.mxu3 %v9062_v40 }
 0x451   :  { %v5859_v15 = vpop.f32.mrf.mxu2 }
 0x452   :  { %6024 = vmatpush.bf16.msrb.mxu3 %v9046_v44 }
 0x455   :  { %6025 = vmatmul.bf16.vlgmr.msrb.gmra.mxu3 %v10369_v55 }
 0x458   :  { %v5818_v63 = vpop.f32.mrf.mxu3 }
 0x459   :  { %v5819_v54 = vadd.f32 %v5818_v63, %v5806_v47 }
 0x45b   :  { %v6031_v49 = vmax.f32 %v5819_v54, 0.0 }
 0x45d   :  { %v6045_v59 = vmul.f32 %v6037_v34, %v6031_v49 }
 0x45f   :  { %v5883_v58 = vpop.f32.mrf.mxu0  ;;  %v6048_v55 = vadd.f32 %v6045_v59, %v6044_v6 }
 0x460   :  { %v5820_v11 = vpop.f32.mrf.mxu3 }
 0x461   :  { %v5896_v39 = vpop.f32.mrf.mxu1 }
 0x467   :  { %v5885_v35 = vpop.f32.mrf.mxu0 }
 0x469   :  { %v5909_v21 = vpop.f32.mrf.mxu2  ;;  %v5898_v46 = vpop.f32.mrf.mxu1 }
 0x471   :  { %v5911_v42 = vpop.f32.mrf.mxu2 }
 0x478   :  { %v5870_v51 = vpop.f32.mrf.mxu3 }
 0x479   :  { %v5871_v62 = vadd.f32 %v5870_v51, %v5858_v20 }
 0x47b   :  { %v5884_v7 = vadd.f32 %v5883_v58, %v5871_v62 }
 0x47d   :  { %v5897_v12 = vadd.f32 %v5896_v39, %v5884_v7 }
 0x47f   :  { %v5935_v45 = vpop.f32.mrf.mxu0  ;;  %v5910_v25 = vadd.f32 %v5909_v21, %v5897_v12 }
 0x480   :  { %v5936_v17 = vadd.f32 %v5935_v45, %v4329_v4  ;;  %v5872_v3 = vpop.f32.mrf.mxu3 }
 0x481   :  { %v5948_v18 = vpop.f32.mrf.mxu1 }
 0x482   :  { %v5949_v19 = vadd.f32 %v5948_v18, %v5936_v17 }
 0x487   :  { %v5937_v23 = vpop.f32.mrf.mxu0 }
 0x489   :  { %v5961_v26 = vpop.f32.mrf.mxu2  ;;  %v5950_v24 = vpop.f32.mrf.mxu1 }
 0x48a   :  { %v5962_v22 = vadd.f32 %v5961_v26, %v5949_v19 }
 0x491   :  { %v5963_v27 = vpop.f32.mrf.mxu2 }
 0x498   :  { %v5922_v29 = vpop.f32.mrf.mxu3 }
 0x499   :  { %v5923_v31 = vadd.f32 %v5922_v29, %v5910_v25 }
 0x49b   :  { %v6032_v32 = vmax.f32 %v5923_v31, 0.0 }
 0x49d   :  { %v6046_v33 = vmul.f32 %v6038_v5, %v6032_v32 }
 0x49f   :  { %v5987_v28 = vpop.f32.mrf.mxu0  ;;  %v6049_v60 = vadd.f32 %v6048_v55, %v6046_v33 }
 0x4a0   :  { %v5924_v48 = vpop.f32.mrf.mxu3 }
 0x4a1   :  { %v6000_v0 = vpop.f32.mrf.mxu1 }
 0x4a7   :  { %v5989_v13 = vpop.f32.mrf.mxu0 }
 0x4a9   :  { %v6013_v38 = vpop.f32.mrf.mxu2  ;;  %v6002_v9 = vpop.f32.mrf.mxu1 }
 0x4b1   :  { %v6015_v53 = vpop.f32.mrf.mxu2 }
 0x4b8   :  { %v5974_v41 = vpop.f32.mrf.mxu3 }
 0x4b9   :  { %v5975_v37 = vadd.f32 %v5974_v41, %v5962_v22 }
 0x4bb   :  { %v5988_v20 = vadd.f32 %v5987_v28, %v5975_v37 }
 0x4bd   :  { %v6001_v10 = vadd.f32 %v6000_v0, %v5988_v20 }
 0x4bf   :  { %v6014_v30 = vadd.f32 %v6013_v38, %v6001_v10 }
 0x4c0   :  { %v5976_v36 = vpop.f32.mrf.mxu3 }
 0x4d8   :  { %v6026_v16 = vpop.f32.mrf.mxu3 }
 0x4d9   :  { %v6027_v40 = vadd.f32 %v6026_v16, %v6014_v30 }
 0x4db   :  { %v6033_v8 = vmax.f32 %v6027_v40, 0.0 }
 0x4dd   :  { %v6047_v44 = vmul.f32 %v6039_v43, %v6033_v8 }
 0x4df   :  { %v6050_v15 = vadd.f32 %v6049_v60, %v6047_v44 }
 0x4e0   :  { %v6028_v57 = vpop.f32.mrf.mxu3 }
 0x4e1   :  { %6051 = vadd.xlane.f32.xlu0 %v6050_v15 }
 0x554   :  { %v6052_v56 = vpop.xlane.xlu0 %6051 }
 0x555   :  { %v6057_v14 = vadd.f32 %v9937_v2, %v6052_v56 }
 0x557   :  { %v6058_v47 = vsub.f32 0.0, %v6057_v14 }
 0x559   :  { %v6059_v50 = vmul.f32 1.442695, %v6058_v47 }
 0x55b   :  { %9938 = vpow2.f32 %v6059_v50 }
 0x561   :  { %v9939_v58 = vpop.eup %9938 }
 0x562   :  { %v6061_v39 = vadd.f32 1.0, %v9939_v58 }
 0x564   :  { %9940 = vrcp.f32 %v6061_v39  ;;  %v6073_v54 = vand.u32 2147483648, %v6061_v39  ;;  %v6071_v61 = vand.u32 2147483647, %v6061_v39  ;;  %vm6067_vm1 = vweird.f32 %v6061_v39 }
 0x566   :  { %v6074_v21 = vor.u32 1.1754944e-38, %v6073_v54  ;;  %vm6072_vm4 = vcmp.eq.f32.partialorder %v6071_v61, 8.507059e+37 }
 0x56a   :  { %v9941_v63 = vpop.eup %9940 }
 0x56b   :  { %v6063_v1 = vmul.f32 %v9941_v63, %v6061_v39  ;;  %vm6068_vm0 = vweird.f32 %v9941_v63 }
 0x56c   :  { %vm6069_vm2 = vmor %vm6067_vm1, %vm6068_vm0 }
 0x56d   :  { %v6064_v52 = vsub.f32 1.0, %v6063_v1 }
 0x56f   :  { %v6065_v34 = vmul.f32 %v9941_v63, %v6064_v52 }
 0x571   :  { %v6066_v49 = vadd.f32 %v9941_v63, %v6065_v34 }
 0x573   :  { %v6070_v35 = vsel %vm6069_vm2, %v9941_v63, %v6066_v49 }
 0x574   :  { %v6075_v6 = vsel %vm6072_vm4, %v6074_v21, %v6070_v35 }
 0x575   :  { %6078 = vst.msk [vmem:[%s10427_s7] sm:$0xff] %vm6077_vm3, %v6075_v6 }
 0x576   :  { %6083 = vsyncpa [#allocation4], 1 }
 0x577   :  { %6084 = vsyncpa [#allocation6], 1 }
 0x578   :  { %6085 = vsyncpa [#allocation9], 1 }
 0x579   :  { %6086 = vsyncpa [#allocation12], 1 }

</bundles_post_ra>
